<compile_context>
chip_gen: v7x
topology: tpu7x:2x2x1
jax: 0.10.0
libtpu: 0.0.40
codegen_flags: <defaults>
</compile_context>

<pallas_src>
import functools

import jax
import jax.numpy as jnp
from jax.experimental import pallas as pl
from jax.experimental.pallas import tpu as pltpu

ACT = "tanh"  # one of 'tanh' | 'sigm' | 'relu', matching the PyTorch `activation` dict


def _apply_act(y, act):
    if act == "tanh":
        return jnp.tanh(y)
    if act == "sigm":
        return jax.nn.sigmoid(y)
    if act == "relu":
        return jnp.maximum(y, 0.0)
    return y


def _full_specs(arrays):
    """Whole-array BlockSpecs (grid=(1,)); every array is tiny and lives fully in VMEM."""
    return [pl.BlockSpec(a.shape, lambda i, n=a.ndim: (0,) * n) for a in arrays]


# ---------------------------------------------------------------------------
# Generic GEMM kernels for the CNN
# ---------------------------------------------------------------------------

def _linear_kernel(x_ref, w_ref, b_ref, o_ref, *, act):
    y = jnp.dot(x_ref[...], w_ref[...], preferred_element_type=jnp.float32)
    o_ref[...] = _apply_act(y + b_ref[...], act)


def pallas_linear(x, w, b, act=None):
    """y = act(x @ w + b). Single whole-array block — at these sizes grid steps are pure
    overhead (see review).  bf16 operands, f32 accumulation."""
    M, K = x.shape
    N = w.shape[1]
    return pl.pallas_call(
        functools.partial(_linear_kernel, act=act),
        out_shape=jax.ShapeDtypeStruct((M, N), jnp.float32),
        grid=(1,),
        in_specs=[pl.BlockSpec((M, K), lambda i: (0, 0)),
                  pl.BlockSpec((K, N), lambda i: (0, 0)),
                  pl.BlockSpec((1, N), lambda i: (0, 0))],
        out_specs=pl.BlockSpec((M, N), lambda i: (0, 0)),
    )(x.astype(jnp.bfloat16), w.astype(jnp.bfloat16),
      b.reshape(1, N).astype(jnp.float32))


def _batched_linear_kernel(x_ref, w_ref, b_ref, o_ref, *, act):
    y = jnp.dot(x_ref[0], w_ref[0], preferred_element_type=jnp.float32)
    o_ref[0] = _apply_act(y + b_ref[0], act)


def pallas_batched_linear(x, w, b, act=None):
    """Per-tower GEMM: x (G,M,K) @ w (G,K,N) + b (G,1,N).  The tower axis is a 'parallel'
    grid dim so v7x runs encoder/decoder conv2 on separate TensorCores."""
    G, M, K = x.shape
    N = w.shape[-1]
    return pl.pallas_call(
        functools.partial(_batched_linear_kernel, act=act),
        out_shape=jax.ShapeDtypeStruct((G, M, N), jnp.float32),
        grid=(G,),
        in_specs=[pl.BlockSpec((1, M, K), lambda g: (g, 0, 0)),
                  pl.BlockSpec((1, K, N), lambda g: (g, 0, 0)),
                  pl.BlockSpec((1, 1, N), lambda g: (g, 0, 0))],
        out_specs=pl.BlockSpec((1, M, N), lambda g: (g, 0, 0)),
        compiler_params=pltpu.CompilerParams(dimension_semantics=("parallel",)),
    )(x.astype(jnp.bfloat16), w.astype(jnp.bfloat16), b.astype(jnp.float32))


# ---------------------------------------------------------------------------
# CNN: conv1 + conv2 for BOTH towers (shared/batched), conv3 folded into the LSTM kernels
# ---------------------------------------------------------------------------

def maxpool2d_nhwc(x, k, stride):
    # TODO(synk): 3x3/2 max-pool kept as one XLA reduce_window (tiny, memory-bound).
    return jax.lax.reduce_window(x, -jnp.inf, jax.lax.max,
                                 (1, k, k, 1), (1, stride, stride, 1), "VALID")


def cnn_conv3_patches_pair(occupancy, cnn_enc, cnn_dec):
    """Runs conv1 (+pool) once for both towers (weights concatenated along out-channels)
    and conv2 (+pool) as one model-axis-batched GEMM; returns the conv3 im2col patches per
    tower.  conv3 GEMM + tanh + (identity) adaptive-avg-pool are folded into the fused
    encoder/decoder kernels.
    # TODO(synk): im2col uses XLA conv_general_dilated_patches (channel-major ordering
    # matching PyTorch weight.reshape(Cout, -1)); no clean single-Pallas-op equivalent."""
    B = occupancy.shape[0]
    H = cnn_enc["w1"].shape[0]

    patches1 = jax.lax.conv_general_dilated_patches(
        occupancy, (7, 7), (2, 2), "VALID",
        dimension_numbers=("NCHW", "OIHW", "NHWC"))            # (B, H1, W1, Cin*49)
    _, H1, W1, K1 = patches1.shape
    w1 = jnp.concatenate([cnn_enc["w1"].reshape(H, K1).T,
                          cnn_dec["w1"].reshape(H, K1).T], axis=1)      # (K1, 2H)
    b1 = jnp.concatenate([cnn_enc["b1"], cnn_dec["b1"]], axis=0)        # (2H,)
    y = pallas_linear(patches1.reshape(B * H1 * W1, K1), w1, b1, ACT)   # (M1, 2H)
    y = maxpool2d_nhwc(y.reshape(B, H1, W1, 2 * H), 3, 2)
    # tower axis -> batch axis for the per-tower conv2/conv3
    y = jnp.concatenate([y[..., :H], y[..., H:]], axis=0)               # (2B, ., ., H)

    patches2 = jax.lax.conv_general_dilated_patches(
        y, (3, 3), (1, 1), "VALID", dimension_numbers=("NHWC", "OIHW", "NHWC"))
    _, H2, W2, K2 = patches2.shape
    w2 = jnp.stack([cnn_enc["w2"].reshape(H, K2).T,
                    cnn_dec["w2"].reshape(H, K2).T], axis=0)            # (2, K2, H)
    b2 = jnp.stack([cnn_enc["b2"].reshape(1, H),
                    cnn_dec["b2"].reshape(1, H)], axis=0)               # (2, 1, H)
    y2 = pallas_batched_linear(patches2.reshape(2, B * H2 * W2, K2), w2, b2, ACT)
    y2 = maxpool2d_nhwc(y2.reshape(2 * B, H2, W2, H), 3, 2)             # (2B, ., ., H)

    patches3 = jax.lax.conv_general_dilated_patches(
        y2, (3, 3), (1, 1), "VALID", dimension_numbers=("NHWC", "OIHW", "NHWC"))
    _, H3, W3, K3 = patches3.shape
    S3 = H3 * W3
    patches3 = patches3.reshape(2, B * S3, K3)
    return patches3[0], patches3[1], S3                                 # each (B*S3, K3)


# ---------------------------------------------------------------------------
# Fused per-tower kernels: conv3 feature + MLP + hoisted W_ih + LSTM + head
# ---------------------------------------------------------------------------

def _seq_precompute(xa_ref, xd_ref, p3_ref, w3_ref, b3_ref,
                    w1a_ref, w1d_ref, b1_ref, w2_ref, b2_ref,
                    wih1_ref, wih2_ref, bl_ref, *, B, S3, H, act):
    """Everything off the serial recurrence chain, as big GEMMs:
    MLP for all timesteps (input concat folded in via a row-split W1), the hoisted
    x1 @ W_ih projection, and the time-invariant CNN conv3 feature folded into an
    effective per-sequence gate bias.  All values stay in vregs."""
    h1 = _apply_act(
        jnp.dot(xa_ref[...], w1a_ref[...], preferred_element_type=jnp.float32)
        + jnp.dot(xd_ref[...], w1d_ref[...], preferred_element_type=jnp.float32)
        + b1_ref[...], act)
    x1 = _apply_act(
        jnp.dot(h1.astype(jnp.bfloat16), w2_ref[...],
                preferred_element_type=jnp.float32) + b2_ref[...], act)
    gates_x = jnp.dot(x1.astype(jnp.bfloat16), wih1_ref[...],
                      preferred_element_type=jnp.float32)               # (T*B, 4H)
    # conv3 + tanh; AdaptiveAvgPool2d((1,1)) is the identity when the conv3 output is 1x1
    y3 = _apply_act(
        jnp.dot(p3_ref[...], w3_ref[...], preferred_element_type=jnp.float32)
        + b3_ref[...], act)                                             # (B*S3, H)
    x2 = y3 if S3 == 1 else jnp.mean(y3.reshape(B, S3, H), axis=1)
    bias_eff = jnp.dot(x2.astype(jnp.bfloat16), wih2_ref[...],
                       preferred_element_type=jnp.float32) + bl_ref[...]  # (B, 4H)
    return gates_x, bias_eff


def _lstm_step(g, c, H):
    """One LSTM cell update (PyTorch gate order i, f, g, o); f32 throughout."""
    sg = jax.nn.sigmoid(g)
    gg = jnp.tanh(g[:, 2 * H:3 * H])          # tanh only on the g-gate quarter
    c = sg[:, H:2 * H] * c + sg[:, 0:H] * gg
    h = sg[:, 3 * H:4 * H] * jnp.tanh(c)
    return h, c


def _encoder_kernel(state_ref, depth_ref, eps_ref, p3_ref,
                    w3_ref, b3_ref, w1a_ref, w1d_ref, b1_ref, w2_ref, b2_ref,
                    wih1_ref, wih2_ref, bl_ref, whh_ref, wh_ref, bh_ref,
                    mean_ref, logvar_ref, z_ref, *, T, B, S3, H, Z, act):
    gates_x, bias_eff = _seq_precompute(
        state_ref, depth_ref, p3_ref, w3_ref, b3_ref, w1a_ref, w1d_ref,
        b1_ref, w2_ref, b2_ref, wih1_ref, wih2_ref, bl_ref,
        B=B, S3=S3, H=H, act=act)
    whh = whh_ref[...]          # f32 — the only op on the serial chain stays full precision
    wh = wh_ref[...]
    bh = bh_ref[...]
    h = jnp.zeros((B, H), jnp.float32)
    c = jnp.zeros((B, H), jnp.float32)
    for t in range(T):          # static unroll (T small); h/c never leave vregs
        g = (gates_x[t * B:(t + 1) * B, :] + bias_eff
             + jnp.dot(h, whh, preferred_element_type=jnp.float32))
        h, c = _lstm_step(g, c, H)
        # fused mean/log_var head (one (H,2Z) GEMM) + reparameterization, written straight
        # to tile-aligned (t, :, :) output slabs — no scratch, no concat.
        heads = jnp.dot(h.astype(jnp.bfloat16), wh,
                        preferred_element_type=jnp.float32) + bh
        means = heads[:, 0:Z]
        log_var = heads[:, Z:2 * Z]
        mean_ref[t] = means
        logvar_ref[t] = log_var
        z_ref[t] = eps_ref[t] * jnp.exp(0.5 * log_var) + means


def _decoder_kernel(z_ref, depth_ref, p3_ref,
                    w3_ref, b3_ref, w1a_ref, w1d_ref, b1_ref, w2_ref, b2_ref,
                    wih1_ref, wih2_ref, bl_ref, whh_ref, wo_ref, bo_ref,
                    out_ref, *, T, B, S3, H, act):
    gates_x, bias_eff = _seq_precompute(
        z_ref, depth_ref, p3_ref, w3_ref, b3_ref, w1a_ref, w1d_ref,
        b1_ref, w2_ref, b2_ref, wih1_ref, wih2_ref, bl_ref,
        B=B, S3=S3, H=H, act=act)
    whh = whh_ref[...]
    wo = wo_ref[...]
    bo = bo_ref[...]
    h = jnp.zeros((B, H), jnp.float32)
    c = jnp.zeros((B, H), jnp.float32)
    for t in range(T):
        g = (gates_x[t * B:(t + 1) * B, :] + bias_eff
             + jnp.dot(h, whh, preferred_element_type=jnp.float32))
        h, c = _lstm_step(g, c, H)
        out_ref[t] = jax.nn.sigmoid(
            jnp.dot(h.astype(jnp.bfloat16), wo,
                    preferred_element_type=jnp.float32) + bo)


def fused_encoder(state_tb, depth_tb, eps_t, p3, p, S3):
    T, B, Z = eps_t.shape
    H = p["lstm"]["whh"].shape[0]
    G = 4 * H
    K3 = p3.shape[-1]
    fc, lstm, cnn = p["fc"], p["lstm"], p["cnn"]
    args = (
        state_tb.astype(jnp.bfloat16), depth_tb.astype(jnp.bfloat16),
        eps_t.astype(jnp.float32), p3.astype(jnp.bfloat16),
        cnn["w3"].reshape(H, K3).T.astype(jnp.bfloat16),
        cnn["b3"].reshape(1, H).astype(jnp.float32),
        fc["w1a"].astype(jnp.bfloat16), fc["w1d"].astype(jnp.bfloat16),
        fc["b1"].reshape(1, H).astype(jnp.float32),
        fc["w2"].astype(jnp.bfloat16), fc["b2"].reshape(1, H).astype(jnp.float32),
        lstm["wih_x1"].astype(jnp.bfloat16), lstm["wih_x2"].astype(jnp.bfloat16),
        lstm["b"].reshape(1, G).astype(jnp.float32),
        lstm["whh"].astype(jnp.float32),
        p["w_heads"].astype(jnp.bfloat16),
        p["b_heads"].reshape(1, 2 * Z).astype(jnp.float32),
    )
    kernel = functools.partial(_encoder_kernel, T=T, B=B, S3=S3, H=H, Z=Z, act=ACT)
    return pl.pallas_call(
        kernel,
        out_shape=(jax.ShapeDtypeStruct((T, B, Z), jnp.float32),) * 3,
        grid=(1,),
        in_specs=_full_specs(args),
        out_specs=tuple(pl.BlockSpec((T, B, Z), lambda i: (0, 0, 0)) for _ in range(3)),
    )(*args)


def fused_decoder(z_tb, depth_tb, p3, p, S3):
    H = p["lstm"]["whh"].shape[0]
    G = 4 * H
    K3 = p3.shape[-1]
    B = p3.shape[0] // S3
    T = z_tb.shape[0] // B
    Ds = p["w_out"].shape[1]
    fc, lstm, cnn = p["fc"], p["lstm"], p["cnn"]
    args = (
        z_tb.astype(jnp.bfloat16), depth_tb.astype(jnp.bfloat16),
        p3.astype(jnp.bfloat16),
        cnn["w3"].reshape(H, K3).T.astype(jnp.bfloat16),
        cnn["b3"].reshape(1, H).astype(jnp.float32),
        fc["w1a"].astype(jnp.bfloat16), fc["w1d"].astype(jnp.bfloat16),
        fc["b1"].reshape(1, H).astype(jnp.float32),
        fc["w2"].astype(jnp.bfloat16), fc["b2"].reshape(1, H).astype(jnp.float32),
        lstm["wih_x1"].astype(jnp.bfloat16), lstm["wih_x2"].astype(jnp.bfloat16),
        lstm["b"].reshape(1, G).astype(jnp.float32),
        lstm["whh"].astype(jnp.float32),
        p["w_out"].astype(jnp.bfloat16),
        p["b_out"].reshape(1, Ds).astype(jnp.float32),
    )
    kernel = functools.partial(_decoder_kernel, T=T, B=B, S3=S3, H=H, act=ACT)
    return pl.pallas_call(
        kernel,
        out_shape=jax.ShapeDtypeStruct((T, B, Ds), jnp.float32),
        grid=(1,),
        in_specs=_full_specs(args),
        out_specs=pl.BlockSpec((T, B, Ds), lambda i: (0, 0, 0)),
    )(*args)


# ---------------------------------------------------------------------------
# Full forward (sequence tensors are time-major internally)
# ---------------------------------------------------------------------------

def seq_cvae_forward(state, occupancy, depth, eps, params):
    B, T, _ = state.shape
    Z = eps.shape[-1]
    to_tb = lambda x: jnp.transpose(x, (1, 0, 2)).reshape(T * B, x.shape[-1])
    state_tb, depth_tb = to_tb(state), to_tb(depth)
    eps_t = jnp.transpose(eps, (1, 0, 2))                               # (T, B, Z)

    p3_enc, p3_dec, s3 = cnn_conv3_patches_pair(
        occupancy, params["encoder"]["cnn"], params["decoder"]["cnn"])

    means, log_var, z = fused_encoder(state_tb, depth_tb, eps_t, p3_enc,
                                      params["encoder"], s3)            # (T, B, Z) each
    recon = fused_decoder(z.reshape(T * B, Z), depth_tb, p3_dec,
                          params["decoder"], s3)                        # (T, B, Ds)

    from_bt = lambda x: jnp.transpose(x, (1, 0, 2))
    return from_bt(recon), from_bt(means), from_bt(log_var), from_bt(z)


# ---------------------------------------------------------------------------
# Deterministic parameter init (shapes follow the PyTorch __init__)
# ---------------------------------------------------------------------------

def init_params(key, cfg):
    H = cfg["hidden_dim"]
    Z = cfg["latent_z_dim"]
    Cin = cfg["occ_channels"]
    Dd = cfg["depth_dim"]
    Ds = cfg["state_dim"]
    keys = iter(jax.random.split(key, 64))

    def nrm(shape, scale=0.1):
        return scale * jax.random.normal(next(keys), shape, dtype=jnp.float32)

    def cnn_p():
        return dict(w1=nrm((H, Cin, 7, 7)), b1=nrm((H,)),
                    w2=nrm((H, H, 3, 3)), b2=nrm((H,)),
                    w3=nrm((H, H, 3, 3)), b3=nrm((H,)))

    def fc_p(d_a):  # first MLP layer weight split by input rows: (x_a | depth)
        return dict(w1a=nrm((d_a, H)), w1d=nrm((Dd, H)), b1=nrm((H,)),
                    w2=nrm((H, H)), b2=nrm((H,)))

    def lstm_p():
        # W_ih stored transposed (in_dim, 4H), split into the x1 (MLP) / x2 (CNN) halves of
        # the concatenated LSTM input; bias is the combined b_ih + b_hh. Gate order i,f,g,o.
        return dict(wih_x1=nrm((H, 4 * H)), wih_x2=nrm((H, 4 * H)),
                    whh=nrm((H, 4 * H)), b=nrm((4 * H,)))

    encoder = dict(cnn=cnn_p(), fc=fc_p(Ds), lstm=lstm_p(),
                   # linear_means and linear_log_var fused into one (H, 2Z) head
                   w_heads=nrm((H, 2 * Z)), b_heads=nrm((2 * Z,)))
    decoder = dict(cnn=cnn_p(), fc=fc_p(Z), lstm=lstm_p(),
                   w_out=nrm((H, Ds)), b_out=nrm((Ds,)))
    return dict(encoder=encoder, decoder=decoder)


# ---------------------------------------------------------------------------
# Main
# ---------------------------------------------------------------------------

if __name__ == "__main__":
    # occ spatial must be >= 43 to survive conv7s2 -> pool3s2 -> conv3 -> pool3s2 -> conv3;
    # 48 gives a 1x1 conv3 output (AdaptiveAvgPool2d((1,1)) is then the identity).
    cfg = dict(hidden_dim=32, latent_z_dim=8, state_dim=6, depth_dim=10,
               occ_channels=4, occ_hw=48)
    B, T = 2, 8

    key = jax.random.PRNGKey(0)
    k_param, k_state, k_occ, k_depth, k_eps = jax.random.split(key, 5)

    params = init_params(k_param, cfg)
    state = jax.random.normal(k_state, (B, T, cfg["state_dim"]), dtype=jnp.float32)
    occupancy = jax.random.normal(
        k_occ, (B, cfg["occ_channels"], cfg["occ_hw"], cfg["occ_hw"]), dtype=jnp.float32)
    depth = jax.random.normal(k_depth, (B, T, cfg["depth_dim"]), dtype=jnp.float32)
    # eps plays the role of torch.randn([B, T, latent_z_dim]) inside the PyTorch forward
    eps = jax.random.normal(k_eps, (B, T, cfg["latent_z_dim"]), dtype=jnp.float32)

    recon, means, log_var, z = jax.jit(seq_cvae_forward)(
        state, occupancy, depth, eps, params)
    jax.block_until_ready((recon, means, log_var, z))

    assert recon.shape == (B, T, cfg["state_dim"])
    assert means.shape == (B, T, cfg["latent_z_dim"])
    assert log_var.shape == (B, T, cfg["latent_z_dim"])
    assert z.shape == (B, T, cfg["latent_z_dim"])
    assert bool(jnp.all(jnp.isfinite(recon)))
    print("KERNEL_OK")
</pallas_src>

<mosaic_0001>
module attributes {stable_mosaic.version = 11 : i64} {
  func.func @_linear_kernel(%arg0: i32, %arg1: memref<882x196xbf16, #tpu.memory_space<vmem>>, %arg2: memref<196x64xbf16, #tpu.memory_space<vmem>>, %arg3: memref<1x64xf32, #tpu.memory_space<vmem>>, %arg4: memref<882x64xf32, #tpu.memory_space<vmem>>) attributes {dimension_semantics = [#tpu.dimension_semantics<arbitrary>], iteration_bounds = array<i64: 1>, scalar_prefetch = 0 : i64, scratch_operands = 0 : i64, tpu.core_type = #tpu.core_type<tc>, window_params = [{pipeline_mode = #tpu.pipeline_mode<synchronous>, transform_indices = @transform_0, window_bounds = array<i64: 882, 196>}, {pipeline_mode = #tpu.pipeline_mode<synchronous>, transform_indices = @transform_1, window_bounds = array<i64: 196, 64>}, {pipeline_mode = #tpu.pipeline_mode<synchronous>, transform_indices = @transform_2, window_bounds = array<i64: 1, 64>}, {pipeline_mode = #tpu.pipeline_mode<synchronous>, transform_indices = @transform_3, window_bounds = array<i64: 882, 64>}]} {
    %c0 = arith.constant 0 : index
    %c0_0 = arith.constant 0 : index
    %0 = vector.load %arg1[%c0, %c0_0] : memref<882x196xbf16, #tpu.memory_space<vmem>>, vector<882x196xbf16>
    %c0_1 = arith.constant 0 : index
    %c0_2 = arith.constant 0 : index
    %1 = vector.load %arg2[%c0_1, %c0_2] : memref<196x64xbf16, #tpu.memory_space<vmem>>, vector<196x64xbf16>
    %cst = arith.constant dense<0.000000e+00> : vector<882x64xf32>
    %2 = tpu.matmul %0, %1, %cst {dimension_numbers = #tpu.dot_dimension_numbers<[1], [0], [0], [1], [0, 0, 1, 1], [], []>} : vector<882x196xbf16>, vector<196x64xbf16>, vector<882x64xf32> -> vector<882x64xf32>
    %c0_3 = arith.constant 0 : index
    %c0_4 = arith.constant 0 : index
    %3 = vector.load %arg3[%c0_3, %c0_4] : memref<1x64xf32, #tpu.memory_space<vmem>>, vector<1x64xf32>
    %4 = vector.broadcast %3 : vector<1x64xf32> to vector<882x64xf32>
    %5 = arith.addf %2, %4 : vector<882x64xf32>
    %6 = math.tanh %5 : vector<882x64xf32>
    %c0_5 = arith.constant 0 : index
    %c0_6 = arith.constant 0 : index
    %7 = vector.load %arg4[%c0_5, %c0_6] : memref<882x64xf32, #tpu.memory_space<vmem>>, vector<882x64xf32>
    tpu.vector_store %arg4[%c0_5, %c0_6], %6 {strides = array<i32>} : memref<882x64xf32, #tpu.memory_space<vmem>>, vector<882x64xf32>,
    return
  }
  func.func @transform_0(%arg0: i32) -> (i32, i32) {
    %c0_i32 = arith.constant 0 : i32
    %c0_i32_0 = arith.constant 0 : i32
    %c0_i32_1 = arith.constant 0 : i32
    return %c0_i32, %c0_i32_0 : i32, i32
  }
  func.func @transform_1(%arg0: i32) -> (i32, i32) {
    %c0_i32 = arith.constant 0 : i32
    %c0_i32_0 = arith.constant 0 : i32
    %c0_i32_1 = arith.constant 0 : i32
    return %c0_i32, %c0_i32_0 : i32, i32
  }
  func.func @transform_2(%arg0: i32) -> (i32, i32) {
    %c0_i32 = arith.constant 0 : i32
    %c0_i32_0 = arith.constant 0 : i32
    %c0_i32_1 = arith.constant 0 : i32
    return %c0_i32, %c0_i32_0 : i32, i32
  }
  func.func @transform_3(%arg0: i32) -> (i32, i32) {
    %c0_i32 = arith.constant 0 : i32
    %c0_i32_0 = arith.constant 0 : i32
    %c0_i32_1 = arith.constant 0 : i32
    return %c0_i32, %c0_i32_0 : i32, i32
  }
}

module attributes {stable_mosaic.version = 11 : i64} {
  func.func @_batched_linear_kernel(%arg0: i32, %arg1: memref<1x128x288xbf16, #tpu.memory_space<vmem>>, %arg2: memref<1x288x32xbf16, #tpu.memory_space<vmem>>, %arg3: memref<1x1x32xf32, #tpu.memory_space<vmem>>, %arg4: memref<1x128x32xf32, #tpu.memory_space<vmem>>) attributes {dimension_semantics = [#tpu.dimension_semantics<parallel>], iteration_bounds = array<i64: 2>, scalar_prefetch = 0 : i64, scratch_operands = 0 : i64, tpu.core_type = #tpu.core_type<tc>, window_params = [{transform_indices = @transform_0, window_bounds = array<i64: 1, 128, 288>}, {transform_indices = @transform_1, window_bounds = array<i64: 1, 288, 32>}, {transform_indices = @transform_2, window_bounds = array<i64: 1, 1, 32>}, {transform_indices = @transform_3, window_bounds = array<i64: 1, 128, 32>}]} {
    %c0 = arith.constant 0 : index
    %c0_0 = arith.constant 0 : index
    %c0_1 = arith.constant 0 : index
    %0 = vector.load %arg1[%c0, %c0_0, %c0_1] : memref<1x128x288xbf16, #tpu.memory_space<vmem>>, vector<1x128x288xbf16>
    %1 = vector.shape_cast %0 : vector<1x128x288xbf16> to vector<128x288xbf16>
    %c0_2 = arith.constant 0 : index
    %c0_3 = arith.constant 0 : index
    %c0_4 = arith.constant 0 : index
    %2 = vector.load %arg2[%c0_2, %c0_3, %c0_4] : memref<1x288x32xbf16, #tpu.memory_space<vmem>>, vector<1x288x32xbf16>
    %3 = vector.shape_cast %2 : vector<1x288x32xbf16> to vector<288x32xbf16>
    %cst = arith.constant dense<0.000000e+00> : vector<128x32xf32>
    %4 = tpu.matmul %1, %3, %cst {dimension_numbers = #tpu.dot_dimension_numbers<[1], [0], [0], [1], [0, 0, 1, 1], [], []>} : vector<128x288xbf16>, vector<288x32xbf16>, vector<128x32xf32> -> vector<128x32xf32>
    %c0_5 = arith.constant 0 : index
    %c0_6 = arith.constant 0 : index
    %c0_7 = arith.constant 0 : index
    %5 = vector.load %arg3[%c0_5, %c0_6, %c0_7] : memref<1x1x32xf32, #tpu.memory_space<vmem>>, vector<1x1x32xf32>
    %6 = vector.shape_cast %5 : vector<1x1x32xf32> to vector<1x32xf32>
    %7 = vector.broadcast %6 : vector<1x32xf32> to vector<128x32xf32>
    %8 = arith.addf %4, %7 : vector<128x32xf32>
    %9 = math.tanh %8 : vector<128x32xf32>
    %c0_8 = arith.constant 0 : index
    %c0_9 = arith.constant 0 : index
    %c0_10 = arith.constant 0 : index
    %10 = vector.load %arg4[%c0_8, %c0_9, %c0_10] : memref<1x128x32xf32, #tpu.memory_space<vmem>>, vector<1x128x32xf32>
    %11 = vector.shape_cast %10 : vector<1x128x32xf32> to vector<128x32xf32>
    %12 = vector.shape_cast %9 : vector<128x32xf32> to vector<1x128x32xf32>
    tpu.vector_store %arg4[%c0_8, %c0_9, %c0_10], %12 {strides = array<i32>} : memref<1x128x32xf32, #tpu.memory_space<vmem>>, vector<1x128x32xf32>,
    return
  }
  func.func @transform_0(%arg0: i32) -> (i32, i32, i32) {
    %c0_i32 = arith.constant 0 : i32
    %c0_i32_0 = arith.constant 0 : i32
    %c0_i32_1 = arith.constant 0 : i32
    return %arg0, %c0_i32, %c0_i32_0 : i32, i32, i32
  }
  func.func @transform_1(%arg0: i32) -> (i32, i32, i32) {
    %c0_i32 = arith.constant 0 : i32
    %c0_i32_0 = arith.constant 0 : i32
    %c0_i32_1 = arith.constant 0 : i32
    return %arg0, %c0_i32, %c0_i32_0 : i32, i32, i32
  }
  func.func @transform_2(%arg0: i32) -> (i32, i32, i32) {
    %c0_i32 = arith.constant 0 : i32
    %c0_i32_0 = arith.constant 0 : i32
    %c0_i32_1 = arith.constant 0 : i32
    return %arg0, %c0_i32, %c0_i32_0 : i32, i32, i32
  }
  func.func @transform_3(%arg0: i32) -> (i32, i32, i32) {
    %c0_i32 = arith.constant 0 : i32
    %c0_i32_0 = arith.constant 0 : i32
    %c0_i32_1 = arith.constant 0 : i32
    return %arg0, %c0_i32, %c0_i32_0 : i32, i32, i32
  }
}

module attributes {stable_mosaic.version = 11 : i64} {
  func.func @_encoder_kernel(%arg0: i32, %arg1: memref<16x6xbf16, #tpu.memory_space<vmem>>, %arg2: memref<16x10xbf16, #tpu.memory_space<vmem>>, %arg3: memref<8x2x8xf32, #tpu.memory_space<vmem>>, %arg4: memref<2x288xbf16, #tpu.memory_space<vmem>>, %arg5: memref<288x32xbf16, #tpu.memory_space<vmem>>, %arg6: memref<1x32xf32, #tpu.memory_space<vmem>>, %arg7: memref<6x32xbf16, #tpu.memory_space<vmem>>, %arg8: memref<10x32xbf16, #tpu.memory_space<vmem>>, %arg9: memref<1x32xf32, #tpu.memory_space<vmem>>, %arg10: memref<32x32xbf16, #tpu.memory_space<vmem>>, %arg11: memref<1x32xf32, #tpu.memory_space<vmem>>, %arg12: memref<32x128xbf16, #tpu.memory_space<vmem>>, %arg13: memref<32x128xbf16, #tpu.memory_space<vmem>>, %arg14: memref<1x128xf32, #tpu.memory_space<vmem>>, %arg15: memref<32x128xf32, #tpu.memory_space<vmem>>, %arg16: memref<32x16xbf16, #tpu.memory_space<vmem>>, %arg17: memref<1x16xf32, #tpu.memory_space<vmem>>, %arg18: memref<8x2x8xf32, #tpu.memory_space<vmem>>, %arg19: memref<8x2x8xf32, #tpu.memory_space<vmem>>, %arg20: memref<8x2x8xf32, #tpu.memory_space<vmem>>) attributes {dimension_semantics = [#tpu.dimension_semantics<arbitrary>], iteration_bounds = array<i64: 1>, scalar_prefetch = 0 : i64, scratch_operands = 0 : i64, tpu.core_type = #tpu.core_type<tc>, window_params = [{pipeline_mode = #tpu.pipeline_mode<synchronous>, transform_indices = @transform_0, window_bounds = array<i64: 16, 6>}, {pipeline_mode = #tpu.pipeline_mode<synchronous>, transform_indices = @transform_1, window_bounds = array<i64: 16, 10>}, {pipeline_mode = #tpu.pipeline_mode<synchronous>, transform_indices = @transform_2, window_bounds = array<i64: 8, 2, 8>}, {pipeline_mode = #tpu.pipeline_mode<synchronous>, transform_indices = @transform_3, window_bounds = array<i64: 2, 288>}, {pipeline_mode = #tpu.pipeline_mode<synchronous>, transform_indices = @transform_4, window_bounds = array<i64: 288, 32>}, {pipeline_mode = #tpu.pipeline_mode<synchronous>, transform_indices = @transform_5, window_bounds = array<i64: 1, 32>}, {pipeline_mode = #tpu.pipeline_mode<synchronous>, transform_indices = @transform_6, window_bounds = array<i64: 6, 32>}, {pipeline_mode = #tpu.pipeline_mode<synchronous>, transform_indices = @transform_7, window_bounds = array<i64: 10, 32>}, {pipeline_mode = #tpu.pipeline_mode<synchronous>, transform_indices = @transform_8, window_bounds = array<i64: 1, 32>}, {pipeline_mode = #tpu.pipeline_mode<synchronous>, transform_indices = @transform_9, window_bounds = array<i64: 32, 32>}, {pipeline_mode = #tpu.pipeline_mode<synchronous>, transform_indices = @transform_10, window_bounds = array<i64: 1, 32>}, {pipeline_mode = #tpu.pipeline_mode<synchronous>, transform_indices = @transform_11, window_bounds = array<i64: 32, 128>}, {pipeline_mode = #tpu.pipeline_mode<synchronous>, transform_indices = @transform_12, window_bounds = array<i64: 32, 128>}, {pipeline_mode = #tpu.pipeline_mode<synchronous>, transform_indices = @transform_13, window_bounds = array<i64: 1, 128>}, {pipeline_mode = #tpu.pipeline_mode<synchronous>, transform_indices = @transform_14, window_bounds = array<i64: 32, 128>}, {pipeline_mode = #tpu.pipeline_mode<synchronous>, transform_indices = @transform_15, window_bounds = array<i64: 32, 16>}, {pipeline_mode = #tpu.pipeline_mode<synchronous>, transform_indices = @transform_16, window_bounds = array<i64: 1, 16>}, {pipeline_mode = #tpu.pipeline_mode<synchronous>, transform_indices = @transform_17, window_bounds = array<i64: 8, 2, 8>}, {pipeline_mode = #tpu.pipeline_mode<synchronous>, transform_indices = @transform_18, window_bounds = array<i64: 8, 2, 8>}, {pipeline_mode = #tpu.pipeline_mode<synchronous>, transform_indices = @transform_19, window_bounds = array<i64: 8, 2, 8>}]} {
    %c0 = arith.constant 0 : index
    %c0_0 = arith.constant 0 : index
    %0 = vector.load %arg1[%c0, %c0_0] : memref<16x6xbf16, #tpu.memory_space<vmem>>, vector<16x6xbf16>
    %c0_1 = arith.constant 0 : index
    %c0_2 = arith.constant 0 : index
    %1 = vector.load %arg7[%c0_1, %c0_2] : memref<6x32xbf16, #tpu.memory_space<vmem>>, vector<6x32xbf16>
    %cst = arith.constant dense<0.000000e+00> : vector<16x32xf32>
    %2 = tpu.matmul %0, %1, %cst {dimension_numbers = #tpu.dot_dimension_numbers<[1], [0], [0], [1], [0, 0, 1, 1], [], []>} : vector<16x6xbf16>, vector<6x32xbf16>, vector<16x32xf32> -> vector<16x32xf32>
    %c0_3 = arith.constant 0 : index
    %c0_4 = arith.constant 0 : index
    %3 = vector.load %arg2[%c0_3, %c0_4] : memref<16x10xbf16, #tpu.memory_space<vmem>>, vector<16x10xbf16>
    %c0_5 = arith.constant 0 : index
    %c0_6 = arith.constant 0 : index
    %4 = vector.load %arg8[%c0_5, %c0_6] : memref<10x32xbf16, #tpu.memory_space<vmem>>, vector<10x32xbf16>
    %cst_7 = arith.constant dense<0.000000e+00> : vector<16x32xf32>
    %5 = tpu.matmul %3, %4, %cst_7 {dimension_numbers = #tpu.dot_dimension_numbers<[1], [0], [0], [1], [0, 0, 1, 1], [], []>} : vector<16x10xbf16>, vector<10x32xbf16>, vector<16x32xf32> -> vector<16x32xf32>
    %6 = arith.addf %2, %5 : vector<16x32xf32>
    %c0_8 = arith.constant 0 : index
    %c0_9 = arith.constant 0 : index
    %7 = vector.load %arg9[%c0_8, %c0_9] : memref<1x32xf32, #tpu.memory_space<vmem>>, vector<1x32xf32>
    %8 = vector.broadcast %7 : vector<1x32xf32> to vector<16x32xf32>
    %9 = arith.addf %6, %8 : vector<16x32xf32>
    %10 = math.tanh %9 : vector<16x32xf32>
    %11 = arith.truncf %10 : vector<16x32xf32> to vector<16x32xbf16>
    %c0_10 = arith.constant 0 : index
    %c0_11 = arith.constant 0 : index
    %12 = vector.load %arg10[%c0_10, %c0_11] : memref<32x32xbf16, #tpu.memory_space<vmem>>, vector<32x32xbf16>
    %cst_12 = arith.constant dense<0.000000e+00> : vector<16x32xf32>
    %13 = tpu.matmul %11, %12, %cst_12 {dimension_numbers = #tpu.dot_dimension_numbers<[1], [0], [0], [1], [0, 0, 1, 1], [], []>} : vector<16x32xbf16>, vector<32x32xbf16>, vector<16x32xf32> -> vector<16x32xf32>
    %c0_13 = arith.constant 0 : index
    %c0_14 = arith.constant 0 : index
    %14 = vector.load %arg11[%c0_13, %c0_14] : memref<1x32xf32, #tpu.memory_space<vmem>>, vector<1x32xf32>
    %15 = vector.broadcast %14 : vector<1x32xf32> to vector<16x32xf32>
    %16 = arith.addf %13, %15 : vector<16x32xf32>
    %17 = math.tanh %16 : vector<16x32xf32>
    %18 = arith.truncf %17 : vector<16x32xf32> to vector<16x32xbf16>
    %c0_15 = arith.constant 0 : index
    %c0_16 = arith.constant 0 : index
    %19 = vector.load %arg12[%c0_15, %c0_16] : memref<32x128xbf16, #tpu.memory_space<vmem>>, vector<32x128xbf16>
    %cst_17 = arith.constant dense<0.000000e+00> : vector<16x128xf32>
    %20 = tpu.matmul %18, %19, %cst_17 {dimension_numbers = #tpu.dot_dimension_numbers<[1], [0], [0], [1], [0, 0, 1, 1], [], []>} : vector<16x32xbf16>, vector<32x128xbf16>, vector<16x128xf32> -> vector<16x128xf32>
    %c0_18 = arith.constant 0 : index
    %c0_19 = arith.constant 0 : index
    %21 = vector.load %arg4[%c0_18, %c0_19] : memref<2x288xbf16, #tpu.memory_space<vmem>>, vector<2x288xbf16>
    %c0_20 = arith.constant 0 : index
    %c0_21 = arith.constant 0 : index
    %22 = vector.load %arg5[%c0_20, %c0_21] : memref<288x32xbf16, #tpu.memory_space<vmem>>, vector<288x32xbf16>
    %cst_22 = arith.constant dense<0.000000e+00> : vector<2x32xf32>
    %23 = tpu.matmul %21, %22, %cst_22 {dimension_numbers = #tpu.dot_dimension_numbers<[1], [0], [0], [1], [0, 0, 1, 1], [], []>} : vector<2x288xbf16>, vector<288x32xbf16>, vector<2x32xf32> -> vector<2x32xf32>
    %c0_23 = arith.constant 0 : index
    %c0_24 = arith.constant 0 : index
    %24 = vector.load %arg6[%c0_23, %c0_24] : memref<1x32xf32, #tpu.memory_space<vmem>>, vector<1x32xf32>
    %25 = vector.broadcast %24 : vector<1x32xf32> to vector<2x32xf32>
    %26 = arith.addf %23, %25 : vector<2x32xf32>
    %27 = math.tanh %26 : vector<2x32xf32>
    %28 = arith.truncf %27 : vector<2x32xf32> to vector<2x32xbf16>
    %c0_25 = arith.constant 0 : index
    %c0_26 = arith.constant 0 : index
    %29 = vector.load %arg13[%c0_25, %c0_26] : memref<32x128xbf16, #tpu.memory_space<vmem>>, vector<32x128xbf16>
    %cst_27 = arith.constant dense<0.000000e+00> : vector<2x128xf32>
    %30 = tpu.matmul %28, %29, %cst_27 {dimension_numbers = #tpu.dot_dimension_numbers<[1], [0], [0], [1], [0, 0, 1, 1], [], []>} : vector<2x32xbf16>, vector<32x128xbf16>, vector<2x128xf32> -> vector<2x128xf32>
    %c0_28 = arith.constant 0 : index
    %c0_29 = arith.constant 0 : index
    %31 = vector.load %arg14[%c0_28, %c0_29] : memref<1x128xf32, #tpu.memory_space<vmem>>, vector<1x128xf32>
    %32 = vector.broadcast %31 : vector<1x128xf32> to vector<2x128xf32>
    %33 = arith.addf %30, %32 : vector<2x128xf32>
    %c0_30 = arith.constant 0 : index
    %c0_31 = arith.constant 0 : index
    %34 = vector.load %arg15[%c0_30, %c0_31] : memref<32x128xf32, #tpu.memory_space<vmem>>, vector<32x128xf32>
    %c0_32 = arith.constant 0 : index
    %c0_33 = arith.constant 0 : index
    %35 = vector.load %arg16[%c0_32, %c0_33] : memref<32x16xbf16, #tpu.memory_space<vmem>>, vector<32x16xbf16>
    %c0_34 = arith.constant 0 : index
    %c0_35 = arith.constant 0 : index
    %36 = vector.load %arg17[%c0_34, %c0_35] : memref<1x16xf32, #tpu.memory_space<vmem>>, vector<1x16xf32>
    %cst_36 = arith.constant 0.000000e+00 : f32
    %37 = vector.broadcast %cst_36 : f32 to vector<2x32xf32>
    %cst_37 = arith.constant 0.000000e+00 : f32
    %38 = vector.broadcast %cst_37 : f32 to vector<2x32xf32>
    %39 = vector.extract_strided_slice %20 {offsets = [0, 0], sizes = [2, 128], strides = [1, 1]} : vector<16x128xf32> to vector<2x128xf32>
    %40 = arith.addf %39, %33 : vector<2x128xf32>
    %cst_38 = arith.constant dense<0.000000e+00> : vector<2x128xf32>
    %41 = tpu.matmul %37, %34, %cst_38 {dimension_numbers = #tpu.dot_dimension_numbers<[1], [0], [0], [1], [0, 0, 1, 1], [], []>} : vector<2x32xf32>, vector<32x128xf32>, vector<2x128xf32> -> vector<2x128xf32>
    %42 = arith.addf %40, %41 : vector<2x128xf32>
    %43 = arith.negf %42 : vector<2x128xf32>
    %44 = math.exp %43 : vector<2x128xf32>
    %cst_39 = arith.constant 1.000000e+00 : f32
    %45 = vector.broadcast %cst_39 : f32 to vector<2x128xf32>
    %46 = arith.addf %45, %44 : vector<2x128xf32>
    %47 = arith.divf %45, %46 : vector<2x128xf32>
    %48 = vector.extract_strided_slice %42 {offsets = [0, 64], sizes = [2, 32], strides = [1, 1]} : vector<2x128xf32> to vector<2x32xf32>
    %49 = math.tanh %48 : vector<2x32xf32>
    %50 = vector.extract_strided_slice %47 {offsets = [0, 32], sizes = [2, 32], strides = [1, 1]} : vector<2x128xf32> to vector<2x32xf32>
    %51 = arith.mulf %50, %38 : vector<2x32xf32>
    %52 = vector.extract_strided_slice %47 {offsets = [0, 0], sizes = [2, 32], strides = [1, 1]} : vector<2x128xf32> to vector<2x32xf32>
    %53 = arith.mulf %52, %49 : vector<2x32xf32>
    %54 = arith.addf %51, %53 : vector<2x32xf32>
    %55 = vector.extract_strided_slice %47 {offsets = [0, 96], sizes = [2, 32], strides = [1, 1]} : vector<2x128xf32> to vector<2x32xf32>
    %56 = math.tanh %54 : vector<2x32xf32>
    %57 = arith.mulf %55, %56 : vector<2x32xf32>
    %58 = arith.truncf %57 : vector<2x32xf32> to vector<2x32xbf16>
    %cst_40 = arith.constant dense<0.000000e+00> : vector<2x16xf32>
    %59 = tpu.matmul %58, %35, %cst_40 {dimension_numbers = #tpu.dot_dimension_numbers<[1], [0], [0], [1], [0, 0, 1, 1], [], []>} : vector<2x32xbf16>, vector<32x16xbf16>, vector<2x16xf32> -> vector<2x16xf32>
    %60 = vector.broadcast %36 : vector<1x16xf32> to vector<2x16xf32>
    %61 = arith.addf %59, %60 : vector<2x16xf32>
    %62 = vector.extract_strided_slice %61 {offsets = [0, 0], sizes = [2, 8], strides = [1, 1]} : vector<2x16xf32> to vector<2x8xf32>
    %63 = vector.extract_strided_slice %61 {offsets = [0, 8], sizes = [2, 8], strides = [1, 1]} : vector<2x16xf32> to vector<2x8xf32>
    %c0_41 = arith.constant 0 : index
    %c0_42 = arith.constant 0 : index
    %c0_43 = arith.constant 0 : index
    %64 = vector.load %arg18[%c0_41, %c0_42, %c0_43] : memref<8x2x8xf32, #tpu.memory_space<vmem>>, vector<1x2x8xf32>
    %65 = vector.shape_cast %64 : vector<1x2x8xf32> to vector<2x8xf32>
    %66 = vector.shape_cast %62 : vector<2x8xf32> to vector<1x2x8xf32>
    tpu.vector_store %arg18[%c0_41, %c0_42, %c0_43], %66 {strides = array<i32>} : memref<8x2x8xf32, #tpu.memory_space<vmem>>, vector<1x2x8xf32>,
    %c0_44 = arith.constant 0 : index
    %c0_45 = arith.constant 0 : index
    %c0_46 = arith.constant 0 : index
    %67 = vector.load %arg19[%c0_44, %c0_45, %c0_46] : memref<8x2x8xf32, #tpu.memory_space<vmem>>, vector<1x2x8xf32>
    %68 = vector.shape_cast %67 : vector<1x2x8xf32> to vector<2x8xf32>
    %69 = vector.shape_cast %63 : vector<2x8xf32> to vector<1x2x8xf32>
    tpu.vector_store %arg19[%c0_44, %c0_45, %c0_46], %69 {strides = array<i32>} : memref<8x2x8xf32, #tpu.memory_space<vmem>>, vector<1x2x8xf32>,
    %c0_47 = arith.constant 0 : index
    %c0_48 = arith.constant 0 : index
    %c0_49 = arith.constant 0 : index
    %70 = vector.load %arg3[%c0_47, %c0_48, %c0_49] : memref<8x2x8xf32, #tpu.memory_space<vmem>>, vector<1x2x8xf32>
    %71 = vector.shape_cast %70 : vector<1x2x8xf32> to vector<2x8xf32>
    %cst_50 = arith.constant 5.000000e-01 : f32
    %72 = vector.broadcast %cst_50 : f32 to vector<2x8xf32>
    %73 = arith.mulf %72, %63 : vector<2x8xf32>
    %74 = math.exp %73 : vector<2x8xf32>
    %75 = arith.mulf %71, %74 : vector<2x8xf32>
    %76 = arith.addf %75, %62 : vector<2x8xf32>
    %c0_51 = arith.constant 0 : index
    %c0_52 = arith.constant 0 : index
    %c0_53 = arith.constant 0 : index
    %77 = vector.load %arg20[%c0_51, %c0_52, %c0_53] : memref<8x2x8xf32, #tpu.memory_space<vmem>>, vector<1x2x8xf32>
    %78 = vector.shape_cast %77 : vector<1x2x8xf32> to vector<2x8xf32>
    %79 = vector.shape_cast %76 : vector<2x8xf32> to vector<1x2x8xf32>
    tpu.vector_store %arg20[%c0_51, %c0_52, %c0_53], %79 {strides = array<i32>} : memref<8x2x8xf32, #tpu.memory_space<vmem>>, vector<1x2x8xf32>,
    %80 = vector.extract_strided_slice %20 {offsets = [2, 0], sizes = [2, 128], strides = [1, 1]} : vector<16x128xf32> to vector<2x128xf32>
    %81 = arith.addf %80, %33 : vector<2x128xf32>
    %cst_54 = arith.constant dense<0.000000e+00> : vector<2x128xf32>
    %82 = tpu.matmul %57, %34, %cst_54 {dimension_numbers = #tpu.dot_dimension_numbers<[1], [0], [0], [1], [0, 0, 1, 1], [], []>} : vector<2x32xf32>, vector<32x128xf32>, vector<2x128xf32> -> vector<2x128xf32>
    %83 = arith.addf %81, %82 : vector<2x128xf32>
    %84 = arith.negf %83 : vector<2x128xf32>
    %85 = math.exp %84 : vector<2x128xf32>
    %cst_55 = arith.constant 1.000000e+00 : f32
    %86 = vector.broadcast %cst_55 : f32 to vector<2x128xf32>
    %87 = arith.addf %86, %85 : vector<2x128xf32>
    %88 = arith.divf %86, %87 : vector<2x128xf32>
    %89 = vector.extract_strided_slice %83 {offsets = [0, 64], sizes = [2, 32], strides = [1, 1]} : vector<2x128xf32> to vector<2x32xf32>
    %90 = math.tanh %89 : vector<2x32xf32>
    %91 = vector.extract_strided_slice %88 {offsets = [0, 32], sizes = [2, 32], strides = [1, 1]} : vector<2x128xf32> to vector<2x32xf32>
    %92 = arith.mulf %91, %54 : vector<2x32xf32>
    %93 = vector.extract_strided_slice %88 {offsets = [0, 0], sizes = [2, 32], strides = [1, 1]} : vector<2x128xf32> to vector<2x32xf32>
    %94 = arith.mulf %93, %90 : vector<2x32xf32>
    %95 = arith.addf %92, %94 : vector<2x32xf32>
    %96 = vector.extract_strided_slice %88 {offsets = [0, 96], sizes = [2, 32], strides = [1, 1]} : vector<2x128xf32> to vector<2x32xf32>
    %97 = math.tanh %95 : vector<2x32xf32>
    %98 = arith.mulf %96, %97 : vector<2x32xf32>
    %99 = arith.truncf %98 : vector<2x32xf32> to vector<2x32xbf16>
    %cst_56 = arith.constant dense<0.000000e+00> : vector<2x16xf32>
    %100 = tpu.matmul %99, %35, %cst_56 {dimension_numbers = #tpu.dot_dimension_numbers<[1], [0], [0], [1], [0, 0, 1, 1], [], []>} : vector<2x32xbf16>, vector<32x16xbf16>, vector<2x16xf32> -> vector<2x16xf32>
    %101 = vector.broadcast %36 : vector<1x16xf32> to vector<2x16xf32>
    %102 = arith.addf %100, %101 : vector<2x16xf32>
    %103 = vector.extract_strided_slice %102 {offsets = [0, 0], sizes = [2, 8], strides = [1, 1]} : vector<2x16xf32> to vector<2x8xf32>
    %104 = vector.extract_strided_slice %102 {offsets = [0, 8], sizes = [2, 8], strides = [1, 1]} : vector<2x16xf32> to vector<2x8xf32>
    %c1 = arith.constant 1 : index
    %c0_57 = arith.constant 0 : index
    %c0_58 = arith.constant 0 : index
    %105 = vector.load %arg18[%c1, %c0_57, %c0_58] : memref<8x2x8xf32, #tpu.memory_space<vmem>>, vector<1x2x8xf32>
    %106 = vector.shape_cast %105 : vector<1x2x8xf32> to vector<2x8xf32>
    %107 = vector.shape_cast %103 : vector<2x8xf32> to vector<1x2x8xf32>
    tpu.vector_store %arg18[%c1, %c0_57, %c0_58], %107 {strides = array<i32>} : memref<8x2x8xf32, #tpu.memory_space<vmem>>, vector<1x2x8xf32>,
    %c1_59 = arith.constant 1 : index
    %c0_60 = arith.constant 0 : index
    %c0_61 = arith.constant 0 : index
    %108 = vector.load %arg19[%c1_59, %c0_60, %c0_61] : memref<8x2x8xf32, #tpu.memory_space<vmem>>, vector<1x2x8xf32>
    %109 = vector.shape_cast %108 : vector<1x2x8xf32> to vector<2x8xf32>
    %110 = vector.shape_cast %104 : vector<2x8xf32> to vector<1x2x8xf32>
    tpu.vector_store %arg19[%c1_59, %c0_60, %c0_61], %110 {strides = array<i32>} : memref<8x2x8xf32, #tpu.memory_space<vmem>>, vector<1x2x8xf32>,
    %c1_62 = arith.constant 1 : index
    %c0_63 = arith.constant 0 : index
    %c0_64 = arith.constant 0 : index
    %111 = vector.load %arg3[%c1_62, %c0_63, %c0_64] : memref<8x2x8xf32, #tpu.memory_space<vmem>>, vector<1x2x8xf32>
    %112 = vector.shape_cast %111 : vector<1x2x8xf32> to vector<2x8xf32>
    %cst_65 = arith.constant 5.000000e-01 : f32
    %113 = vector.broadcast %cst_65 : f32 to vector<2x8xf32>
    %114 = arith.mulf %113, %104 : vector<2x8xf32>
    %115 = math.exp %114 : vector<2x8xf32>
    %116 = arith.mulf %112, %115 : vector<2x8xf32>
    %117 = arith.addf %116, %103 : vector<2x8xf32>
    %c1_66 = arith.constant 1 : index
    %c0_67 = arith.constant 0 : index
    %c0_68 = arith.constant 0 : index
    %118 = vector.load %arg20[%c1_66, %c0_67, %c0_68] : memref<8x2x8xf32, #tpu.memory_space<vmem>>, vector<1x2x8xf32>
    %119 = vector.shape_cast %118 : vector<1x2x8xf32> to vector<2x8xf32>
    %120 = vector.shape_cast %117 : vector<2x8xf32> to vector<1x2x8xf32>
    tpu.vector_store %arg20[%c1_66, %c0_67, %c0_68], %120 {strides = array<i32>} : memref<8x2x8xf32, #tpu.memory_space<vmem>>, vector<1x2x8xf32>,
    %121 = vector.extract_strided_slice %20 {offsets = [4, 0], sizes = [2, 128], strides = [1, 1]} : vector<16x128xf32> to vector<2x128xf32>
    %122 = arith.addf %121, %33 : vector<2x128xf32>
    %cst_69 = arith.constant dense<0.000000e+00> : vector<2x128xf32>
    %123 = tpu.matmul %98, %34, %cst_69 {dimension_numbers = #tpu.dot_dimension_numbers<[1], [0], [0], [1], [0, 0, 1, 1], [], []>} : vector<2x32xf32>, vector<32x128xf32>, vector<2x128xf32> -> vector<2x128xf32>
    %124 = arith.addf %122, %123 : vector<2x128xf32>
    %125 = arith.negf %124 : vector<2x128xf32>
    %126 = math.exp %125 : vector<2x128xf32>
    %cst_70 = arith.constant 1.000000e+00 : f32
    %127 = vector.broadcast %cst_70 : f32 to vector<2x128xf32>
    %128 = arith.addf %127, %126 : vector<2x128xf32>
    %129 = arith.divf %127, %128 : vector<2x128xf32>
    %130 = vector.extract_strided_slice %124 {offsets = [0, 64], sizes = [2, 32], strides = [1, 1]} : vector<2x128xf32> to vector<2x32xf32>
    %131 = math.tanh %130 : vector<2x32xf32>
    %132 = vector.extract_strided_slice %129 {offsets = [0, 32], sizes = [2, 32], strides = [1, 1]} : vector<2x128xf32> to vector<2x32xf32>
    %133 = arith.mulf %132, %95 : vector<2x32xf32>
    %134 = vector.extract_strided_slice %129 {offsets = [0, 0], sizes = [2, 32], strides = [1, 1]} : vector<2x128xf32> to vector<2x32xf32>
    %135 = arith.mulf %134, %131 : vector<2x32xf32>
    %136 = arith.addf %133, %135 : vector<2x32xf32>
    %137 = vector.extract_strided_slice %129 {offsets = [0, 96], sizes = [2, 32], strides = [1, 1]} : vector<2x128xf32> to vector<2x32xf32>
    %138 = math.tanh %136 : vector<2x32xf32>
    %139 = arith.mulf %137, %138 : vector<2x32xf32>
    %140 = arith.truncf %139 : vector<2x32xf32> to vector<2x32xbf16>
    %cst_71 = arith.constant dense<0.000000e+00> : vector<2x16xf32>
    %141 = tpu.matmul %140, %35, %cst_71 {dimension_numbers = #tpu.dot_dimension_numbers<[1], [0], [0], [1], [0, 0, 1, 1], [], []>} : vector<2x32xbf16>, vector<32x16xbf16>, vector<2x16xf32> -> vector<2x16xf32>
    %142 = vector.broadcast %36 : vector<1x16xf32> to vector<2x16xf32>
    %143 = arith.addf %141, %142 : vector<2x16xf32>
    %144 = vector.extract_strided_slice %143 {offsets = [0, 0], sizes = [2, 8], strides = [1, 1]} : vector<2x16xf32> to vector<2x8xf32>
    %145 = vector.extract_strided_slice %143 {offsets = [0, 8], sizes = [2, 8], strides = [1, 1]} : vector<2x16xf32> to vector<2x8xf32>
    %c2 = arith.constant 2 : index
    %c0_72 = arith.constant 0 : index
    %c0_73 = arith.constant 0 : index
    %146 = vector.load %arg18[%c2, %c0_72, %c0_73] : memref<8x2x8xf32, #tpu.memory_space<vmem>>, vector<1x2x8xf32>
    %147 = vector.shape_cast %146 : vector<1x2x8xf32> to vector<2x8xf32>
    %148 = vector.shape_cast %144 : vector<2x8xf32> to vector<1x2x8xf32>
    tpu.vector_store %arg18[%c2, %c0_72, %c0_73], %148 {strides = array<i32>} : memref<8x2x8xf32, #tpu.memory_space<vmem>>, vector<1x2x8xf32>,
    %c2_74 = arith.constant 2 : index
    %c0_75 = arith.constant 0 : index
    %c0_76 = arith.constant 0 : index
    %149 = vector.load %arg19[%c2_74, %c0_75, %c0_76] : memref<8x2x8xf32, #tpu.memory_space<vmem>>, vector<1x2x8xf32>
    %150 = vector.shape_cast %149 : vector<1x2x8xf32> to vector<2x8xf32>
    %151 = vector.shape_cast %145 : vector<2x8xf32> to vector<1x2x8xf32>
    tpu.vector_store %arg19[%c2_74, %c0_75, %c0_76], %151 {strides = array<i32>} : memref<8x2x8xf32, #tpu.memory_space<vmem>>, vector<1x2x8xf32>,
    %c2_77 = arith.constant 2 : index
    %c0_78 = arith.constant 0 : index
    %c0_79 = arith.constant 0 : index
    %152 = vector.load %arg3[%c2_77, %c0_78, %c0_79] : memref<8x2x8xf32, #tpu.memory_space<vmem>>, vector<1x2x8xf32>
    %153 = vector.shape_cast %152 : vector<1x2x8xf32> to vector<2x8xf32>
    %cst_80 = arith.constant 5.000000e-01 : f32
    %154 = vector.broadcast %cst_80 : f32 to vector<2x8xf32>
    %155 = arith.mulf %154, %145 : vector<2x8xf32>
    %156 = math.exp %155 : vector<2x8xf32>
    %157 = arith.mulf %153, %156 : vector<2x8xf32>
    %158 = arith.addf %157, %144 : vector<2x8xf32>
    %c2_81 = arith.constant 2 : index
    %c0_82 = arith.constant 0 : index
    %c0_83 = arith.constant 0 : index
    %159 = vector.load %arg20[%c2_81, %c0_82, %c0_83] : memref<8x2x8xf32, #tpu.memory_space<vmem>>, vector<1x2x8xf32>
    %160 = vector.shape_cast %159 : vector<1x2x8xf32> to vector<2x8xf32>
    %161 = vector.shape_cast %158 : vector<2x8xf32> to vector<1x2x8xf32>
    tpu.vector_store %arg20[%c2_81, %c0_82, %c0_83], %161 {strides = array<i32>} : memref<8x2x8xf32, #tpu.memory_space<vmem>>, vector<1x2x8xf32>,
    %162 = vector.extract_strided_slice %20 {offsets = [6, 0], sizes = [2, 128], strides = [1, 1]} : vector<16x128xf32> to vector<2x128xf32>
    %163 = arith.addf %162, %33 : vector<2x128xf32>
    %cst_84 = arith.constant dense<0.000000e+00> : vector<2x128xf32>
    %164 = tpu.matmul %139, %34, %cst_84 {dimension_numbers = #tpu.dot_dimension_numbers<[1], [0], [0], [1], [0, 0, 1, 1], [], []>} : vector<2x32xf32>, vector<32x128xf32>, vector<2x128xf32> -> vector<2x128xf32>
    %165 = arith.addf %163, %164 : vector<2x128xf32>
    %166 = arith.negf %165 : vector<2x128xf32>
    %167 = math.exp %166 : vector<2x128xf32>
    %cst_85 = arith.constant 1.000000e+00 : f32
    %168 = vector.broadcast %cst_85 : f32 to vector<2x128xf32>
    %169 = arith.addf %168, %167 : vector<2x128xf32>
    %170 = arith.divf %168, %169 : vector<2x128xf32>
    %171 = vector.extract_strided_slice %165 {offsets = [0, 64], sizes = [2, 32], strides = [1, 1]} : vector<2x128xf32> to vector<2x32xf32>
    %172 = math.tanh %171 : vector<2x32xf32>
    %173 = vector.extract_strided_slice %170 {offsets = [0, 32], sizes = [2, 32], strides = [1, 1]} : vector<2x128xf32> to vector<2x32xf32>
    %174 = arith.mulf %173, %136 : vector<2x32xf32>
    %175 = vector.extract_strided_slice %170 {offsets = [0, 0], sizes = [2, 32], strides = [1, 1]} : vector<2x128xf32> to vector<2x32xf32>
    %176 = arith.mulf %175, %172 : vector<2x32xf32>
    %177 = arith.addf %174, %176 : vector<2x32xf32>
    %178 = vector.extract_strided_slice %170 {offsets = [0, 96], sizes = [2, 32], strides = [1, 1]} : vector<2x128xf32> to vector<2x32xf32>
    %179 = math.tanh %177 : vector<2x32xf32>
    %180 = arith.mulf %178, %179 : vector<2x32xf32>
    %181 = arith.truncf %180 : vector<2x32xf32> to vector<2x32xbf16>
    %cst_86 = arith.constant dense<0.000000e+00> : vector<2x16xf32>
    %182 = tpu.matmul %181, %35, %cst_86 {dimension_numbers = #tpu.dot_dimension_numbers<[1], [0], [0], [1], [0, 0, 1, 1], [], []>} : vector<2x32xbf16>, vector<32x16xbf16>, vector<2x16xf32> -> vector<2x16xf32>
    %183 = vector.broadcast %36 : vector<1x16xf32> to vector<2x16xf32>
    %184 = arith.addf %182, %183 : vector<2x16xf32>
    %185 = vector.extract_strided_slice %184 {offsets = [0, 0], sizes = [2, 8], strides = [1, 1]} : vector<2x16xf32> to vector<2x8xf32>
    %186 = vector.extract_strided_slice %184 {offsets = [0, 8], sizes = [2, 8], strides = [1, 1]} : vector<2x16xf32> to vector<2x8xf32>
    %c3 = arith.constant 3 : index
    %c0_87 = arith.constant 0 : index
    %c0_88 = arith.constant 0 : index
    %187 = vector.load %arg18[%c3, %c0_87, %c0_88] : memref<8x2x8xf32, #tpu.memory_space<vmem>>, vector<1x2x8xf32>
    %188 = vector.shape_cast %187 : vector<1x2x8xf32> to vector<2x8xf32>
    %189 = vector.shape_cast %185 : vector<2x8xf32> to vector<1x2x8xf32>
    tpu.vector_store %arg18[%c3, %c0_87, %c0_88], %189 {strides = array<i32>} : memref<8x2x8xf32, #tpu.memory_space<vmem>>, vector<1x2x8xf32>,
    %c3_89 = arith.constant 3 : index
    %c0_90 = arith.constant 0 : index
    %c0_91 = arith.constant 0 : index
    %190 = vector.load %arg19[%c3_89, %c0_90, %c0_91] : memref<8x2x8xf32, #tpu.memory_space<vmem>>, vector<1x2x8xf32>
    %191 = vector.shape_cast %190 : vector<1x2x8xf32> to vector<2x8xf32>
    %192 = vector.shape_cast %186 : vector<2x8xf32> to vector<1x2x8xf32>
    tpu.vector_store %arg19[%c3_89, %c0_90, %c0_91], %192 {strides = array<i32>} : memref<8x2x8xf32, #tpu.memory_space<vmem>>, vector<1x2x8xf32>,
    %c3_92 = arith.constant 3 : index
    %c0_93 = arith.constant 0 : index
    %c0_94 = arith.constant 0 : index
    %193 = vector.load %arg3[%c3_92, %c0_93, %c0_94] : memref<8x2x8xf32, #tpu.memory_space<vmem>>, vector<1x2x8xf32>
    %194 = vector.shape_cast %193 : vector<1x2x8xf32> to vector<2x8xf32>
    %cst_95 = arith.constant 5.000000e-01 : f32
    %195 = vector.broadcast %cst_95 : f32 to vector<2x8xf32>
    %196 = arith.mulf %195, %186 : vector<2x8xf32>
    %197 = math.exp %196 : vector<2x8xf32>
    %198 = arith.mulf %194, %197 : vector<2x8xf32>
    %199 = arith.addf %198, %185 : vector<2x8xf32>
    %c3_96 = arith.constant 3 : index
    %c0_97 = arith.constant 0 : index
    %c0_98 = arith.constant 0 : index
    %200 = vector.load %arg20[%c3_96, %c0_97, %c0_98] : memref<8x2x8xf32, #tpu.memory_space<vmem>>, vector<1x2x8xf32>
    %201 = vector.shape_cast %200 : vector<1x2x8xf32> to vector<2x8xf32>
    %202 = vector.shape_cast %199 : vector<2x8xf32> to vector<1x2x8xf32>
    tpu.vector_store %arg20[%c3_96, %c0_97, %c0_98], %202 {strides = array<i32>} : memref<8x2x8xf32, #tpu.memory_space<vmem>>, vector<1x2x8xf32>,
    %203 = vector.extract_strided_slice %20 {offsets = [8, 0], sizes = [2, 128], strides = [1, 1]} : vector<16x128xf32> to vector<2x128xf32>
    %204 = arith.addf %203, %33 : vector<2x128xf32>
    %cst_99 = arith.constant dense<0.000000e+00> : vector<2x128xf32>
    %205 = tpu.matmul %180, %34, %cst_99 {dimension_numbers = #tpu.dot_dimension_numbers<[1], [0], [0], [1], [0, 0, 1, 1], [], []>} : vector<2x32xf32>, vector<32x128xf32>, vector<2x128xf32> -> vector<2x128xf32>
    %206 = arith.addf %204, %205 : vector<2x128xf32>
    %207 = arith.negf %206 : vector<2x128xf32>
    %208 = math.exp %207 : vector<2x128xf32>
    %cst_100 = arith.constant 1.000000e+00 : f32
    %209 = vector.broadcast %cst_100 : f32 to vector<2x128xf32>
    %210 = arith.addf %209, %208 : vector<2x128xf32>
    %211 = arith.divf %209, %210 : vector<2x128xf32>
    %212 = vector.extract_strided_slice %206 {offsets = [0, 64], sizes = [2, 32], strides = [1, 1]} : vector<2x128xf32> to vector<2x32xf32>
    %213 = math.tanh %212 : vector<2x32xf32>
    %214 = vector.extract_strided_slice %211 {offsets = [0, 32], sizes = [2, 32], strides = [1, 1]} : vector<2x128xf32> to vector<2x32xf32>
    %215 = arith.mulf %214, %177 : vector<2x32xf32>
    %216 = vector.extract_strided_slice %211 {offsets = [0, 0], sizes = [2, 32], strides = [1, 1]} : vector<2x128xf32> to vector<2x32xf32>
    %217 = arith.mulf %216, %213 : vector<2x32xf32>
    %218 = arith.addf %215, %217 : vector<2x32xf32>
    %219 = vector.extract_strided_slice %211 {offsets = [0, 96], sizes = [2, 32], strides = [1, 1]} : vector<2x128xf32> to vector<2x32xf32>
    %220 = math.tanh %218 : vector<2x32xf32>
    %221 = arith.mulf %219, %220 : vector<2x32xf32>
    %222 = arith.truncf %221 : vector<2x32xf32> to vector<2x32xbf16>
    %cst_101 = arith.constant dense<0.000000e+00> : vector<2x16xf32>
    %223 = tpu.matmul %222, %35, %cst_101 {dimension_numbers = #tpu.dot_dimension_numbers<[1], [0], [0], [1], [0, 0, 1, 1], [], []>} : vector<2x32xbf16>, vector<32x16xbf16>, vector<2x16xf32> -> vector<2x16xf32>
    %224 = vector.broadcast %36 : vector<1x16xf32> to vector<2x16xf32>
    %225 = arith.addf %223, %224 : vector<2x16xf32>
    %226 = vector.extract_strided_slice %225 {offsets = [0, 0], sizes = [2, 8], strides = [1, 1]} : vector<2x16xf32> to vector<2x8xf32>
    %227 = vector.extract_strided_slice %225 {offsets = [0, 8], sizes = [2, 8], strides = [1, 1]} : vector<2x16xf32> to vector<2x8xf32>
    %c4 = arith.constant 4 : index
    %c0_102 = arith.constant 0 : index
    %c0_103 = arith.constant 0 : index
    %228 = vector.load %arg18[%c4, %c0_102, %c0_103] : memref<8x2x8xf32, #tpu.memory_space<vmem>>, vector<1x2x8xf32>
    %229 = vector.shape_cast %228 : vector<1x2x8xf32> to vector<2x8xf32>
    %230 = vector.shape_cast %226 : vector<2x8xf32> to vector<1x2x8xf32>
    tpu.vector_store %arg18[%c4, %c0_102, %c0_103], %230 {strides = array<i32>} : memref<8x2x8xf32, #tpu.memory_space<vmem>>, vector<1x2x8xf32>,
    %c4_104 = arith.constant 4 : index
    %c0_105 = arith.constant 0 : index
    %c0_106 = arith.constant 0 : index
    %231 = vector.load %arg19[%c4_104, %c0_105, %c0_106] : memref<8x2x8xf32, #tpu.memory_space<vmem>>, vector<1x2x8xf32>
    %232 = vector.shape_cast %231 : vector<1x2x8xf32> to vector<2x8xf32>
    %233 = vector.shape_cast %227 : vector<2x8xf32> to vector<1x2x8xf32>
    tpu.vector_store %arg19[%c4_104, %c0_105, %c0_106], %233 {strides = array<i32>} : memref<8x2x8xf32, #tpu.memory_space<vmem>>, vector<1x2x8xf32>,
    %c4_107 = arith.constant 4 : index
    %c0_108 = arith.constant 0 : index
    %c0_109 = arith.constant 0 : index
    %234 = vector.load %arg3[%c4_107, %c0_108, %c0_109] : memref<8x2x8xf32, #tpu.memory_space<vmem>>, vector<1x2x8xf32>
    %235 = vector.shape_cast %234 : vector<1x2x8xf32> to vector<2x8xf32>
    %cst_110 = arith.constant 5.000000e-01 : f32
    %236 = vector.broadcast %cst_110 : f32 to vector<2x8xf32>
    %237 = arith.mulf %236, %227 : vector<2x8xf32>
    %238 = math.exp %237 : vector<2x8xf32>
    %239 = arith.mulf %235, %238 : vector<2x8xf32>
    %240 = arith.addf %239, %226 : vector<2x8xf32>
    %c4_111 = arith.constant 4 : index
    %c0_112 = arith.constant 0 : index
    %c0_113 = arith.constant 0 : index
    %241 = vector.load %arg20[%c4_111, %c0_112, %c0_113] : memref<8x2x8xf32, #tpu.memory_space<vmem>>, vector<1x2x8xf32>
    %242 = vector.shape_cast %241 : vector<1x2x8xf32> to vector<2x8xf32>
    %243 = vector.shape_cast %240 : vector<2x8xf32> to vector<1x2x8xf32>
    tpu.vector_store %arg20[%c4_111, %c0_112, %c0_113], %243 {strides = array<i32>} : memref<8x2x8xf32, #tpu.memory_space<vmem>>, vector<1x2x8xf32>,
    %244 = vector.extract_strided_slice %20 {offsets = [10, 0], sizes = [2, 128], strides = [1, 1]} : vector<16x128xf32> to vector<2x128xf32>
    %245 = arith.addf %244, %33 : vector<2x128xf32>
    %cst_114 = arith.constant dense<0.000000e+00> : vector<2x128xf32>
    %246 = tpu.matmul %221, %34, %cst_114 {dimension_numbers = #tpu.dot_dimension_numbers<[1], [0], [0], [1], [0, 0, 1, 1], [], []>} : vector<2x32xf32>, vector<32x128xf32>, vector<2x128xf32> -> vector<2x128xf32>
    %247 = arith.addf %245, %246 : vector<2x128xf32>
    %248 = arith.negf %247 : vector<2x128xf32>
    %249 = math.exp %248 : vector<2x128xf32>
    %cst_115 = arith.constant 1.000000e+00 : f32
    %250 = vector.broadcast %cst_115 : f32 to vector<2x128xf32>
    %251 = arith.addf %250, %249 : vector<2x128xf32>
    %252 = arith.divf %250, %251 : vector<2x128xf32>
    %253 = vector.extract_strided_slice %247 {offsets = [0, 64], sizes = [2, 32], strides = [1, 1]} : vector<2x128xf32> to vector<2x32xf32>
    %254 = math.tanh %253 : vector<2x32xf32>
    %255 = vector.extract_strided_slice %252 {offsets = [0, 32], sizes = [2, 32], strides = [1, 1]} : vector<2x128xf32> to vector<2x32xf32>
    %256 = arith.mulf %255, %218 : vector<2x32xf32>
    %257 = vector.extract_strided_slice %252 {offsets = [0, 0], sizes = [2, 32], strides = [1, 1]} : vector<2x128xf32> to vector<2x32xf32>
    %258 = arith.mulf %257, %254 : vector<2x32xf32>
    %259 = arith.addf %256, %258 : vector<2x32xf32>
    %260 = vector.extract_strided_slice %252 {offsets = [0, 96], sizes = [2, 32], strides = [1, 1]} : vector<2x128xf32> to vector<2x32xf32>
    %261 = math.tanh %259 : vector<2x32xf32>
    %262 = arith.mulf %260, %261 : vector<2x32xf32>
    %263 = arith.truncf %262 : vector<2x32xf32> to vector<2x32xbf16>
    %cst_116 = arith.constant dense<0.000000e+00> : vector<2x16xf32>
    %264 = tpu.matmul %263, %35, %cst_116 {dimension_numbers = #tpu.dot_dimension_numbers<[1], [0], [0], [1], [0, 0, 1, 1], [], []>} : vector<2x32xbf16>, vector<32x16xbf16>, vector<2x16xf32> -> vector<2x16xf32>
    %265 = vector.broadcast %36 : vector<1x16xf32> to vector<2x16xf32>
    %266 = arith.addf %264, %265 : vector<2x16xf32>
    %267 = vector.extract_strided_slice %266 {offsets = [0, 0], sizes = [2, 8], strides = [1, 1]} : vector<2x16xf32> to vector<2x8xf32>
    %268 = vector.extract_strided_slice %266 {offsets = [0, 8], sizes = [2, 8], strides = [1, 1]} : vector<2x16xf32> to vector<2x8xf32>
    %c5 = arith.constant 5 : index
    %c0_117 = arith.constant 0 : index
    %c0_118 = arith.constant 0 : index
    %269 = vector.load %arg18[%c5, %c0_117, %c0_118] : memref<8x2x8xf32, #tpu.memory_space<vmem>>, vector<1x2x8xf32>
    %270 = vector.shape_cast %269 : vector<1x2x8xf32> to vector<2x8xf32>
    %271 = vector.shape_cast %267 : vector<2x8xf32> to vector<1x2x8xf32>
    tpu.vector_store %arg18[%c5, %c0_117, %c0_118], %271 {strides = array<i32>} : memref<8x2x8xf32, #tpu.memory_space<vmem>>, vector<1x2x8xf32>,
    %c5_119 = arith.constant 5 : index
    %c0_120 = arith.constant 0 : index
    %c0_121 = arith.constant 0 : index
    %272 = vector.load %arg19[%c5_119, %c0_120, %c0_121] : memref<8x2x8xf32, #tpu.memory_space<vmem>>, vector<1x2x8xf32>
    %273 = vector.shape_cast %272 : vector<1x2x8xf32> to vector<2x8xf32>
    %274 = vector.shape_cast %268 : vector<2x8xf32> to vector<1x2x8xf32>
    tpu.vector_store %arg19[%c5_119, %c0_120, %c0_121], %274 {strides = array<i32>} : memref<8x2x8xf32, #tpu.memory_space<vmem>>, vector<1x2x8xf32>,
    %c5_122 = arith.constant 5 : index
    %c0_123 = arith.constant 0 : index
    %c0_124 = arith.constant 0 : index
    %275 = vector.load %arg3[%c5_122, %c0_123, %c0_124] : memref<8x2x8xf32, #tpu.memory_space<vmem>>, vector<1x2x8xf32>
    %276 = vector.shape_cast %275 : vector<1x2x8xf32> to vector<2x8xf32>
    %cst_125 = arith.constant 5.000000e-01 : f32
    %277 = vector.broadcast %cst_125 : f32 to vector<2x8xf32>
    %278 = arith.mulf %277, %268 : vector<2x8xf32>
    %279 = math.exp %278 : vector<2x8xf32>
    %280 = arith.mulf %276, %279 : vector<2x8xf32>
    %281 = arith.addf %280, %267 : vector<2x8xf32>
    %c5_126 = arith.constant 5 : index
    %c0_127 = arith.constant 0 : index
    %c0_128 = arith.constant 0 : index
    %282 = vector.load %arg20[%c5_126, %c0_127, %c0_128] : memref<8x2x8xf32, #tpu.memory_space<vmem>>, vector<1x2x8xf32>
    %283 = vector.shape_cast %282 : vector<1x2x8xf32> to vector<2x8xf32>
    %284 = vector.shape_cast %281 : vector<2x8xf32> to vector<1x2x8xf32>
    tpu.vector_store %arg20[%c5_126, %c0_127, %c0_128], %284 {strides = array<i32>} : memref<8x2x8xf32, #tpu.memory_space<vmem>>, vector<1x2x8xf32>,
    %285 = vector.extract_strided_slice %20 {offsets = [12, 0], sizes = [2, 128], strides = [1, 1]} : vector<16x128xf32> to vector<2x128xf32>
    %286 = arith.addf %285, %33 : vector<2x128xf32>
    %cst_129 = arith.constant dense<0.000000e+00> : vector<2x128xf32>
    %287 = tpu.matmul %262, %34, %cst_129 {dimension_numbers = #tpu.dot_dimension_numbers<[1], [0], [0], [1], [0, 0, 1, 1], [], []>} : vector<2x32xf32>, vector<32x128xf32>, vector<2x128xf32> -> vector<2x128xf32>
    %288 = arith.addf %286, %287 : vector<2x128xf32>
    %289 = arith.negf %288 : vector<2x128xf32>
    %290 = math.exp %289 : vector<2x128xf32>
    %cst_130 = arith.constant 1.000000e+00 : f32
    %291 = vector.broadcast %cst_130 : f32 to vector<2x128xf32>
    %292 = arith.addf %291, %290 : vector<2x128xf32>
    %293 = arith.divf %291, %292 : vector<2x128xf32>
    %294 = vector.extract_strided_slice %288 {offsets = [0, 64], sizes = [2, 32], strides = [1, 1]} : vector<2x128xf32> to vector<2x32xf32>
    %295 = math.tanh %294 : vector<2x32xf32>
    %296 = vector.extract_strided_slice %293 {offsets = [0, 32], sizes = [2, 32], strides = [1, 1]} : vector<2x128xf32> to vector<2x32xf32>
    %297 = arith.mulf %296, %259 : vector<2x32xf32>
    %298 = vector.extract_strided_slice %293 {offsets = [0, 0], sizes = [2, 32], strides = [1, 1]} : vector<2x128xf32> to vector<2x32xf32>
    %299 = arith.mulf %298, %295 : vector<2x32xf32>
    %300 = arith.addf %297, %299 : vector<2x32xf32>
    %301 = vector.extract_strided_slice %293 {offsets = [0, 96], sizes = [2, 32], strides = [1, 1]} : vector<2x128xf32> to vector<2x32xf32>
    %302 = math.tanh %300 : vector<2x32xf32>
    %303 = arith.mulf %301, %302 : vector<2x32xf32>
    %304 = arith.truncf %303 : vector<2x32xf32> to vector<2x32xbf16>
    %cst_131 = arith.constant dense<0.000000e+00> : vector<2x16xf32>
    %305 = tpu.matmul %304, %35, %cst_131 {dimension_numbers = #tpu.dot_dimension_numbers<[1], [0], [0], [1], [0, 0, 1, 1], [], []>} : vector<2x32xbf16>, vector<32x16xbf16>, vector<2x16xf32> -> vector<2x16xf32>
    %306 = vector.broadcast %36 : vector<1x16xf32> to vector<2x16xf32>
    %307 = arith.addf %305, %306 : vector<2x16xf32>
    %308 = vector.extract_strided_slice %307 {offsets = [0, 0], sizes = [2, 8], strides = [1, 1]} : vector<2x16xf32> to vector<2x8xf32>
    %309 = vector.extract_strided_slice %307 {offsets = [0, 8], sizes = [2, 8], strides = [1, 1]} : vector<2x16xf32> to vector<2x8xf32>
    %c6 = arith.constant 6 : index
    %c0_132 = arith.constant 0 : index
    %c0_133 = arith.constant 0 : index
    %310 = vector.load %arg18[%c6, %c0_132, %c0_133] : memref<8x2x8xf32, #tpu.memory_space<vmem>>, vector<1x2x8xf32>
    %311 = vector.shape_cast %310 : vector<1x2x8xf32> to vector<2x8xf32>
    %312 = vector.shape_cast %308 : vector<2x8xf32> to vector<1x2x8xf32>
    tpu.vector_store %arg18[%c6, %c0_132, %c0_133], %312 {strides = array<i32>} : memref<8x2x8xf32, #tpu.memory_space<vmem>>, vector<1x2x8xf32>,
    %c6_134 = arith.constant 6 : index
    %c0_135 = arith.constant 0 : index
    %c0_136 = arith.constant 0 : index
    %313 = vector.load %arg19[%c6_134, %c0_135, %c0_136] : memref<8x2x8xf32, #tpu.memory_space<vmem>>, vector<1x2x8xf32>
    %314 = vector.shape_cast %313 : vector<1x2x8xf32> to vector<2x8xf32>
    %315 = vector.shape_cast %309 : vector<2x8xf32> to vector<1x2x8xf32>
    tpu.vector_store %arg19[%c6_134, %c0_135, %c0_136], %315 {strides = array<i32>} : memref<8x2x8xf32, #tpu.memory_space<vmem>>, vector<1x2x8xf32>,
    %c6_137 = arith.constant 6 : index
    %c0_138 = arith.constant 0 : index
    %c0_139 = arith.constant 0 : index
    %316 = vector.load %arg3[%c6_137, %c0_138, %c0_139] : memref<8x2x8xf32, #tpu.memory_space<vmem>>, vector<1x2x8xf32>
    %317 = vector.shape_cast %316 : vector<1x2x8xf32> to vector<2x8xf32>
    %cst_140 = arith.constant 5.000000e-01 : f32
    %318 = vector.broadcast %cst_140 : f32 to vector<2x8xf32>
    %319 = arith.mulf %318, %309 : vector<2x8xf32>
    %320 = math.exp %319 : vector<2x8xf32>
    %321 = arith.mulf %317, %320 : vector<2x8xf32>
    %322 = arith.addf %321, %308 : vector<2x8xf32>
    %c6_141 = arith.constant 6 : index
    %c0_142 = arith.constant 0 : index
    %c0_143 = arith.constant 0 : index
    %323 = vector.load %arg20[%c6_141, %c0_142, %c0_143] : memref<8x2x8xf32, #tpu.memory_space<vmem>>, vector<1x2x8xf32>
    %324 = vector.shape_cast %323 : vector<1x2x8xf32> to vector<2x8xf32>
    %325 = vector.shape_cast %322 : vector<2x8xf32> to vector<1x2x8xf32>
    tpu.vector_store %arg20[%c6_141, %c0_142, %c0_143], %325 {strides = array<i32>} : memref<8x2x8xf32, #tpu.memory_space<vmem>>, vector<1x2x8xf32>,
    %326 = vector.extract_strided_slice %20 {offsets = [14, 0], sizes = [2, 128], strides = [1, 1]} : vector<16x128xf32> to vector<2x128xf32>
    %327 = arith.addf %326, %33 : vector<2x128xf32>
    %cst_144 = arith.constant dense<0.000000e+00> : vector<2x128xf32>
    %328 = tpu.matmul %303, %34, %cst_144 {dimension_numbers = #tpu.dot_dimension_numbers<[1], [0], [0], [1], [0, 0, 1, 1], [], []>} : vector<2x32xf32>, vector<32x128xf32>, vector<2x128xf32> -> vector<2x128xf32>
    %329 = arith.addf %327, %328 : vector<2x128xf32>
    %330 = arith.negf %329 : vector<2x128xf32>
    %331 = math.exp %330 : vector<2x128xf32>
    %cst_145 = arith.constant 1.000000e+00 : f32
    %332 = vector.broadcast %cst_145 : f32 to vector<2x128xf32>
    %333 = arith.addf %332, %331 : vector<2x128xf32>
    %334 = arith.divf %332, %333 : vector<2x128xf32>
    %335 = vector.extract_strided_slice %329 {offsets = [0, 64], sizes = [2, 32], strides = [1, 1]} : vector<2x128xf32> to vector<2x32xf32>
    %336 = math.tanh %335 : vector<2x32xf32>
    %337 = vector.extract_strided_slice %334 {offsets = [0, 32], sizes = [2, 32], strides = [1, 1]} : vector<2x128xf32> to vector<2x32xf32>
    %338 = arith.mulf %337, %300 : vector<2x32xf32>
    %339 = vector.extract_strided_slice %334 {offsets = [0, 0], sizes = [2, 32], strides = [1, 1]} : vector<2x128xf32> to vector<2x32xf32>
    %340 = arith.mulf %339, %336 : vector<2x32xf32>
    %341 = arith.addf %338, %340 : vector<2x32xf32>
    %342 = vector.extract_strided_slice %334 {offsets = [0, 96], sizes = [2, 32], strides = [1, 1]} : vector<2x128xf32> to vector<2x32xf32>
    %343 = math.tanh %341 : vector<2x32xf32>
    %344 = arith.mulf %342, %343 : vector<2x32xf32>
    %345 = arith.truncf %344 : vector<2x32xf32> to vector<2x32xbf16>
    %cst_146 = arith.constant dense<0.000000e+00> : vector<2x16xf32>
    %346 = tpu.matmul %345, %35, %cst_146 {dimension_numbers = #tpu.dot_dimension_numbers<[1], [0], [0], [1], [0, 0, 1, 1], [], []>} : vector<2x32xbf16>, vector<32x16xbf16>, vector<2x16xf32> -> vector<2x16xf32>
    %347 = vector.broadcast %36 : vector<1x16xf32> to vector<2x16xf32>
    %348 = arith.addf %346, %347 : vector<2x16xf32>
    %349 = vector.extract_strided_slice %348 {offsets = [0, 0], sizes = [2, 8], strides = [1, 1]} : vector<2x16xf32> to vector<2x8xf32>
    %350 = vector.extract_strided_slice %348 {offsets = [0, 8], sizes = [2, 8], strides = [1, 1]} : vector<2x16xf32> to vector<2x8xf32>
    %c7 = arith.constant 7 : index
    %c0_147 = arith.constant 0 : index
    %c0_148 = arith.constant 0 : index
    %351 = vector.load %arg18[%c7, %c0_147, %c0_148] : memref<8x2x8xf32, #tpu.memory_space<vmem>>, vector<1x2x8xf32>
    %352 = vector.shape_cast %351 : vector<1x2x8xf32> to vector<2x8xf32>
    %353 = vector.shape_cast %349 : vector<2x8xf32> to vector<1x2x8xf32>
    tpu.vector_store %arg18[%c7, %c0_147, %c0_148], %353 {strides = array<i32>} : memref<8x2x8xf32, #tpu.memory_space<vmem>>, vector<1x2x8xf32>,
    %c7_149 = arith.constant 7 : index
    %c0_150 = arith.constant 0 : index
    %c0_151 = arith.constant 0 : index
    %354 = vector.load %arg19[%c7_149, %c0_150, %c0_151] : memref<8x2x8xf32, #tpu.memory_space<vmem>>, vector<1x2x8xf32>
    %355 = vector.shape_cast %354 : vector<1x2x8xf32> to vector<2x8xf32>
    %356 = vector.shape_cast %350 : vector<2x8xf32> to vector<1x2x8xf32>
    tpu.vector_store %arg19[%c7_149, %c0_150, %c0_151], %356 {strides = array<i32>} : memref<8x2x8xf32, #tpu.memory_space<vmem>>, vector<1x2x8xf32>,
    %c7_152 = arith.constant 7 : index
    %c0_153 = arith.constant 0 : index
    %c0_154 = arith.constant 0 : index
    %357 = vector.load %arg3[%c7_152, %c0_153, %c0_154] : memref<8x2x8xf32, #tpu.memory_space<vmem>>, vector<1x2x8xf32>
    %358 = vector.shape_cast %357 : vector<1x2x8xf32> to vector<2x8xf32>
    %cst_155 = arith.constant 5.000000e-01 : f32
    %359 = vector.broadcast %cst_155 : f32 to vector<2x8xf32>
    %360 = arith.mulf %359, %350 : vector<2x8xf32>
    %361 = math.exp %360 : vector<2x8xf32>
    %362 = arith.mulf %358, %361 : vector<2x8xf32>
    %363 = arith.addf %362, %349 : vector<2x8xf32>
    %c7_156 = arith.constant 7 : index
    %c0_157 = arith.constant 0 : index
    %c0_158 = arith.constant 0 : index
    %364 = vector.load %arg20[%c7_156, %c0_157, %c0_158] : memref<8x2x8xf32, #tpu.memory_space<vmem>>, vector<1x2x8xf32>
    %365 = vector.shape_cast %364 : vector<1x2x8xf32> to vector<2x8xf32>
    %366 = vector.shape_cast %363 : vector<2x8xf32> to vector<1x2x8xf32>
    tpu.vector_store %arg20[%c7_156, %c0_157, %c0_158], %366 {strides = array<i32>} : memref<8x2x8xf32, #tpu.memory_space<vmem>>, vector<1x2x8xf32>,
    return
  }
  func.func @transform_0(%arg0: i32) -> (i32, i32) {
    %c0_i32 = arith.constant 0 : i32
    %c0_i32_0 = arith.constant 0 : i32
    %c0_i32_1 = arith.constant 0 : i32
    return %c0_i32, %c0_i32_0 : i32, i32
  }
  func.func @transform_1(%arg0: i32) -> (i32, i32) {
    %c0_i32 = arith.constant 0 : i32
    %c0_i32_0 = arith.constant 0 : i32
    %c0_i32_1 = arith.constant 0 : i32
    return %c0_i32, %c0_i32_0 : i32, i32
  }
  func.func @transform_2(%arg0: i32) -> (i32, i32, i32) {
    %c0_i32 = arith.constant 0 : i32
    %c0_i32_0 = arith.constant 0 : i32
    %c0_i32_1 = arith.constant 0 : i32
    %c0_i32_2 = arith.constant 0 : i32
    return %c0_i32, %c0_i32_0, %c0_i32_1 : i32, i32, i32
  }
  func.func @transform_3(%arg0: i32) -> (i32, i32) {
    %c0_i32 = arith.constant 0 : i32
    %c0_i32_0 = arith.constant 0 : i32
    %c0_i32_1 = arith.constant 0 : i32
    return %c0_i32, %c0_i32_0 : i32, i32
  }
  func.func @transform_4(%arg0: i32) -> (i32, i32) {
    %c0_i32 = arith.constant 0 : i32
    %c0_i32_0 = arith.constant 0 : i32
    %c0_i32_1 = arith.constant 0 : i32
    return %c0_i32, %c0_i32_0 : i32, i32
  }
  func.func @transform_5(%arg0: i32) -> (i32, i32) {
    %c0_i32 = arith.constant 0 : i32
    %c0_i32_0 = arith.constant 0 : i32
    %c0_i32_1 = arith.constant 0 : i32
    return %c0_i32, %c0_i32_0 : i32, i32
  }
  func.func @transform_6(%arg0: i32) -> (i32, i32) {
    %c0_i32 = arith.constant 0 : i32
    %c0_i32_0 = arith.constant 0 : i32
    %c0_i32_1 = arith.constant 0 : i32
    return %c0_i32, %c0_i32_0 : i32, i32
  }
  func.func @transform_7(%arg0: i32) -> (i32, i32) {
    %c0_i32 = arith.constant 0 : i32
    %c0_i32_0 = arith.constant 0 : i32
    %c0_i32_1 = arith.constant 0 : i32
    return %c0_i32, %c0_i32_0 : i32, i32
  }
  func.func @transform_8(%arg0: i32) -> (i32, i32) {
    %c0_i32 = arith.constant 0 : i32
    %c0_i32_0 = arith.constant 0 : i32
    %c0_i32_1 = arith.constant 0 : i32
    return %c0_i32, %c0_i32_0 : i32, i32
  }
  func.func @transform_9(%arg0: i32) -> (i32, i32) {
    %c0_i32 = arith.constant 0 : i32
    %c0_i32_0 = arith.constant 0 : i32
    %c0_i32_1 = arith.constant 0 : i32
    return %c0_i32, %c0_i32_0 : i32, i32
  }
  func.func @transform_10(%arg0: i32) -> (i32, i32) {
    %c0_i32 = arith.constant 0 : i32
    %c0_i32_0 = arith.constant 0 : i32
    %c0_i32_1 = arith.constant 0 : i32
    return %c0_i32, %c0_i32_0 : i32, i32
  }
  func.func @transform_11(%arg0: i32) -> (i32, i32) {
    %c0_i32 = arith.constant 0 : i32
    %c0_i32_0 = arith.constant 0 : i32
    %c0_i32_1 = arith.constant 0 : i32
    return %c0_i32, %c0_i32_0 : i32, i32
  }
  func.func @transform_12(%arg0: i32) -> (i32, i32) {
    %c0_i32 = arith.constant 0 : i32
    %c0_i32_0 = arith.constant 0 : i32
    %c0_i32_1 = arith.constant 0 : i32
    return %c0_i32, %c0_i32_0 : i32, i32
  }
  func.func @transform_13(%arg0: i32) -> (i32, i32) {
    %c0_i32 = arith.constant 0 : i32
    %c0_i32_0 = arith.constant 0 : i32
    %c0_i32_1 = arith.constant 0 : i32
    return %c0_i32, %c0_i32_0 : i32, i32
  }
  func.func @transform_14(%arg0: i32) -> (i32, i32) {
    %c0_i32 = arith.constant 0 : i32
    %c0_i32_0 = arith.constant 0 : i32
    %c0_i32_1 = arith.constant 0 : i32
    return %c0_i32, %c0_i32_0 : i32, i32
  }
  func.func @transform_15(%arg0: i32) -> (i32, i32) {
    %c0_i32 = arith.constant 0 : i32
    %c0_i32_0 = arith.constant 0 : i32
    %c0_i32_1 = arith.constant 0 : i32
    return %c0_i32, %c0_i32_0 : i32, i32
  }
  func.func @transform_16(%arg0: i32) -> (i32, i32) {
    %c0_i32 = arith.constant 0 : i32
    %c0_i32_0 = arith.constant 0 : i32
    %c0_i32_1 = arith.constant 0 : i32
    return %c0_i32, %c0_i32_0 : i32, i32
  }
  func.func @transform_17(%arg0: i32) -> (i32, i32, i32) {
    %c0_i32 = arith.constant 0 : i32
    %c0_i32_0 = arith.constant 0 : i32
    %c0_i32_1 = arith.constant 0 : i32
    %c0_i32_2 = arith.constant 0 : i32
    return %c0_i32, %c0_i32_0, %c0_i32_1 : i32, i32, i32
  }
  func.func @transform_18(%arg0: i32) -> (i32, i32, i32) {
    %c0_i32 = arith.constant 0 : i32
    %c0_i32_0 = arith.constant 0 : i32
    %c0_i32_1 = arith.constant 0 : i32
    %c0_i32_2 = arith.constant 0 : i32
    return %c0_i32, %c0_i32_0, %c0_i32_1 : i32, i32, i32
  }
  func.func @transform_19(%arg0: i32) -> (i32, i32, i32) {
    %c0_i32 = arith.constant 0 : i32
    %c0_i32_0 = arith.constant 0 : i32
    %c0_i32_1 = arith.constant 0 : i32
    %c0_i32_2 = arith.constant 0 : i32
    return %c0_i32, %c0_i32_0, %c0_i32_1 : i32, i32, i32
  }
}

module attributes {stable_mosaic.version = 11 : i64} {
  func.func @_decoder_kernel(%arg0: i32, %arg1: memref<16x8xbf16, #tpu.memory_space<vmem>>, %arg2: memref<16x10xbf16, #tpu.memory_space<vmem>>, %arg3: memref<2x288xbf16, #tpu.memory_space<vmem>>, %arg4: memref<288x32xbf16, #tpu.memory_space<vmem>>, %arg5: memref<1x32xf32, #tpu.memory_space<vmem>>, %arg6: memref<8x32xbf16, #tpu.memory_space<vmem>>, %arg7: memref<10x32xbf16, #tpu.memory_space<vmem>>, %arg8: memref<1x32xf32, #tpu.memory_space<vmem>>, %arg9: memref<32x32xbf16, #tpu.memory_space<vmem>>, %arg10: memref<1x32xf32, #tpu.memory_space<vmem>>, %arg11: memref<32x128xbf16, #tpu.memory_space<vmem>>, %arg12: memref<32x128xbf16, #tpu.memory_space<vmem>>, %arg13: memref<1x128xf32, #tpu.memory_space<vmem>>, %arg14: memref<32x128xf32, #tpu.memory_space<vmem>>, %arg15: memref<32x6xbf16, #tpu.memory_space<vmem>>, %arg16: memref<1x6xf32, #tpu.memory_space<vmem>>, %arg17: memref<8x2x6xf32, #tpu.memory_space<vmem>>) attributes {dimension_semantics = [#tpu.dimension_semantics<arbitrary>], iteration_bounds = array<i64: 1>, scalar_prefetch = 0 : i64, scratch_operands = 0 : i64, tpu.core_type = #tpu.core_type<tc>, window_params = [{pipeline_mode = #tpu.pipeline_mode<synchronous>, transform_indices = @transform_0, window_bounds = array<i64: 16, 8>}, {pipeline_mode = #tpu.pipeline_mode<synchronous>, transform_indices = @transform_1, window_bounds = array<i64: 16, 10>}, {pipeline_mode = #tpu.pipeline_mode<synchronous>, transform_indices = @transform_2, window_bounds = array<i64: 2, 288>}, {pipeline_mode = #tpu.pipeline_mode<synchronous>, transform_indices = @transform_3, window_bounds = array<i64: 288, 32>}, {pipeline_mode = #tpu.pipeline_mode<synchronous>, transform_indices = @transform_4, window_bounds = array<i64: 1, 32>}, {pipeline_mode = #tpu.pipeline_mode<synchronous>, transform_indices = @transform_5, window_bounds = array<i64: 8, 32>}, {pipeline_mode = #tpu.pipeline_mode<synchronous>, transform_indices = @transform_6, window_bounds = array<i64: 10, 32>}, {pipeline_mode = #tpu.pipeline_mode<synchronous>, transform_indices = @transform_7, window_bounds = array<i64: 1, 32>}, {pipeline_mode = #tpu.pipeline_mode<synchronous>, transform_indices = @transform_8, window_bounds = array<i64: 32, 32>}, {pipeline_mode = #tpu.pipeline_mode<synchronous>, transform_indices = @transform_9, window_bounds = array<i64: 1, 32>}, {pipeline_mode = #tpu.pipeline_mode<synchronous>, transform_indices = @transform_10, window_bounds = array<i64: 32, 128>}, {pipeline_mode = #tpu.pipeline_mode<synchronous>, transform_indices = @transform_11, window_bounds = array<i64: 32, 128>}, {pipeline_mode = #tpu.pipeline_mode<synchronous>, transform_indices = @transform_12, window_bounds = array<i64: 1, 128>}, {pipeline_mode = #tpu.pipeline_mode<synchronous>, transform_indices = @transform_13, window_bounds = array<i64: 32, 128>}, {pipeline_mode = #tpu.pipeline_mode<synchronous>, transform_indices = @transform_14, window_bounds = array<i64: 32, 6>}, {pipeline_mode = #tpu.pipeline_mode<synchronous>, transform_indices = @transform_15, window_bounds = array<i64: 1, 6>}, {pipeline_mode = #tpu.pipeline_mode<synchronous>, transform_indices = @transform_16, window_bounds = array<i64: 8, 2, 6>}]} {
    %c0 = arith.constant 0 : index
    %c0_0 = arith.constant 0 : index
    %0 = vector.load %arg1[%c0, %c0_0] : memref<16x8xbf16, #tpu.memory_space<vmem>>, vector<16x8xbf16>
    %c0_1 = arith.constant 0 : index
    %c0_2 = arith.constant 0 : index
    %1 = vector.load %arg6[%c0_1, %c0_2] : memref<8x32xbf16, #tpu.memory_space<vmem>>, vector<8x32xbf16>
    %cst = arith.constant dense<0.000000e+00> : vector<16x32xf32>
    %2 = tpu.matmul %0, %1, %cst {dimension_numbers = #tpu.dot_dimension_numbers<[1], [0], [0], [1], [0, 0, 1, 1], [], []>} : vector<16x8xbf16>, vector<8x32xbf16>, vector<16x32xf32> -> vector<16x32xf32>
    %c0_3 = arith.constant 0 : index
    %c0_4 = arith.constant 0 : index
    %3 = vector.load %arg2[%c0_3, %c0_4] : memref<16x10xbf16, #tpu.memory_space<vmem>>, vector<16x10xbf16>
    %c0_5 = arith.constant 0 : index
    %c0_6 = arith.constant 0 : index
    %4 = vector.load %arg7[%c0_5, %c0_6] : memref<10x32xbf16, #tpu.memory_space<vmem>>, vector<10x32xbf16>
    %cst_7 = arith.constant dense<0.000000e+00> : vector<16x32xf32>
    %5 = tpu.matmul %3, %4, %cst_7 {dimension_numbers = #tpu.dot_dimension_numbers<[1], [0], [0], [1], [0, 0, 1, 1], [], []>} : vector<16x10xbf16>, vector<10x32xbf16>, vector<16x32xf32> -> vector<16x32xf32>
    %6 = arith.addf %2, %5 : vector<16x32xf32>
    %c0_8 = arith.constant 0 : index
    %c0_9 = arith.constant 0 : index
    %7 = vector.load %arg8[%c0_8, %c0_9] : memref<1x32xf32, #tpu.memory_space<vmem>>, vector<1x32xf32>
    %8 = vector.broadcast %7 : vector<1x32xf32> to vector<16x32xf32>
    %9 = arith.addf %6, %8 : vector<16x32xf32>
    %10 = math.tanh %9 : vector<16x32xf32>
    %11 = arith.truncf %10 : vector<16x32xf32> to vector<16x32xbf16>
    %c0_10 = arith.constant 0 : index
    %c0_11 = arith.constant 0 : index
    %12 = vector.load %arg9[%c0_10, %c0_11] : memref<32x32xbf16, #tpu.memory_space<vmem>>, vector<32x32xbf16>
    %cst_12 = arith.constant dense<0.000000e+00> : vector<16x32xf32>
    %13 = tpu.matmul %11, %12, %cst_12 {dimension_numbers = #tpu.dot_dimension_numbers<[1], [0], [0], [1], [0, 0, 1, 1], [], []>} : vector<16x32xbf16>, vector<32x32xbf16>, vector<16x32xf32> -> vector<16x32xf32>
    %c0_13 = arith.constant 0 : index
    %c0_14 = arith.constant 0 : index
    %14 = vector.load %arg10[%c0_13, %c0_14] : memref<1x32xf32, #tpu.memory_space<vmem>>, vector<1x32xf32>
    %15 = vector.broadcast %14 : vector<1x32xf32> to vector<16x32xf32>
    %16 = arith.addf %13, %15 : vector<16x32xf32>
    %17 = math.tanh %16 : vector<16x32xf32>
    %18 = arith.truncf %17 : vector<16x32xf32> to vector<16x32xbf16>
    %c0_15 = arith.constant 0 : index
    %c0_16 = arith.constant 0 : index
    %19 = vector.load %arg11[%c0_15, %c0_16] : memref<32x128xbf16, #tpu.memory_space<vmem>>, vector<32x128xbf16>
    %cst_17 = arith.constant dense<0.000000e+00> : vector<16x128xf32>
    %20 = tpu.matmul %18, %19, %cst_17 {dimension_numbers = #tpu.dot_dimension_numbers<[1], [0], [0], [1], [0, 0, 1, 1], [], []>} : vector<16x32xbf16>, vector<32x128xbf16>, vector<16x128xf32> -> vector<16x128xf32>
    %c0_18 = arith.constant 0 : index
    %c0_19 = arith.constant 0 : index
    %21 = vector.load %arg3[%c0_18, %c0_19] : memref<2x288xbf16, #tpu.memory_space<vmem>>, vector<2x288xbf16>
    %c0_20 = arith.constant 0 : index
    %c0_21 = arith.constant 0 : index
    %22 = vector.load %arg4[%c0_20, %c0_21] : memref<288x32xbf16, #tpu.memory_space<vmem>>, vector<288x32xbf16>
    %cst_22 = arith.constant dense<0.000000e+00> : vector<2x32xf32>
    %23 = tpu.matmul %21, %22, %cst_22 {dimension_numbers = #tpu.dot_dimension_numbers<[1], [0], [0], [1], [0, 0, 1, 1], [], []>} : vector<2x288xbf16>, vector<288x32xbf16>, vector<2x32xf32> -> vector<2x32xf32>
    %c0_23 = arith.constant 0 : index
    %c0_24 = arith.constant 0 : index
    %24 = vector.load %arg5[%c0_23, %c0_24] : memref<1x32xf32, #tpu.memory_space<vmem>>, vector<1x32xf32>
    %25 = vector.broadcast %24 : vector<1x32xf32> to vector<2x32xf32>
    %26 = arith.addf %23, %25 : vector<2x32xf32>
    %27 = math.tanh %26 : vector<2x32xf32>
    %28 = arith.truncf %27 : vector<2x32xf32> to vector<2x32xbf16>
    %c0_25 = arith.constant 0 : index
    %c0_26 = arith.constant 0 : index
    %29 = vector.load %arg12[%c0_25, %c0_26] : memref<32x128xbf16, #tpu.memory_space<vmem>>, vector<32x128xbf16>
    %cst_27 = arith.constant dense<0.000000e+00> : vector<2x128xf32>
    %30 = tpu.matmul %28, %29, %cst_27 {dimension_numbers = #tpu.dot_dimension_numbers<[1], [0], [0], [1], [0, 0, 1, 1], [], []>} : vector<2x32xbf16>, vector<32x128xbf16>, vector<2x128xf32> -> vector<2x128xf32>
    %c0_28 = arith.constant 0 : index
    %c0_29 = arith.constant 0 : index
    %31 = vector.load %arg13[%c0_28, %c0_29] : memref<1x128xf32, #tpu.memory_space<vmem>>, vector<1x128xf32>
    %32 = vector.broadcast %31 : vector<1x128xf32> to vector<2x128xf32>
    %33 = arith.addf %30, %32 : vector<2x128xf32>
    %c0_30 = arith.constant 0 : index
    %c0_31 = arith.constant 0 : index
    %34 = vector.load %arg14[%c0_30, %c0_31] : memref<32x128xf32, #tpu.memory_space<vmem>>, vector<32x128xf32>
    %c0_32 = arith.constant 0 : index
    %c0_33 = arith.constant 0 : index
    %35 = vector.load %arg15[%c0_32, %c0_33] : memref<32x6xbf16, #tpu.memory_space<vmem>>, vector<32x6xbf16>
    %c0_34 = arith.constant 0 : index
    %c0_35 = arith.constant 0 : index
    %36 = vector.load %arg16[%c0_34, %c0_35] : memref<1x6xf32, #tpu.memory_space<vmem>>, vector<1x6xf32>
    %cst_36 = arith.constant 0.000000e+00 : f32
    %37 = vector.broadcast %cst_36 : f32 to vector<2x32xf32>
    %cst_37 = arith.constant 0.000000e+00 : f32
    %38 = vector.broadcast %cst_37 : f32 to vector<2x32xf32>
    %39 = vector.extract_strided_slice %20 {offsets = [0, 0], sizes = [2, 128], strides = [1, 1]} : vector<16x128xf32> to vector<2x128xf32>
    %40 = arith.addf %39, %33 : vector<2x128xf32>
    %cst_38 = arith.constant dense<0.000000e+00> : vector<2x128xf32>
    %41 = tpu.matmul %37, %34, %cst_38 {dimension_numbers = #tpu.dot_dimension_numbers<[1], [0], [0], [1], [0, 0, 1, 1], [], []>} : vector<2x32xf32>, vector<32x128xf32>, vector<2x128xf32> -> vector<2x128xf32>
    %42 = arith.addf %40, %41 : vector<2x128xf32>
    %43 = arith.negf %42 : vector<2x128xf32>
    %44 = math.exp %43 : vector<2x128xf32>
    %cst_39 = arith.constant 1.000000e+00 : f32
    %45 = vector.broadcast %cst_39 : f32 to vector<2x128xf32>
    %46 = arith.addf %45, %44 : vector<2x128xf32>
    %47 = arith.divf %45, %46 : vector<2x128xf32>
    %48 = vector.extract_strided_slice %42 {offsets = [0, 64], sizes = [2, 32], strides = [1, 1]} : vector<2x128xf32> to vector<2x32xf32>
    %49 = math.tanh %48 : vector<2x32xf32>
    %50 = vector.extract_strided_slice %47 {offsets = [0, 32], sizes = [2, 32], strides = [1, 1]} : vector<2x128xf32> to vector<2x32xf32>
    %51 = arith.mulf %50, %38 : vector<2x32xf32>
    %52 = vector.extract_strided_slice %47 {offsets = [0, 0], sizes = [2, 32], strides = [1, 1]} : vector<2x128xf32> to vector<2x32xf32>
    %53 = arith.mulf %52, %49 : vector<2x32xf32>
    %54 = arith.addf %51, %53 : vector<2x32xf32>
    %55 = vector.extract_strided_slice %47 {offsets = [0, 96], sizes = [2, 32], strides = [1, 1]} : vector<2x128xf32> to vector<2x32xf32>
    %56 = math.tanh %54 : vector<2x32xf32>
    %57 = arith.mulf %55, %56 : vector<2x32xf32>
    %58 = arith.truncf %57 : vector<2x32xf32> to vector<2x32xbf16>
    %cst_40 = arith.constant dense<0.000000e+00> : vector<2x6xf32>
    %59 = tpu.matmul %58, %35, %cst_40 {dimension_numbers = #tpu.dot_dimension_numbers<[1], [0], [0], [1], [0, 0, 1, 1], [], []>} : vector<2x32xbf16>, vector<32x6xbf16>, vector<2x6xf32> -> vector<2x6xf32>
    %60 = vector.broadcast %36 : vector<1x6xf32> to vector<2x6xf32>
    %61 = arith.addf %59, %60 : vector<2x6xf32>
    %62 = arith.negf %61 : vector<2x6xf32>
    %63 = math.exp %62 : vector<2x6xf32>
    %cst_41 = arith.constant 1.000000e+00 : f32
    %64 = vector.broadcast %cst_41 : f32 to vector<2x6xf32>
    %65 = arith.addf %64, %63 : vector<2x6xf32>
    %66 = arith.divf %64, %65 : vector<2x6xf32>
    %c0_42 = arith.constant 0 : index
    %c0_43 = arith.constant 0 : index
    %c0_44 = arith.constant 0 : index
    %67 = vector.load %arg17[%c0_42, %c0_43, %c0_44] : memref<8x2x6xf32, #tpu.memory_space<vmem>>, vector<1x2x6xf32>
    %68 = vector.shape_cast %67 : vector<1x2x6xf32> to vector<2x6xf32>
    %69 = vector.shape_cast %66 : vector<2x6xf32> to vector<1x2x6xf32>
    tpu.vector_store %arg17[%c0_42, %c0_43, %c0_44], %69 {strides = array<i32>} : memref<8x2x6xf32, #tpu.memory_space<vmem>>, vector<1x2x6xf32>,
    %70 = vector.extract_strided_slice %20 {offsets = [2, 0], sizes = [2, 128], strides = [1, 1]} : vector<16x128xf32> to vector<2x128xf32>
    %71 = arith.addf %70, %33 : vector<2x128xf32>
    %cst_45 = arith.constant dense<0.000000e+00> : vector<2x128xf32>
    %72 = tpu.matmul %57, %34, %cst_45 {dimension_numbers = #tpu.dot_dimension_numbers<[1], [0], [0], [1], [0, 0, 1, 1], [], []>} : vector<2x32xf32>, vector<32x128xf32>, vector<2x128xf32> -> vector<2x128xf32>
    %73 = arith.addf %71, %72 : vector<2x128xf32>
    %74 = arith.negf %73 : vector<2x128xf32>
    %75 = math.exp %74 : vector<2x128xf32>
    %cst_46 = arith.constant 1.000000e+00 : f32
    %76 = vector.broadcast %cst_46 : f32 to vector<2x128xf32>
    %77 = arith.addf %76, %75 : vector<2x128xf32>
    %78 = arith.divf %76, %77 : vector<2x128xf32>
    %79 = vector.extract_strided_slice %73 {offsets = [0, 64], sizes = [2, 32], strides = [1, 1]} : vector<2x128xf32> to vector<2x32xf32>
    %80 = math.tanh %79 : vector<2x32xf32>
    %81 = vector.extract_strided_slice %78 {offsets = [0, 32], sizes = [2, 32], strides = [1, 1]} : vector<2x128xf32> to vector<2x32xf32>
    %82 = arith.mulf %81, %54 : vector<2x32xf32>
    %83 = vector.extract_strided_slice %78 {offsets = [0, 0], sizes = [2, 32], strides = [1, 1]} : vector<2x128xf32> to vector<2x32xf32>
    %84 = arith.mulf %83, %80 : vector<2x32xf32>
    %85 = arith.addf %82, %84 : vector<2x32xf32>
    %86 = vector.extract_strided_slice %78 {offsets = [0, 96], sizes = [2, 32], strides = [1, 1]} : vector<2x128xf32> to vector<2x32xf32>
    %87 = math.tanh %85 : vector<2x32xf32>
    %88 = arith.mulf %86, %87 : vector<2x32xf32>
    %89 = arith.truncf %88 : vector<2x32xf32> to vector<2x32xbf16>
    %cst_47 = arith.constant dense<0.000000e+00> : vector<2x6xf32>
    %90 = tpu.matmul %89, %35, %cst_47 {dimension_numbers = #tpu.dot_dimension_numbers<[1], [0], [0], [1], [0, 0, 1, 1], [], []>} : vector<2x32xbf16>, vector<32x6xbf16>, vector<2x6xf32> -> vector<2x6xf32>
    %91 = vector.broadcast %36 : vector<1x6xf32> to vector<2x6xf32>
    %92 = arith.addf %90, %91 : vector<2x6xf32>
    %93 = arith.negf %92 : vector<2x6xf32>
    %94 = math.exp %93 : vector<2x6xf32>
    %cst_48 = arith.constant 1.000000e+00 : f32
    %95 = vector.broadcast %cst_48 : f32 to vector<2x6xf32>
    %96 = arith.addf %95, %94 : vector<2x6xf32>
    %97 = arith.divf %95, %96 : vector<2x6xf32>
    %c1 = arith.constant 1 : index
    %c0_49 = arith.constant 0 : index
    %c0_50 = arith.constant 0 : index
    %98 = vector.load %arg17[%c1, %c0_49, %c0_50] : memref<8x2x6xf32, #tpu.memory_space<vmem>>, vector<1x2x6xf32>
    %99 = vector.shape_cast %98 : vector<1x2x6xf32> to vector<2x6xf32>
    %100 = vector.shape_cast %97 : vector<2x6xf32> to vector<1x2x6xf32>
    tpu.vector_store %arg17[%c1, %c0_49, %c0_50], %100 {strides = array<i32>} : memref<8x2x6xf32, #tpu.memory_space<vmem>>, vector<1x2x6xf32>,
    %101 = vector.extract_strided_slice %20 {offsets = [4, 0], sizes = [2, 128], strides = [1, 1]} : vector<16x128xf32> to vector<2x128xf32>
    %102 = arith.addf %101, %33 : vector<2x128xf32>
    %cst_51 = arith.constant dense<0.000000e+00> : vector<2x128xf32>
    %103 = tpu.matmul %88, %34, %cst_51 {dimension_numbers = #tpu.dot_dimension_numbers<[1], [0], [0], [1], [0, 0, 1, 1], [], []>} : vector<2x32xf32>, vector<32x128xf32>, vector<2x128xf32> -> vector<2x128xf32>
    %104 = arith.addf %102, %103 : vector<2x128xf32>
    %105 = arith.negf %104 : vector<2x128xf32>
    %106 = math.exp %105 : vector<2x128xf32>
    %cst_52 = arith.constant 1.000000e+00 : f32
    %107 = vector.broadcast %cst_52 : f32 to vector<2x128xf32>
    %108 = arith.addf %107, %106 : vector<2x128xf32>
    %109 = arith.divf %107, %108 : vector<2x128xf32>
    %110 = vector.extract_strided_slice %104 {offsets = [0, 64], sizes = [2, 32], strides = [1, 1]} : vector<2x128xf32> to vector<2x32xf32>
    %111 = math.tanh %110 : vector<2x32xf32>
    %112 = vector.extract_strided_slice %109 {offsets = [0, 32], sizes = [2, 32], strides = [1, 1]} : vector<2x128xf32> to vector<2x32xf32>
    %113 = arith.mulf %112, %85 : vector<2x32xf32>
    %114 = vector.extract_strided_slice %109 {offsets = [0, 0], sizes = [2, 32], strides = [1, 1]} : vector<2x128xf32> to vector<2x32xf32>
    %115 = arith.mulf %114, %111 : vector<2x32xf32>
    %116 = arith.addf %113, %115 : vector<2x32xf32>
    %117 = vector.extract_strided_slice %109 {offsets = [0, 96], sizes = [2, 32], strides = [1, 1]} : vector<2x128xf32> to vector<2x32xf32>
    %118 = math.tanh %116 : vector<2x32xf32>
    %119 = arith.mulf %117, %118 : vector<2x32xf32>
    %120 = arith.truncf %119 : vector<2x32xf32> to vector<2x32xbf16>
    %cst_53 = arith.constant dense<0.000000e+00> : vector<2x6xf32>
    %121 = tpu.matmul %120, %35, %cst_53 {dimension_numbers = #tpu.dot_dimension_numbers<[1], [0], [0], [1], [0, 0, 1, 1], [], []>} : vector<2x32xbf16>, vector<32x6xbf16>, vector<2x6xf32> -> vector<2x6xf32>
    %122 = vector.broadcast %36 : vector<1x6xf32> to vector<2x6xf32>
    %123 = arith.addf %121, %122 : vector<2x6xf32>
    %124 = arith.negf %123 : vector<2x6xf32>
    %125 = math.exp %124 : vector<2x6xf32>
    %cst_54 = arith.constant 1.000000e+00 : f32
    %126 = vector.broadcast %cst_54 : f32 to vector<2x6xf32>
    %127 = arith.addf %126, %125 : vector<2x6xf32>
    %128 = arith.divf %126, %127 : vector<2x6xf32>
    %c2 = arith.constant 2 : index
    %c0_55 = arith.constant 0 : index
    %c0_56 = arith.constant 0 : index
    %129 = vector.load %arg17[%c2, %c0_55, %c0_56] : memref<8x2x6xf32, #tpu.memory_space<vmem>>, vector<1x2x6xf32>
    %130 = vector.shape_cast %129 : vector<1x2x6xf32> to vector<2x6xf32>
    %131 = vector.shape_cast %128 : vector<2x6xf32> to vector<1x2x6xf32>
    tpu.vector_store %arg17[%c2, %c0_55, %c0_56], %131 {strides = array<i32>} : memref<8x2x6xf32, #tpu.memory_space<vmem>>, vector<1x2x6xf32>,
    %132 = vector.extract_strided_slice %20 {offsets = [6, 0], sizes = [2, 128], strides = [1, 1]} : vector<16x128xf32> to vector<2x128xf32>
    %133 = arith.addf %132, %33 : vector<2x128xf32>
    %cst_57 = arith.constant dense<0.000000e+00> : vector<2x128xf32>
    %134 = tpu.matmul %119, %34, %cst_57 {dimension_numbers = #tpu.dot_dimension_numbers<[1], [0], [0], [1], [0, 0, 1, 1], [], []>} : vector<2x32xf32>, vector<32x128xf32>, vector<2x128xf32> -> vector<2x128xf32>
    %135 = arith.addf %133, %134 : vector<2x128xf32>
    %136 = arith.negf %135 : vector<2x128xf32>
    %137 = math.exp %136 : vector<2x128xf32>
    %cst_58 = arith.constant 1.000000e+00 : f32
    %138 = vector.broadcast %cst_58 : f32 to vector<2x128xf32>
    %139 = arith.addf %138, %137 : vector<2x128xf32>
    %140 = arith.divf %138, %139 : vector<2x128xf32>
    %141 = vector.extract_strided_slice %135 {offsets = [0, 64], sizes = [2, 32], strides = [1, 1]} : vector<2x128xf32> to vector<2x32xf32>
    %142 = math.tanh %141 : vector<2x32xf32>
    %143 = vector.extract_strided_slice %140 {offsets = [0, 32], sizes = [2, 32], strides = [1, 1]} : vector<2x128xf32> to vector<2x32xf32>
    %144 = arith.mulf %143, %116 : vector<2x32xf32>
    %145 = vector.extract_strided_slice %140 {offsets = [0, 0], sizes = [2, 32], strides = [1, 1]} : vector<2x128xf32> to vector<2x32xf32>
    %146 = arith.mulf %145, %142 : vector<2x32xf32>
    %147 = arith.addf %144, %146 : vector<2x32xf32>
    %148 = vector.extract_strided_slice %140 {offsets = [0, 96], sizes = [2, 32], strides = [1, 1]} : vector<2x128xf32> to vector<2x32xf32>
    %149 = math.tanh %147 : vector<2x32xf32>
    %150 = arith.mulf %148, %149 : vector<2x32xf32>
    %151 = arith.truncf %150 : vector<2x32xf32> to vector<2x32xbf16>
    %cst_59 = arith.constant dense<0.000000e+00> : vector<2x6xf32>
    %152 = tpu.matmul %151, %35, %cst_59 {dimension_numbers = #tpu.dot_dimension_numbers<[1], [0], [0], [1], [0, 0, 1, 1], [], []>} : vector<2x32xbf16>, vector<32x6xbf16>, vector<2x6xf32> -> vector<2x6xf32>
    %153 = vector.broadcast %36 : vector<1x6xf32> to vector<2x6xf32>
    %154 = arith.addf %152, %153 : vector<2x6xf32>
    %155 = arith.negf %154 : vector<2x6xf32>
    %156 = math.exp %155 : vector<2x6xf32>
    %cst_60 = arith.constant 1.000000e+00 : f32
    %157 = vector.broadcast %cst_60 : f32 to vector<2x6xf32>
    %158 = arith.addf %157, %156 : vector<2x6xf32>
    %159 = arith.divf %157, %158 : vector<2x6xf32>
    %c3 = arith.constant 3 : index
    %c0_61 = arith.constant 0 : index
    %c0_62 = arith.constant 0 : index
    %160 = vector.load %arg17[%c3, %c0_61, %c0_62] : memref<8x2x6xf32, #tpu.memory_space<vmem>>, vector<1x2x6xf32>
    %161 = vector.shape_cast %160 : vector<1x2x6xf32> to vector<2x6xf32>
    %162 = vector.shape_cast %159 : vector<2x6xf32> to vector<1x2x6xf32>
    tpu.vector_store %arg17[%c3, %c0_61, %c0_62], %162 {strides = array<i32>} : memref<8x2x6xf32, #tpu.memory_space<vmem>>, vector<1x2x6xf32>,
    %163 = vector.extract_strided_slice %20 {offsets = [8, 0], sizes = [2, 128], strides = [1, 1]} : vector<16x128xf32> to vector<2x128xf32>
    %164 = arith.addf %163, %33 : vector<2x128xf32>
    %cst_63 = arith.constant dense<0.000000e+00> : vector<2x128xf32>
    %165 = tpu.matmul %150, %34, %cst_63 {dimension_numbers = #tpu.dot_dimension_numbers<[1], [0], [0], [1], [0, 0, 1, 1], [], []>} : vector<2x32xf32>, vector<32x128xf32>, vector<2x128xf32> -> vector<2x128xf32>
    %166 = arith.addf %164, %165 : vector<2x128xf32>
    %167 = arith.negf %166 : vector<2x128xf32>
    %168 = math.exp %167 : vector<2x128xf32>
    %cst_64 = arith.constant 1.000000e+00 : f32
    %169 = vector.broadcast %cst_64 : f32 to vector<2x128xf32>
    %170 = arith.addf %169, %168 : vector<2x128xf32>
    %171 = arith.divf %169, %170 : vector<2x128xf32>
    %172 = vector.extract_strided_slice %166 {offsets = [0, 64], sizes = [2, 32], strides = [1, 1]} : vector<2x128xf32> to vector<2x32xf32>
    %173 = math.tanh %172 : vector<2x32xf32>
    %174 = vector.extract_strided_slice %171 {offsets = [0, 32], sizes = [2, 32], strides = [1, 1]} : vector<2x128xf32> to vector<2x32xf32>
    %175 = arith.mulf %174, %147 : vector<2x32xf32>
    %176 = vector.extract_strided_slice %171 {offsets = [0, 0], sizes = [2, 32], strides = [1, 1]} : vector<2x128xf32> to vector<2x32xf32>
    %177 = arith.mulf %176, %173 : vector<2x32xf32>
    %178 = arith.addf %175, %177 : vector<2x32xf32>
    %179 = vector.extract_strided_slice %171 {offsets = [0, 96], sizes = [2, 32], strides = [1, 1]} : vector<2x128xf32> to vector<2x32xf32>
    %180 = math.tanh %178 : vector<2x32xf32>
    %181 = arith.mulf %179, %180 : vector<2x32xf32>
    %182 = arith.truncf %181 : vector<2x32xf32> to vector<2x32xbf16>
    %cst_65 = arith.constant dense<0.000000e+00> : vector<2x6xf32>
    %183 = tpu.matmul %182, %35, %cst_65 {dimension_numbers = #tpu.dot_dimension_numbers<[1], [0], [0], [1], [0, 0, 1, 1], [], []>} : vector<2x32xbf16>, vector<32x6xbf16>, vector<2x6xf32> -> vector<2x6xf32>
    %184 = vector.broadcast %36 : vector<1x6xf32> to vector<2x6xf32>
    %185 = arith.addf %183, %184 : vector<2x6xf32>
    %186 = arith.negf %185 : vector<2x6xf32>
    %187 = math.exp %186 : vector<2x6xf32>
    %cst_66 = arith.constant 1.000000e+00 : f32
    %188 = vector.broadcast %cst_66 : f32 to vector<2x6xf32>
    %189 = arith.addf %188, %187 : vector<2x6xf32>
    %190 = arith.divf %188, %189 : vector<2x6xf32>
    %c4 = arith.constant 4 : index
    %c0_67 = arith.constant 0 : index
    %c0_68 = arith.constant 0 : index
    %191 = vector.load %arg17[%c4, %c0_67, %c0_68] : memref<8x2x6xf32, #tpu.memory_space<vmem>>, vector<1x2x6xf32>
    %192 = vector.shape_cast %191 : vector<1x2x6xf32> to vector<2x6xf32>
    %193 = vector.shape_cast %190 : vector<2x6xf32> to vector<1x2x6xf32>
    tpu.vector_store %arg17[%c4, %c0_67, %c0_68], %193 {strides = array<i32>} : memref<8x2x6xf32, #tpu.memory_space<vmem>>, vector<1x2x6xf32>,
    %194 = vector.extract_strided_slice %20 {offsets = [10, 0], sizes = [2, 128], strides = [1, 1]} : vector<16x128xf32> to vector<2x128xf32>
    %195 = arith.addf %194, %33 : vector<2x128xf32>
    %cst_69 = arith.constant dense<0.000000e+00> : vector<2x128xf32>
    %196 = tpu.matmul %181, %34, %cst_69 {dimension_numbers = #tpu.dot_dimension_numbers<[1], [0], [0], [1], [0, 0, 1, 1], [], []>} : vector<2x32xf32>, vector<32x128xf32>, vector<2x128xf32> -> vector<2x128xf32>
    %197 = arith.addf %195, %196 : vector<2x128xf32>
    %198 = arith.negf %197 : vector<2x128xf32>
    %199 = math.exp %198 : vector<2x128xf32>
    %cst_70 = arith.constant 1.000000e+00 : f32
    %200 = vector.broadcast %cst_70 : f32 to vector<2x128xf32>
    %201 = arith.addf %200, %199 : vector<2x128xf32>
    %202 = arith.divf %200, %201 : vector<2x128xf32>
    %203 = vector.extract_strided_slice %197 {offsets = [0, 64], sizes = [2, 32], strides = [1, 1]} : vector<2x128xf32> to vector<2x32xf32>
    %204 = math.tanh %203 : vector<2x32xf32>
    %205 = vector.extract_strided_slice %202 {offsets = [0, 32], sizes = [2, 32], strides = [1, 1]} : vector<2x128xf32> to vector<2x32xf32>
    %206 = arith.mulf %205, %178 : vector<2x32xf32>
    %207 = vector.extract_strided_slice %202 {offsets = [0, 0], sizes = [2, 32], strides = [1, 1]} : vector<2x128xf32> to vector<2x32xf32>
    %208 = arith.mulf %207, %204 : vector<2x32xf32>
    %209 = arith.addf %206, %208 : vector<2x32xf32>
    %210 = vector.extract_strided_slice %202 {offsets = [0, 96], sizes = [2, 32], strides = [1, 1]} : vector<2x128xf32> to vector<2x32xf32>
    %211 = math.tanh %209 : vector<2x32xf32>
    %212 = arith.mulf %210, %211 : vector<2x32xf32>
    %213 = arith.truncf %212 : vector<2x32xf32> to vector<2x32xbf16>
    %cst_71 = arith.constant dense<0.000000e+00> : vector<2x6xf32>
    %214 = tpu.matmul %213, %35, %cst_71 {dimension_numbers = #tpu.dot_dimension_numbers<[1], [0], [0], [1], [0, 0, 1, 1], [], []>} : vector<2x32xbf16>, vector<32x6xbf16>, vector<2x6xf32> -> vector<2x6xf32>
    %215 = vector.broadcast %36 : vector<1x6xf32> to vector<2x6xf32>
    %216 = arith.addf %214, %215 : vector<2x6xf32>
    %217 = arith.negf %216 : vector<2x6xf32>
    %218 = math.exp %217 : vector<2x6xf32>
    %cst_72 = arith.constant 1.000000e+00 : f32
    %219 = vector.broadcast %cst_72 : f32 to vector<2x6xf32>
    %220 = arith.addf %219, %218 : vector<2x6xf32>
    %221 = arith.divf %219, %220 : vector<2x6xf32>
    %c5 = arith.constant 5 : index
    %c0_73 = arith.constant 0 : index
    %c0_74 = arith.constant 0 : index
    %222 = vector.load %arg17[%c5, %c0_73, %c0_74] : memref<8x2x6xf32, #tpu.memory_space<vmem>>, vector<1x2x6xf32>
    %223 = vector.shape_cast %222 : vector<1x2x6xf32> to vector<2x6xf32>
    %224 = vector.shape_cast %221 : vector<2x6xf32> to vector<1x2x6xf32>
    tpu.vector_store %arg17[%c5, %c0_73, %c0_74], %224 {strides = array<i32>} : memref<8x2x6xf32, #tpu.memory_space<vmem>>, vector<1x2x6xf32>,
    %225 = vector.extract_strided_slice %20 {offsets = [12, 0], sizes = [2, 128], strides = [1, 1]} : vector<16x128xf32> to vector<2x128xf32>
    %226 = arith.addf %225, %33 : vector<2x128xf32>
    %cst_75 = arith.constant dense<0.000000e+00> : vector<2x128xf32>
    %227 = tpu.matmul %212, %34, %cst_75 {dimension_numbers = #tpu.dot_dimension_numbers<[1], [0], [0], [1], [0, 0, 1, 1], [], []>} : vector<2x32xf32>, vector<32x128xf32>, vector<2x128xf32> -> vector<2x128xf32>
    %228 = arith.addf %226, %227 : vector<2x128xf32>
    %229 = arith.negf %228 : vector<2x128xf32>
    %230 = math.exp %229 : vector<2x128xf32>
    %cst_76 = arith.constant 1.000000e+00 : f32
    %231 = vector.broadcast %cst_76 : f32 to vector<2x128xf32>
    %232 = arith.addf %231, %230 : vector<2x128xf32>
    %233 = arith.divf %231, %232 : vector<2x128xf32>
    %234 = vector.extract_strided_slice %228 {offsets = [0, 64], sizes = [2, 32], strides = [1, 1]} : vector<2x128xf32> to vector<2x32xf32>
    %235 = math.tanh %234 : vector<2x32xf32>
    %236 = vector.extract_strided_slice %233 {offsets = [0, 32], sizes = [2, 32], strides = [1, 1]} : vector<2x128xf32> to vector<2x32xf32>
    %237 = arith.mulf %236, %209 : vector<2x32xf32>
    %238 = vector.extract_strided_slice %233 {offsets = [0, 0], sizes = [2, 32], strides = [1, 1]} : vector<2x128xf32> to vector<2x32xf32>
    %239 = arith.mulf %238, %235 : vector<2x32xf32>
    %240 = arith.addf %237, %239 : vector<2x32xf32>
    %241 = vector.extract_strided_slice %233 {offsets = [0, 96], sizes = [2, 32], strides = [1, 1]} : vector<2x128xf32> to vector<2x32xf32>
    %242 = math.tanh %240 : vector<2x32xf32>
    %243 = arith.mulf %241, %242 : vector<2x32xf32>
    %244 = arith.truncf %243 : vector<2x32xf32> to vector<2x32xbf16>
    %cst_77 = arith.constant dense<0.000000e+00> : vector<2x6xf32>
    %245 = tpu.matmul %244, %35, %cst_77 {dimension_numbers = #tpu.dot_dimension_numbers<[1], [0], [0], [1], [0, 0, 1, 1], [], []>} : vector<2x32xbf16>, vector<32x6xbf16>, vector<2x6xf32> -> vector<2x6xf32>
    %246 = vector.broadcast %36 : vector<1x6xf32> to vector<2x6xf32>
    %247 = arith.addf %245, %246 : vector<2x6xf32>
    %248 = arith.negf %247 : vector<2x6xf32>
    %249 = math.exp %248 : vector<2x6xf32>
    %cst_78 = arith.constant 1.000000e+00 : f32
    %250 = vector.broadcast %cst_78 : f32 to vector<2x6xf32>
    %251 = arith.addf %250, %249 : vector<2x6xf32>
    %252 = arith.divf %250, %251 : vector<2x6xf32>
    %c6 = arith.constant 6 : index
    %c0_79 = arith.constant 0 : index
    %c0_80 = arith.constant 0 : index
    %253 = vector.load %arg17[%c6, %c0_79, %c0_80] : memref<8x2x6xf32, #tpu.memory_space<vmem>>, vector<1x2x6xf32>
    %254 = vector.shape_cast %253 : vector<1x2x6xf32> to vector<2x6xf32>
    %255 = vector.shape_cast %252 : vector<2x6xf32> to vector<1x2x6xf32>
    tpu.vector_store %arg17[%c6, %c0_79, %c0_80], %255 {strides = array<i32>} : memref<8x2x6xf32, #tpu.memory_space<vmem>>, vector<1x2x6xf32>,
    %256 = vector.extract_strided_slice %20 {offsets = [14, 0], sizes = [2, 128], strides = [1, 1]} : vector<16x128xf32> to vector<2x128xf32>
    %257 = arith.addf %256, %33 : vector<2x128xf32>
    %cst_81 = arith.constant dense<0.000000e+00> : vector<2x128xf32>
    %258 = tpu.matmul %243, %34, %cst_81 {dimension_numbers = #tpu.dot_dimension_numbers<[1], [0], [0], [1], [0, 0, 1, 1], [], []>} : vector<2x32xf32>, vector<32x128xf32>, vector<2x128xf32> -> vector<2x128xf32>
    %259 = arith.addf %257, %258 : vector<2x128xf32>
    %260 = arith.negf %259 : vector<2x128xf32>
    %261 = math.exp %260 : vector<2x128xf32>
    %cst_82 = arith.constant 1.000000e+00 : f32
    %262 = vector.broadcast %cst_82 : f32 to vector<2x128xf32>
    %263 = arith.addf %262, %261 : vector<2x128xf32>
    %264 = arith.divf %262, %263 : vector<2x128xf32>
    %265 = vector.extract_strided_slice %259 {offsets = [0, 64], sizes = [2, 32], strides = [1, 1]} : vector<2x128xf32> to vector<2x32xf32>
    %266 = math.tanh %265 : vector<2x32xf32>
    %267 = vector.extract_strided_slice %264 {offsets = [0, 32], sizes = [2, 32], strides = [1, 1]} : vector<2x128xf32> to vector<2x32xf32>
    %268 = arith.mulf %267, %240 : vector<2x32xf32>
    %269 = vector.extract_strided_slice %264 {offsets = [0, 0], sizes = [2, 32], strides = [1, 1]} : vector<2x128xf32> to vector<2x32xf32>
    %270 = arith.mulf %269, %266 : vector<2x32xf32>
    %271 = arith.addf %268, %270 : vector<2x32xf32>
    %272 = vector.extract_strided_slice %264 {offsets = [0, 96], sizes = [2, 32], strides = [1, 1]} : vector<2x128xf32> to vector<2x32xf32>
    %273 = math.tanh %271 : vector<2x32xf32>
    %274 = arith.mulf %272, %273 : vector<2x32xf32>
    %275 = arith.truncf %274 : vector<2x32xf32> to vector<2x32xbf16>
    %cst_83 = arith.constant dense<0.000000e+00> : vector<2x6xf32>
    %276 = tpu.matmul %275, %35, %cst_83 {dimension_numbers = #tpu.dot_dimension_numbers<[1], [0], [0], [1], [0, 0, 1, 1], [], []>} : vector<2x32xbf16>, vector<32x6xbf16>, vector<2x6xf32> -> vector<2x6xf32>
    %277 = vector.broadcast %36 : vector<1x6xf32> to vector<2x6xf32>
    %278 = arith.addf %276, %277 : vector<2x6xf32>
    %279 = arith.negf %278 : vector<2x6xf32>
    %280 = math.exp %279 : vector<2x6xf32>
    %cst_84 = arith.constant 1.000000e+00 : f32
    %281 = vector.broadcast %cst_84 : f32 to vector<2x6xf32>
    %282 = arith.addf %281, %280 : vector<2x6xf32>
    %283 = arith.divf %281, %282 : vector<2x6xf32>
    %c7 = arith.constant 7 : index
    %c0_85 = arith.constant 0 : index
    %c0_86 = arith.constant 0 : index
    %284 = vector.load %arg17[%c7, %c0_85, %c0_86] : memref<8x2x6xf32, #tpu.memory_space<vmem>>, vector<1x2x6xf32>
    %285 = vector.shape_cast %284 : vector<1x2x6xf32> to vector<2x6xf32>
    %286 = vector.shape_cast %283 : vector<2x6xf32> to vector<1x2x6xf32>
    tpu.vector_store %arg17[%c7, %c0_85, %c0_86], %286 {strides = array<i32>} : memref<8x2x6xf32, #tpu.memory_space<vmem>>, vector<1x2x6xf32>,
    return
  }
  func.func @transform_0(%arg0: i32) -> (i32, i32) {
    %c0_i32 = arith.constant 0 : i32
    %c0_i32_0 = arith.constant 0 : i32
    %c0_i32_1 = arith.constant 0 : i32
    return %c0_i32, %c0_i32_0 : i32, i32
  }
  func.func @transform_1(%arg0: i32) -> (i32, i32) {
    %c0_i32 = arith.constant 0 : i32
    %c0_i32_0 = arith.constant 0 : i32
    %c0_i32_1 = arith.constant 0 : i32
    return %c0_i32, %c0_i32_0 : i32, i32
  }
  func.func @transform_2(%arg0: i32) -> (i32, i32) {
    %c0_i32 = arith.constant 0 : i32
    %c0_i32_0 = arith.constant 0 : i32
    %c0_i32_1 = arith.constant 0 : i32
    return %c0_i32, %c0_i32_0 : i32, i32
  }
  func.func @transform_3(%arg0: i32) -> (i32, i32) {
    %c0_i32 = arith.constant 0 : i32
    %c0_i32_0 = arith.constant 0 : i32
    %c0_i32_1 = arith.constant 0 : i32
    return %c0_i32, %c0_i32_0 : i32, i32
  }
  func.func @transform_4(%arg0: i32) -> (i32, i32) {
    %c0_i32 = arith.constant 0 : i32
    %c0_i32_0 = arith.constant 0 : i32
    %c0_i32_1 = arith.constant 0 : i32
    return %c0_i32, %c0_i32_0 : i32, i32
  }
  func.func @transform_5(%arg0: i32) -> (i32, i32) {
    %c0_i32 = arith.constant 0 : i32
    %c0_i32_0 = arith.constant 0 : i32
    %c0_i32_1 = arith.constant 0 : i32
    return %c0_i32, %c0_i32_0 : i32, i32
  }
  func.func @transform_6(%arg0: i32) -> (i32, i32) {
    %c0_i32 = arith.constant 0 : i32
    %c0_i32_0 = arith.constant 0 : i32
    %c0_i32_1 = arith.constant 0 : i32
    return %c0_i32, %c0_i32_0 : i32, i32
  }
  func.func @transform_7(%arg0: i32) -> (i32, i32) {
    %c0_i32 = arith.constant 0 : i32
    %c0_i32_0 = arith.constant 0 : i32
    %c0_i32_1 = arith.constant 0 : i32
    return %c0_i32, %c0_i32_0 : i32, i32
  }
  func.func @transform_8(%arg0: i32) -> (i32, i32) {
    %c0_i32 = arith.constant 0 : i32
    %c0_i32_0 = arith.constant 0 : i32
    %c0_i32_1 = arith.constant 0 : i32
    return %c0_i32, %c0_i32_0 : i32, i32
  }
  func.func @transform_9(%arg0: i32) -> (i32, i32) {
    %c0_i32 = arith.constant 0 : i32
    %c0_i32_0 = arith.constant 0 : i32
    %c0_i32_1 = arith.constant 0 : i32
    return %c0_i32, %c0_i32_0 : i32, i32
  }
  func.func @transform_10(%arg0: i32) -> (i32, i32) {
    %c0_i32 = arith.constant 0 : i32
    %c0_i32_0 = arith.constant 0 : i32
    %c0_i32_1 = arith.constant 0 : i32
    return %c0_i32, %c0_i32_0 : i32, i32
  }
  func.func @transform_11(%arg0: i32) -> (i32, i32) {
    %c0_i32 = arith.constant 0 : i32
    %c0_i32_0 = arith.constant 0 : i32
    %c0_i32_1 = arith.constant 0 : i32
    return %c0_i32, %c0_i32_0 : i32, i32
  }
  func.func @transform_12(%arg0: i32) -> (i32, i32) {
    %c0_i32 = arith.constant 0 : i32
    %c0_i32_0 = arith.constant 0 : i32
    %c0_i32_1 = arith.constant 0 : i32
    return %c0_i32, %c0_i32_0 : i32, i32
  }
  func.func @transform_13(%arg0: i32) -> (i32, i32) {
    %c0_i32 = arith.constant 0 : i32
    %c0_i32_0 = arith.constant 0 : i32
    %c0_i32_1 = arith.constant 0 : i32
    return %c0_i32, %c0_i32_0 : i32, i32
  }
  func.func @transform_14(%arg0: i32) -> (i32, i32) {
    %c0_i32 = arith.constant 0 : i32
    %c0_i32_0 = arith.constant 0 : i32
    %c0_i32_1 = arith.constant 0 : i32
    return %c0_i32, %c0_i32_0 : i32, i32
  }
  func.func @transform_15(%arg0: i32) -> (i32, i32) {
    %c0_i32 = arith.constant 0 : i32
    %c0_i32_0 = arith.constant 0 : i32
    %c0_i32_1 = arith.constant 0 : i32
    return %c0_i32, %c0_i32_0 : i32, i32
  }
  func.func @transform_16(%arg0: i32) -> (i32, i32, i32) {
    %c0_i32 = arith.constant 0 : i32
    %c0_i32_0 = arith.constant 0 : i32
    %c0_i32_1 = arith.constant 0 : i32
    %c0_i32_2 = arith.constant 0 : i32
    return %c0_i32, %c0_i32_0, %c0_i32_1 : i32, i32, i32
  }
}

</mosaic_0001>

<bundles_post_ra>
// kernel: seq_cvae_forward.4
= control target key start
LH: loop header
LB: loop body
LE: loop exit
PB: predicated region body
PF: predicated region fallthrough
CT: control target
= control target key end

     0   :  { %v2227_v0 = vmov 0   ;;  %vm734_vm0 = vcmask 556032   ;;  %vm903_vm1 = vcmask 1041408   ;;  %vm1498_vm2 = vcmask 523264   ;;  %s3266_s1 = inlined_call_operand.vmem [shape: bf16[196,64], index: 1, kind: input, shape index: {}]   ;;  %s3267_s0 = inlined_call_operand.vmem [shape: bf16[882,196], index: 0, kind: input, shape index: {}]   ;;  %s3268_s2 = inlined_call_operand.vmem [shape: f32[1,64], index: 2, kind: input, shape index: {}]   ;;  %s3269_s3 = inlined_call_operand.vmem [shape: f32[882,64], index: 3, kind: output, shape index: {}]  }
   0x1   :  { %907 = vmatprep.subr.bf16.mxu0 %v2227_v0  ;;  %1797 = vmatprep.subr.bf16.mxu1 %v2227_v0  ;;  %v1824_v1 = vld [vmem:[%s3266_s1] sm:$0xff]   ;;  %v1825_v2 = vld [vmem:[%s3266_s1 + $0x8] sm:$0xff]   ;;  %v1826_v3 = vld [vmem:[%s3266_s1 + $0x10] sm:$0xff]   ;;  %vm1609_vm3 = vcmask 517120  }
   0x2   :  { %908 = vmatpush1.bf16.msra.mxu0 %v1824_v1  ;;  %1810 = vmatpush1.bf16.msra.mxu1 %v1824_v1  ;;  %v1827_v4 = vld [vmem:[%s3266_s1 + $0x18] sm:$0xff]   ;;  %v1839_v5 = vld [vmem:[%s3267_s0 + $0x4] ss:$8 sps:$4 sm:$0xff]   ;;  %v1830_v9 = vld [vmem:[%s3266_s1 + $0x30] sm:$0xff]  }
   0x3   :  { %909 = vmatprep.subr.bf16.mxu0 %v2227_v0  ;;  %1798 = vmatprep.subr.bf16.mxu1 %v2227_v0  ;;  %v1828_v6 = vld [vmem:[%s3266_s1 + $0x20] sm:$0xff]   ;;  %v1829_v8 = vld [vmem:[%s3266_s1 + $0x28] sm:$0xff]   ;;  %v1831_v10 = vld [vmem:[%s3266_s1 + $0x38] sm:$0xff]  }
   0x4   :  { %v1842_v7 = vld [vmem:[%s3267_s0 + $0x1c4] ss:$8 sps:$4 sm:$0xff]   ;;  %1741 = vmatprep.mubr.msk.bf16.mxu0 %vm734_vm0, %v1839_v5  ;;  %v1834_v13 = vld [vmem:[%s3266_s1 + $0x50] sm:$0xff]   ;;  %v1835_v14 = vld [vmem:[%s3266_s1 + $0x58] sm:$0xff]  }
   0x5   :  { %1769 = vmatprep.mubr.msk.bf16.mxu1 %vm734_vm0, %v1842_v7  ;;  %v1832_v11 = vld [vmem:[%s3266_s1 + $0x40] sm:$0xff]   ;;  %v1833_v12 = vld [vmem:[%s3266_s1 + $0x48] sm:$0xff]   ;;  %v1843_v19 = vld [vmem:[%s3267_s0 + $0x14] ss:$8 sps:$4 sm:$0xff]  }
   0x6   :  { %910 = vmatpush1.bf16.msra.mxu0 %v1825_v2  ;;  %1811 = vmatpush1.bf16.msra.mxu1 %v1825_v2  ;;  %v1836_v15 = vld [vmem:[%s3266_s1 + $0x60] ss:$0 sps:$4 sm:$0x33]   ;;  %v1845_v20 = vld [vmem:[%s3267_s0 + $0x1d4] ss:$8 sps:$4 sm:$0xff]  }
   0x7   :  { %911 = vmatprep.subr.bf16.mxu0 %v2227_v0  ;;  %1799 = vmatprep.subr.bf16.mxu1 %v2227_v0  ;;  %v905_v16 = vsel %vm903_vm1, %v1836_v15, 0  ;;  %v1837_v17 = vld [vmem:[%s3267_s0] ss:$8 sps:$4 sm:$0xff]   ;;  %v1847_v21 = vld [vmem:[%s3267_s0 + $0x10] ss:$8 sps:$4 sm:$0xff]  }
   0x8   :  { %v1840_v18 = vld [vmem:[%s3267_s0 + $0x1c0] ss:$8 sps:$4 sm:$0xff]   ;;  %v1848_v22 = vld [vmem:[%s3267_s0 + $0x1d0] ss:$8 sps:$4 sm:$0xff]   ;;  %v1849_v23 = vld [vmem:[%s3267_s0 + $0x24] ss:$8 sps:$4 sm:$0xff]  }
   0x9   :  { %v1851_v24 = vld [vmem:[%s3267_s0 + $0x1e4] ss:$8 sps:$4 sm:$0xff]   ;;  %v1853_v25 = vld [vmem:[%s3267_s0 + $0x20] ss:$8 sps:$4 sm:$0xff]   ;;  %v1855_v27 = vld [vmem:[%s3267_s0 + $0x34] ss:$8 sps:$4 sm:$0xff]  }
   0xa   :  { %912 = vmatpush1.bf16.msra.mxu0 %v1826_v3  ;;  %1812 = vmatpush1.bf16.msra.mxu1 %v1826_v3  ;;  %v1854_v26 = vld [vmem:[%s3267_s0 + $0x1e0] ss:$8 sps:$4 sm:$0xff]   ;;  %v1857_v28 = vld [vmem:[%s3267_s0 + $0x1f4] ss:$8 sps:$4 sm:$0xff]   ;;  %v1859_v29 = vld [vmem:[%s3267_s0 + $0x30] ss:$8 sps:$4 sm:$0xff]  }
   0xb   :  { %913 = vmatprep.subr.bf16.mxu0 %v2227_v0  ;;  %1800 = vmatprep.subr.bf16.mxu1 %v2227_v0  ;;  %v1860_v30 = vld [vmem:[%s3267_s0 + $0x1f0] ss:$8 sps:$4 sm:$0xff]   ;;  %v1861_v31 = vld [vmem:[%s3267_s0 + $0x44] ss:$8 sps:$4 sm:$0xff]   ;;  %v1865_v33 = vld [vmem:[%s3267_s0 + $0x40] ss:$8 sps:$4 sm:$0xff]  }
   0xc   :  { %v1863_v32 = vld [vmem:[%s3267_s0 + $0x204] ss:$8 sps:$4 sm:$0xff]   ;;  %v1866_v34 = vld [vmem:[%s3267_s0 + $0x200] ss:$8 sps:$4 sm:$0xff]   ;;  %v1867_v35 = vld [vmem:[%s3267_s0 + $0x54] ss:$8 sps:$4 sm:$0xff]  }
   0xd   :  { %v1869_v36 = vld [vmem:[%s3267_s0 + $0x214] ss:$8 sps:$4 sm:$0xff]   ;;  %v1871_v37 = vld [vmem:[%s3267_s0 + $0x50] ss:$8 sps:$4 sm:$0xff]   ;;  %v1873_v39 = vld [vmem:[%s3267_s0 + $0x64] ss:$8 sps:$4 sm:$0xff]  }
   0xe   :  { %914 = vmatpush1.bf16.msra.mxu0 %v1827_v4  ;;  %1813 = vmatpush1.bf16.msra.mxu1 %v1827_v4  ;;  %v1872_v38 = vld [vmem:[%s3267_s0 + $0x210] ss:$8 sps:$4 sm:$0xff]   ;;  %v1875_v40 = vld [vmem:[%s3267_s0 + $0x224] ss:$8 sps:$4 sm:$0xff]   ;;  %v1877_v41 = vld [vmem:[%s3267_s0 + $0x60] ss:$8 sps:$4 sm:$0xff]  }
   0xf   :  { %915 = vmatprep.subr.bf16.mxu0 %v2227_v0  ;;  %1801 = vmatprep.subr.bf16.mxu1 %v2227_v0  ;;  %v1878_v42 = vld [vmem:[%s3267_s0 + $0x220] ss:$8 sps:$4 sm:$0xff]   ;;  %v1879_v43 = vld [vmem:[%s3267_s0 + $0x74] ss:$8 sps:$4 sm:$0xff]   ;;  %v1883_v45 = vld [vmem:[%s3267_s0 + $0x70] ss:$8 sps:$4 sm:$0xff]  }
  0x10   :  { %v1881_v44 = vld [vmem:[%s3267_s0 + $0x234] ss:$8 sps:$4 sm:$0xff]   ;;  %v1884_v46 = vld [vmem:[%s3267_s0 + $0x230] ss:$8 sps:$4 sm:$0xff]   ;;  %v1885_v47 = vld [vmem:[%s3267_s0 + $0x84] ss:$8 sps:$4 sm:$0xff]  }
  0x11   :  { %v1887_v48 = vld [vmem:[%s3267_s0 + $0x244] ss:$8 sps:$4 sm:$0xff]   ;;  %v1889_v49 = vld [vmem:[%s3267_s0 + $0x80] ss:$8 sps:$4 sm:$0xff]   ;;  %v1891_v51 = vld [vmem:[%s3267_s0 + $0x94] ss:$8 sps:$4 sm:$0xff]  }
  0x12   :  { %916 = vmatpush1.bf16.msra.mxu0 %v1828_v6  ;;  %1814 = vmatpush1.bf16.msra.mxu1 %v1828_v6  ;;  %v1890_v50 = vld [vmem:[%s3267_s0 + $0x240] ss:$8 sps:$4 sm:$0xff]   ;;  %v1893_v52 = vld [vmem:[%s3267_s0 + $0x254] ss:$8 sps:$4 sm:$0xff]   ;;  %v1895_v53 = vld [vmem:[%s3267_s0 + $0x90] ss:$8 sps:$4 sm:$0xff]  }
  0x13   :  { %917 = vmatprep.subr.bf16.mxu0 %v2227_v0  ;;  %1802 = vmatprep.subr.bf16.mxu1 %v2227_v0  ;;  %v1896_v54 = vld [vmem:[%s3267_s0 + $0x250] ss:$8 sps:$4 sm:$0xff]   ;;  %v1897_v55 = vld [vmem:[%s3267_s0 + $0xa4] ss:$8 sps:$4 sm:$0xff]   ;;  %v1901_v57 = vld [vmem:[%s3267_s0 + $0xa0] ss:$8 sps:$4 sm:$0xff]  }
  0x14   :  { %v1899_v56 = vld [vmem:[%s3267_s0 + $0x264] ss:$8 sps:$4 sm:$0xff]   ;;  %v1902_v58 = vld [vmem:[%s3267_s0 + $0x260] ss:$8 sps:$4 sm:$0xff]   ;;  %v1903_v59 = vld [vmem:[%s3267_s0 + $0xb4] ss:$8 sps:$4 sm:$0xff]  }
  0x15   :  { %v1905_v60 = vld [vmem:[%s3267_s0 + $0x274] ss:$8 sps:$4 sm:$0xff]   ;;  %v1907_v61 = vld [vmem:[%s3267_s0 + $0xb0] ss:$8 sps:$4 sm:$0xff]   ;;  %v1909_v63 = vld [vmem:[%s3267_s0 + $0xc4] ss:$8 sps:$4 sm:$0xff]  }
  0x16   :  { %918 = vmatpush1.bf16.msra.mxu0 %v1829_v8  ;;  %1815 = vmatpush1.bf16.msra.mxu1 %v1829_v8  ;;  %v1908_v62 = vld [vmem:[%s3267_s0 + $0x270] ss:$8 sps:$4 sm:$0xff]   ;;  %v1913_v1 = vld [vmem:[%s3267_s0 + $0xc0] ss:$8 sps:$4 sm:$0xff]   ;;  %v1915_v3 = vld [vmem:[%s3267_s0 + $0xd4] ss:$8 sps:$4 sm:$0xff]  }
  0x17   :  { %919 = vmatprep.subr.bf16.mxu0 %v2227_v0  ;;  %1803 = vmatprep.subr.bf16.mxu1 %v2227_v0  ;;  %v1914_v2 = vld [vmem:[%s3267_s0 + $0x280] ss:$8 sps:$4 sm:$0xff]   ;;  %v1917_v4 = vld [vmem:[%s3267_s0 + $0x294] ss:$8 sps:$4 sm:$0xff]   ;;  %v1919_v5 = vld [vmem:[%s3267_s0 + $0xd0] ss:$8 sps:$4 sm:$0xff]  }
  0x18   :  { %v1920_v6 = vld [vmem:[%s3267_s0 + $0x290] ss:$8 sps:$4 sm:$0xff]   ;;  %v1921_v7 = vld [vmem:[%s3267_s0 + $0xe4] ss:$8 sps:$4 sm:$0xff]  }
  0x19   :  { %v1923_v8 = vld [vmem:[%s3267_s0 + $0x2a4] ss:$8 sps:$4 sm:$0xff]  }
  0x1a   :  { %920 = vmatpush1.bf16.msra.mxu0 %v1830_v9  ;;  %1816 = vmatpush1.bf16.msra.mxu1 %v1830_v9  ;;  %v1925_v9 = vld [vmem:[%s3267_s0 + $0xe0] ss:$8 sps:$4 sm:$0xff]   ;;  %v1933_v15 = vld [vmem:[%s3267_s0 + $0x104] ss:$8 sps:$4 sm:$0xff]  }
  0x1b   :  { %921 = vmatprep.subr.bf16.mxu0 %v2227_v0  ;;  %1804 = vmatprep.subr.bf16.mxu1 %v2227_v0 }
  0x1e   :  { %922 = vmatpush1.bf16.msra.mxu0 %v1831_v10  ;;  %1817 = vmatpush1.bf16.msra.mxu1 %v1831_v10  ;;  %v1926_v10 = vld [vmem:[%s3267_s0 + $0x2a0] ss:$8 sps:$4 sm:$0xff]  }
  0x1f   :  { %923 = vmatprep.subr.bf16.mxu0 %v2227_v0  ;;  %1805 = vmatprep.subr.bf16.mxu1 %v2227_v0 }
  0x22   :  { %924 = vmatpush1.bf16.msra.mxu0 %v1832_v11  ;;  %1818 = vmatpush1.bf16.msra.mxu1 %v1832_v11  ;;  %v1927_v11 = vld [vmem:[%s3267_s0 + $0xf4] ss:$8 sps:$4 sm:$0xff]  }
  0x23   :  { %925 = vmatprep.subr.bf16.mxu0 %v2227_v0  ;;  %1806 = vmatprep.subr.bf16.mxu1 %v2227_v0 }
  0x26   :  { %926 = vmatpush1.bf16.msra.mxu0 %v1833_v12  ;;  %1819 = vmatpush1.bf16.msra.mxu1 %v1833_v12  ;;  %v1929_v12 = vld [vmem:[%s3267_s0 + $0x2b4] ss:$8 sps:$4 sm:$0xff]  }
  0x27   :  { %927 = vmatprep.subr.bf16.mxu0 %v2227_v0  ;;  %1807 = vmatprep.subr.bf16.mxu1 %v2227_v0 }
  0x2a   :  { %928 = vmatpush1.bf16.msra.mxu0 %v1834_v13  ;;  %1820 = vmatpush1.bf16.msra.mxu1 %v1834_v13  ;;  %v1931_v13 = vld [vmem:[%s3267_s0 + $0xf0] ss:$8 sps:$4 sm:$0xff]  }
  0x2b   :  { %929 = vmatprep.subr.bf16.mxu0 %v2227_v0  ;;  %1808 = vmatprep.subr.bf16.mxu1 %v2227_v0 }
  0x2e   :  { %930 = vmatpush1.bf16.msra.mxu0 %v1835_v14  ;;  %1821 = vmatpush1.bf16.msra.mxu1 %v1835_v14  ;;  %v1932_v14 = vld [vmem:[%s3267_s0 + $0x2b0] ss:$8 sps:$4 sm:$0xff]  }
  0x2f   :  { %931 = vmatprep.subr.bf16.mxu0 %v2227_v0  ;;  %1809 = vmatprep.subr.bf16.mxu1 %v2227_v0  ;;  %v1911_v0 = vld [vmem:[%s3267_s0 + $0x284] ss:$8 sps:$4 sm:$0xff]  }
  0x32   :  { %932 = vmatpush1.bf16.msra.mxu0 %v905_v16  ;;  %1822 = vmatpush1.bf16.msra.mxu1 %v905_v16  ;;  %v1935_v16 = vld [vmem:[%s3267_s0 + $0x2c4] ss:$8 sps:$4 sm:$0xff]  }
  0x35   :  { %940 = vmatmul.mubr.bf16.vlgmr.msra.gmra.mrb[0].mxu0 %v1837_v17  ;;  %1164 = vmatmul.mubr.bf16.vlgmr.msra.gmra.mrb[0].mxu1 %v1840_v18  ;;  %v1937_v17 = vld [vmem:[%s3267_s0 + $0x100] ss:$8 sps:$4 sm:$0xff]  }
  0x36   :  { %1742 = vmatprep.mubr.msk.bf16.mxu0 %vm734_vm0, %v1843_v19  ;;  %1770 = vmatprep.mubr.msk.bf16.mxu1 %vm734_vm0, %v1845_v20  ;;  %v1938_v18 = vld [vmem:[%s3267_s0 + $0x2c0] ss:$8 sps:$4 sm:$0xff]   ;;  %v1939_v19 = vld [vmem:[%s3267_s0 + $0x114] ss:$8 sps:$4 sm:$0xff]  }
  0x37   :  { %v1941_v20 = vld [vmem:[%s3267_s0 + $0x2d4] ss:$8 sps:$4 sm:$0xff]  }
  0x3d   :  { %948 = vmatmul.mubr.bf16.gmra.mrb[4].mxu0 %v1847_v21  ;;  %1172 = vmatmul.mubr.bf16.gmra.mrb[4].mxu1 %v1848_v22  ;;  %v1943_v21 = vld [vmem:[%s3267_s0 + $0x110] ss:$8 sps:$4 sm:$0xff]  }
  0x3e   :  { %1743 = vmatprep.mubr.msk.bf16.mxu0 %vm734_vm0, %v1849_v23  ;;  %1771 = vmatprep.mubr.msk.bf16.mxu1 %vm734_vm0, %v1851_v24  ;;  %v1944_v22 = vld [vmem:[%s3267_s0 + $0x2d0] ss:$8 sps:$4 sm:$0xff]   ;;  %v1945_v23 = vld [vmem:[%s3267_s0 + $0x124] ss:$8 sps:$4 sm:$0xff]  }
  0x3f   :  { %v1947_v24 = vld [vmem:[%s3267_s0 + $0x2e4] ss:$8 sps:$4 sm:$0xff]  }
  0x45   :  { %956 = vmatmul.mubr.bf16.gmra.mrb[8].mxu0 %v1853_v25  ;;  %1180 = vmatmul.mubr.bf16.gmra.mrb[8].mxu1 %v1854_v26  ;;  %v1949_v25 = vld [vmem:[%s3267_s0 + $0x120] ss:$8 sps:$4 sm:$0xff]  }
  0x46   :  { %1744 = vmatprep.mubr.msk.bf16.mxu0 %vm734_vm0, %v1855_v27  ;;  %1772 = vmatprep.mubr.msk.bf16.mxu1 %vm734_vm0, %v1857_v28  ;;  %v1950_v26 = vld [vmem:[%s3267_s0 + $0x2e0] ss:$8 sps:$4 sm:$0xff]   ;;  %v1951_v27 = vld [vmem:[%s3267_s0 + $0x134] ss:$8 sps:$4 sm:$0xff]  }
  0x47   :  { %v1953_v28 = vld [vmem:[%s3267_s0 + $0x2f4] ss:$8 sps:$4 sm:$0xff]  }
  0x4d   :  { %964 = vmatmul.mubr.bf16.gmra.mrb[12].mxu0 %v1859_v29  ;;  %1188 = vmatmul.mubr.bf16.gmra.mrb[12].mxu1 %v1860_v30  ;;  %v1955_v29 = vld [vmem:[%s3267_s0 + $0x130] ss:$8 sps:$4 sm:$0xff]  }
  0x4e   :  { %1745 = vmatprep.mubr.msk.bf16.mxu0 %vm734_vm0, %v1861_v31  ;;  %1773 = vmatprep.mubr.msk.bf16.mxu1 %vm734_vm0, %v1863_v32  ;;  %v1956_v30 = vld [vmem:[%s3267_s0 + $0x2f0] ss:$8 sps:$4 sm:$0xff]   ;;  %v1957_v31 = vld [vmem:[%s3267_s0 + $0x144] ss:$8 sps:$4 sm:$0xff]  }
  0x4f   :  { %v1959_v32 = vld [vmem:[%s3267_s0 + $0x304] ss:$8 sps:$4 sm:$0xff]  }
  0x55   :  { %972 = vmatmul.mubr.bf16.gmra.mrb[16].mxu0 %v1865_v33  ;;  %1196 = vmatmul.mubr.bf16.gmra.mrb[16].mxu1 %v1866_v34  ;;  %v1961_v33 = vld [vmem:[%s3267_s0 + $0x140] ss:$8 sps:$4 sm:$0xff]  }
  0x56   :  { %1746 = vmatprep.mubr.msk.bf16.mxu0 %vm734_vm0, %v1867_v35  ;;  %1774 = vmatprep.mubr.msk.bf16.mxu1 %vm734_vm0, %v1869_v36  ;;  %v1962_v34 = vld [vmem:[%s3267_s0 + $0x300] ss:$8 sps:$4 sm:$0xff]   ;;  %v1963_v35 = vld [vmem:[%s3267_s0 + $0x154] ss:$8 sps:$4 sm:$0xff]  }
  0x57   :  { %v1965_v36 = vld [vmem:[%s3267_s0 + $0x314] ss:$8 sps:$4 sm:$0xff]  }
  0x5d   :  { %980 = vmatmul.mubr.bf16.gmra.mrb[20].mxu0 %v1871_v37  ;;  %1204 = vmatmul.mubr.bf16.gmra.mrb[20].mxu1 %v1872_v38  ;;  %v1967_v37 = vld [vmem:[%s3267_s0 + $0x150] ss:$8 sps:$4 sm:$0xff]  }
  0x5e   :  { %1747 = vmatprep.mubr.msk.bf16.mxu0 %vm734_vm0, %v1873_v39  ;;  %1775 = vmatprep.mubr.msk.bf16.mxu1 %vm734_vm0, %v1875_v40  ;;  %v1968_v38 = vld [vmem:[%s3267_s0 + $0x310] ss:$8 sps:$4 sm:$0xff]   ;;  %v1969_v39 = vld [vmem:[%s3267_s0 + $0x164] ss:$8 sps:$4 sm:$0xff]  }
  0x5f   :  { %v1971_v40 = vld [vmem:[%s3267_s0 + $0x324] ss:$8 sps:$4 sm:$0xff]  }
  0x65   :  { %988 = vmatmul.mubr.bf16.gmra.mrb[24].mxu0 %v1877_v41  ;;  %1212 = vmatmul.mubr.bf16.gmra.mrb[24].mxu1 %v1878_v42  ;;  %v1973_v41 = vld [vmem:[%s3267_s0 + $0x160] ss:$8 sps:$4 sm:$0xff]  }
  0x66   :  { %1748 = vmatprep.mubr.msk.bf16.mxu0 %vm734_vm0, %v1879_v43  ;;  %1776 = vmatprep.mubr.msk.bf16.mxu1 %vm734_vm0, %v1881_v44  ;;  %v1974_v42 = vld [vmem:[%s3267_s0 + $0x320] ss:$8 sps:$4 sm:$0xff]   ;;  %v1975_v43 = vld [vmem:[%s3267_s0 + $0x174] ss:$8 sps:$4 sm:$0xff]  }
  0x67   :  { %v1977_v44 = vld [vmem:[%s3267_s0 + $0x334] ss:$8 sps:$4 sm:$0xff]  }
  0x6d   :  { %996 = vmatmul.mubr.bf16.gmra.mrb[28].mxu0 %v1883_v45  ;;  %1220 = vmatmul.mubr.bf16.gmra.mrb[28].mxu1 %v1884_v46  ;;  %v1979_v45 = vld [vmem:[%s3267_s0 + $0x170] ss:$8 sps:$4 sm:$0xff]  }
  0x6e   :  { %1749 = vmatprep.mubr.msk.bf16.mxu0 %vm734_vm0, %v1885_v47  ;;  %1777 = vmatprep.mubr.msk.bf16.mxu1 %vm734_vm0, %v1887_v48  ;;  %v1980_v46 = vld [vmem:[%s3267_s0 + $0x330] ss:$8 sps:$4 sm:$0xff]   ;;  %v1981_v47 = vld [vmem:[%s3267_s0 + $0x184] ss:$8 sps:$4 sm:$0xff]  }
  0x6f   :  { %v1983_v48 = vld [vmem:[%s3267_s0 + $0x344] ss:$8 sps:$4 sm:$0xff]  }
  0x75   :  { %1004 = vmatmul.mubr.bf16.gmra.mrb[32].mxu0 %v1889_v49  ;;  %1228 = vmatmul.mubr.bf16.gmra.mrb[32].mxu1 %v1890_v50  ;;  %v1985_v49 = vld [vmem:[%s3267_s0 + $0x180] ss:$8 sps:$4 sm:$0xff]  }
  0x76   :  { %1750 = vmatprep.mubr.msk.bf16.mxu0 %vm734_vm0, %v1891_v51  ;;  %1778 = vmatprep.mubr.msk.bf16.mxu1 %vm734_vm0, %v1893_v52  ;;  %v1986_v50 = vld [vmem:[%s3267_s0 + $0x340] ss:$8 sps:$4 sm:$0xff]   ;;  %v1987_v51 = vld [vmem:[%s3267_s0 + $0x194] ss:$8 sps:$4 sm:$0xff]  }
  0x77   :  { %v1989_v52 = vld [vmem:[%s3267_s0 + $0x354] ss:$8 sps:$4 sm:$0xff]  }
  0x7d   :  { %1012 = vmatmul.mubr.bf16.gmra.mrb[36].mxu0 %v1895_v53  ;;  %1236 = vmatmul.mubr.bf16.gmra.mrb[36].mxu1 %v1896_v54  ;;  %v1991_v53 = vld [vmem:[%s3267_s0 + $0x190] ss:$8 sps:$4 sm:$0xff]  }
  0x7e   :  { %1751 = vmatprep.mubr.msk.bf16.mxu0 %vm734_vm0, %v1897_v55  ;;  %1779 = vmatprep.mubr.msk.bf16.mxu1 %vm734_vm0, %v1899_v56  ;;  %v1992_v54 = vld [vmem:[%s3267_s0 + $0x350] ss:$8 sps:$4 sm:$0xff]   ;;  %v1993_v55 = vld [vmem:[%s3267_s0 + $0x1a4] ss:$8 sps:$4 sm:$0xff]  }
  0x7f   :  { %v1995_v56 = vld [vmem:[%s3267_s0 + $0x364] ss:$8 sps:$4 sm:$0xff]  }
  0x85   :  { %1020 = vmatmul.mubr.bf16.gmra.mrb[40].mxu0 %v1901_v57  ;;  %1244 = vmatmul.mubr.bf16.gmra.mrb[40].mxu1 %v1902_v58  ;;  %v125_v57 = vld [vmem:[%s3267_s0 + $0x370] sm:$0x11]  ;;  %v1997_v58 = vld [vmem:[%s3267_s0 + $0x1a0] ss:$8 sps:$4 sm:$0xff]  }
  0x86   :  { %1752 = vmatprep.mubr.msk.bf16.mxu0 %vm734_vm0, %v1903_v59  ;;  %1780 = vmatprep.mubr.msk.bf16.mxu1 %vm734_vm0, %v1905_v60  ;;  %v1998_v59 = vld [vmem:[%s3267_s0 + $0x360] ss:$8 sps:$4 sm:$0xff]   ;;  %v1999_v60 = vld [vmem:[%s3267_s0 + $0x1b4] ss:$8 sps:$4 sm:$0xff]  }
  0x8d   :  { %1028 = vmatmul.mubr.bf16.gmra.mrb[44].mxu0 %v1907_v61  ;;  %1252 = vmatmul.mubr.bf16.gmra.mrb[44].mxu1 %v1908_v62  ;;  %v1727_v61 = vcombine.high %v125_v57, %v125_v57  ;;  %v2700_v62 = vld [vmem:[%s3268_s2] ss:$0 sm:$0xff] }
  0x8e   :  { %1753 = vmatprep.mubr.msk.bf16.mxu0 %vm734_vm0, %v1909_v63  ;;  %1781 = vmatprep.mubr.msk.bf16.mxu1 %vm734_vm0, %v1911_v0 }
  0x95   :  { %1036 = vmatmul.mubr.bf16.gmra.mrb[48].mxu0 %v1913_v1  ;;  %1260 = vmatmul.mubr.bf16.gmra.mrb[48].mxu1 %v1914_v2 }
  0x96   :  { %1754 = vmatprep.mubr.msk.bf16.mxu0 %vm734_vm0, %v1915_v3  ;;  %1782 = vmatprep.mubr.msk.bf16.mxu1 %vm734_vm0, %v1917_v4 }
  0x9d   :  { %1044 = vmatmul.mubr.bf16.gmra.mrb[52].mxu0 %v1919_v5  ;;  %1268 = vmatmul.mubr.bf16.gmra.mrb[52].mxu1 %v1920_v6  ;;  %v2002_v5 = vld [vmem:[%s3267_s0 + $0x1b0] ss:$8 sps:$4 sm:$0xff]   ;;  %v1726_v6 = vcombine.low %v125_v57, %v125_v57 }
  0x9e   :  { %1755 = vmatprep.mubr.msk.bf16.mxu0 %vm734_vm0, %v1921_v7  ;;  %1783 = vmatprep.mubr.msk.bf16.mxu1 %vm734_vm0, %v1923_v8 }
  0xa5   :  { %1052 = vmatmul.mubr.bf16.gmra.mrb[56].mxu0 %v1925_v9  ;;  %1276 = vmatmul.mubr.bf16.gmra.mrb[56].mxu1 %v1926_v10 }
  0xa6   :  { %1756 = vmatprep.mubr.msk.bf16.mxu0 %vm734_vm0, %v1927_v11  ;;  %1784 = vmatprep.mubr.msk.bf16.mxu1 %vm734_vm0, %v1929_v12 }
  0xad   :  { %1060 = vmatmul.mubr.bf16.gmra.mrb[60].mxu0 %v1931_v13  ;;  %1284 = vmatmul.mubr.bf16.gmra.mrb[60].mxu1 %v1932_v14 }
  0xae   :  { %1757 = vmatprep.mubr.msk.bf16.mxu0 %vm734_vm0, %v1933_v15  ;;  %1785 = vmatprep.mubr.msk.bf16.mxu1 %vm734_vm0, %v1935_v16 }
  0xb5   :  { %1068 = vmatmul.mubr.bf16.gmra.mrb[64].mxu0 %v1937_v17  ;;  %1292 = vmatmul.mubr.bf16.gmra.mrb[64].mxu1 %v1938_v18 }
  0xb6   :  { %1758 = vmatprep.mubr.msk.bf16.mxu0 %vm734_vm0, %v1939_v19  ;;  %1786 = vmatprep.mubr.msk.bf16.mxu1 %vm734_vm0, %v1941_v20 }
  0xbd   :  { %1076 = vmatmul.mubr.bf16.gmra.mrb[68].mxu0 %v1943_v21  ;;  %1300 = vmatmul.mubr.bf16.gmra.mrb[68].mxu1 %v1944_v22 }
  0xbe   :  { %1759 = vmatprep.mubr.msk.bf16.mxu0 %vm734_vm0, %v1945_v23  ;;  %1787 = vmatprep.mubr.msk.bf16.mxu1 %vm734_vm0, %v1947_v24 }
  0xc5   :  { %1084 = vmatmul.mubr.bf16.gmra.mrb[72].mxu0 %v1949_v25  ;;  %1308 = vmatmul.mubr.bf16.gmra.mrb[72].mxu1 %v1950_v26 }
  0xc6   :  { %1760 = vmatprep.mubr.msk.bf16.mxu0 %vm734_vm0, %v1951_v27  ;;  %1788 = vmatprep.mubr.msk.bf16.mxu1 %vm734_vm0, %v1953_v28 }
  0xcd   :  { %1092 = vmatmul.mubr.bf16.gmra.mrb[76].mxu0 %v1955_v29  ;;  %1316 = vmatmul.mubr.bf16.gmra.mrb[76].mxu1 %v1956_v30 }
  0xce   :  { %1761 = vmatprep.mubr.msk.bf16.mxu0 %vm734_vm0, %v1957_v31  ;;  %1789 = vmatprep.mubr.msk.bf16.mxu1 %vm734_vm0, %v1959_v32 }
  0xd5   :  { %1100 = vmatmul.mubr.bf16.gmra.mrb[80].mxu0 %v1961_v33  ;;  %1324 = vmatmul.mubr.bf16.gmra.mrb[80].mxu1 %v1962_v34 }
  0xd6   :  { %1762 = vmatprep.mubr.msk.bf16.mxu0 %vm734_vm0, %v1963_v35  ;;  %1790 = vmatprep.mubr.msk.bf16.mxu1 %vm734_vm0, %v1965_v36 }
  0xdd   :  { %1108 = vmatmul.mubr.bf16.gmra.mrb[84].mxu0 %v1967_v37  ;;  %1332 = vmatmul.mubr.bf16.gmra.mrb[84].mxu1 %v1968_v38 }
  0xde   :  { %1763 = vmatprep.mubr.msk.bf16.mxu0 %vm734_vm0, %v1969_v39  ;;  %1791 = vmatprep.mubr.msk.bf16.mxu1 %vm734_vm0, %v1971_v40 }
  0xe5   :  { %1116 = vmatmul.mubr.bf16.gmra.mrb[88].mxu0 %v1973_v41  ;;  %1340 = vmatmul.mubr.bf16.gmra.mrb[88].mxu1 %v1974_v42 }
  0xe6   :  { %1764 = vmatprep.mubr.msk.bf16.mxu0 %vm734_vm0, %v1975_v43  ;;  %1792 = vmatprep.mubr.msk.bf16.mxu1 %vm734_vm0, %v1977_v44 }
  0xed   :  { %1124 = vmatmul.mubr.bf16.gmra.mrb[92].mxu0 %v1979_v45  ;;  %1348 = vmatmul.mubr.bf16.gmra.mrb[92].mxu1 %v1980_v46 }
  0xee   :  { %1765 = vmatprep.mubr.msk.bf16.mxu0 %vm734_vm0, %v1981_v47  ;;  %1793 = vmatprep.mubr.msk.bf16.mxu1 %vm734_vm0, %v1983_v48 }
  0xf5   :  { %1132 = vmatmul.mubr.bf16.gmra.mrb[96].mxu0 %v1985_v49  ;;  %1356 = vmatmul.mubr.bf16.gmra.mrb[96].mxu1 %v1986_v50 }
  0xf6   :  { %1766 = vmatprep.mubr.msk.bf16.mxu0 %vm734_vm0, %v1987_v51  ;;  %1794 = vmatprep.mubr.msk.bf16.mxu1 %vm734_vm0, %v1989_v52 }
  0xfd   :  { %1140 = vmatmul.mubr.bf16.gmra.mrb[100].mxu0 %v1991_v53  ;;  %1364 = vmatmul.mubr.bf16.gmra.mrb[100].mxu1 %v1992_v54 }
  0xfe   :  { %1767 = vmatprep.mubr.msk.bf16.mxu0 %vm734_vm0, %v1993_v55  ;;  %1795 = vmatprep.mubr.msk.bf16.mxu1 %vm734_vm0, %v1995_v56 }
 0x105   :  { %1148 = vmatmul.mubr.bf16.gmra.mrb[104].mxu0 %v1997_v58  ;;  %1372 = vmatmul.mubr.bf16.gmra.mrb[104].mxu1 %v1998_v59 }
 0x106   :  { %1768 = vmatprep.mubr.msk.bf16.mxu0 %vm734_vm0, %v1999_v60  ;;  %1796 = vmatprep.mubr.msk.bf16.mxu1 %vm734_vm0, %v1727_v61 }
 0x108   :  { %v941_v63 = vpop.f32.mrb[0].mxu0  ;;  %v1165_v0 = vpop.f32.mrb[0].mxu1 }
 0x109   :  { %v942_v1 = vadd.f32 %v2700_v62, %v941_v63  ;;  %v1166_v2 = vadd.f32 %v2700_v62, %v1165_v0  ;;  %v943_v3 = vpop.f32.mrb[1].mxu0  ;;  %v1167_v4 = vpop.f32.mrb[1].mxu1 }
 0x10a   :  { %v944_v7 = vpop.f32.mrb[2].mxu0  ;;  %v1168_v8 = vpop.f32.mrb[2].mxu1 }
 0x10b   :  { %2004 = vtanh.f32 %v942_v1  ;;  %v945_v9 = vadd.f32 %v2700_v62, %v944_v7  ;;  %v1169_v10 = vadd.f32 %v2700_v62, %v1168_v8  ;;  %v946_v11 = vpop.f32.mrb[3].mxu0  ;;  %v1170_v12 = vpop.f32.mrb[3].mxu1 }
 0x10c   :  { %2006 = vtanh.f32 %v1166_v2 }
 0x10d   :  { %2008 = vtanh.f32 %v945_v9  ;;  %1156 = vmatmul.mubr.bf16.gmra.mrb[108].mxu0 %v2002_v5  ;;  %1380 = vmatmul.mubr.bf16.gmra.mrb[108].mxu1 %v1726_v6 }
 0x10e   :  { %2010 = vtanh.f32 %v1169_v10 }
 0x110   :  { %v949_v13 = vpop.f32.mrb[4].mxu0  ;;  %v1173_v14 = vpop.f32.mrb[4].mxu1 }
 0x111   :  { %v950_v15 = vadd.f32 %v2700_v62, %v949_v13  ;;  %v1174_v16 = vadd.f32 %v2700_v62, %v1173_v14  ;;  %v951_v17 = vpop.f32.mrb[5].mxu0  ;;  %v1175_v18 = vpop.f32.mrb[5].mxu1 }
 0x112   :  { %v952_v19 = vpop.f32.mrb[6].mxu0  ;;  %v1176_v20 = vpop.f32.mrb[6].mxu1 }
 0x113   :  { %2012 = vtanh.f32 %v950_v15  ;;  %v953_v21 = vadd.f32 %v2700_v62, %v952_v19  ;;  %v1177_v22 = vadd.f32 %v2700_v62, %v1176_v20  ;;  %v954_v23 = vpop.f32.mrb[7].mxu0  ;;  %v1178_v24 = vpop.f32.mrb[7].mxu1 }
 0x114   :  { %2014 = vtanh.f32 %v1174_v16 }
 0x115   :  { %v2005_v25 = vpop.eup %2004  ;;  %2016 = vtanh.f32 %v953_v21 }
 0x116   :  { %v2007_v26 = vpop.eup %2006  ;;  %1499 = vst.msk [vmem:[%s3269_s3] sm:$0xff] %vm1498_vm2, %v2005_v25  ;;  %2018 = vtanh.f32 %v1177_v22 }
 0x117   :  { %v2009_v27 = vpop.eup %2008  ;;  %1555 = vst.msk [vmem:[%s3269_s3 + $0x1c0] sm:$0xff] %vm1498_vm2, %v2007_v26 }
 0x118   :  { %v2011_v28 = vpop.eup %2010  ;;  %1500 = vst.msk [vmem:[%s3269_s3 + $0x8] sm:$0xff] %vm1498_vm2, %v2009_v27  ;;  %v957_v29 = vpop.f32.mrb[8].mxu0 }
 0x119   :  { %v1181_v30 = vpop.f32.mrb[8].mxu1  ;;  %1556 = vst.msk [vmem:[%s3269_s3 + $0x1c8] sm:$0xff] %vm1498_vm2, %v2011_v28  ;;  %v958_v31 = vadd.f32 %v2700_v62, %v957_v29  ;;  %v959_v33 = vpop.f32.mrb[9].mxu0 }
 0x11a   :  { %v1182_v32 = vadd.f32 %v2700_v62, %v1181_v30  ;;  %v1183_v34 = vpop.f32.mrb[9].mxu1  ;;  %v960_v35 = vpop.f32.mrb[10].mxu0 }
 0x11b   :  { %v1184_v36 = vpop.f32.mrb[10].mxu1  ;;  %2020 = vtanh.f32 %v958_v31  ;;  %v961_v37 = vadd.f32 %v2700_v62, %v960_v35  ;;  %v962_v39 = vpop.f32.mrb[11].mxu0 }
 0x11c   :  { %v1185_v38 = vadd.f32 %v2700_v62, %v1184_v36  ;;  %v1186_v40 = vpop.f32.mrb[11].mxu1  ;;  %2022 = vtanh.f32 %v1182_v32 }
 0x11d   :  { %v2013_v41 = vpop.eup %2012  ;;  %2024 = vtanh.f32 %v961_v37 }
 0x11e   :  { %v2015_v42 = vpop.eup %2014  ;;  %1501 = vst.msk [vmem:[%s3269_s3 + $0x10] sm:$0xff] %vm1498_vm2, %v2013_v41  ;;  %2026 = vtanh.f32 %v1185_v38 }
 0x11f   :  { %v2017_v43 = vpop.eup %2016  ;;  %1557 = vst.msk [vmem:[%s3269_s3 + $0x1d0] sm:$0xff] %vm1498_vm2, %v2015_v42 }
 0x120   :  { %v2019_v44 = vpop.eup %2018  ;;  %1502 = vst.msk [vmem:[%s3269_s3 + $0x18] sm:$0xff] %vm1498_vm2, %v2017_v43  ;;  %v965_v45 = vpop.f32.mrb[12].mxu0 }
 0x121   :  { %v1189_v46 = vpop.f32.mrb[12].mxu1  ;;  %1558 = vst.msk [vmem:[%s3269_s3 + $0x1d8] sm:$0xff] %vm1498_vm2, %v2019_v44  ;;  %v966_v47 = vadd.f32 %v2700_v62, %v965_v45  ;;  %v967_v49 = vpop.f32.mrb[13].mxu0 }
 0x122   :  { %v1190_v48 = vadd.f32 %v2700_v62, %v1189_v46  ;;  %v1191_v50 = vpop.f32.mrb[13].mxu1  ;;  %v968_v51 = vpop.f32.mrb[14].mxu0 }
 0x123   :  { %v1192_v52 = vpop.f32.mrb[14].mxu1  ;;  %2028 = vtanh.f32 %v966_v47  ;;  %v969_v53 = vadd.f32 %v2700_v62, %v968_v51  ;;  %v970_v55 = vpop.f32.mrb[15].mxu0 }
 0x124   :  { %v1193_v54 = vadd.f32 %v2700_v62, %v1192_v52  ;;  %v1194_v56 = vpop.f32.mrb[15].mxu1  ;;  %2030 = vtanh.f32 %v1190_v48 }
 0x125   :  { %v2021_v57 = vpop.eup %2020  ;;  %2032 = vtanh.f32 %v969_v53 }
 0x126   :  { %v2023_v58 = vpop.eup %2022  ;;  %1503 = vst.msk [vmem:[%s3269_s3 + $0x20] sm:$0xff] %vm1498_vm2, %v2021_v57  ;;  %2034 = vtanh.f32 %v1193_v54 }
 0x127   :  { %v2025_v59 = vpop.eup %2024  ;;  %1559 = vst.msk [vmem:[%s3269_s3 + $0x1e0] sm:$0xff] %vm1498_vm2, %v2023_v58 }
 0x128   :  { %v2027_v60 = vpop.eup %2026  ;;  %1504 = vst.msk [vmem:[%s3269_s3 + $0x28] sm:$0xff] %vm1498_vm2, %v2025_v59  ;;  %v973_v61 = vpop.f32.mrb[16].mxu0 }
 0x129   :  { %v1197_v63 = vpop.f32.mrb[16].mxu1  ;;  %1560 = vst.msk [vmem:[%s3269_s3 + $0x1e8] sm:$0xff] %vm1498_vm2, %v2027_v60  ;;  %v974_v0 = vadd.f32 %v2700_v62, %v973_v61  ;;  %v975_v2 = vpop.f32.mrb[17].mxu0 }
 0x12a   :  { %v1198_v1 = vadd.f32 %v2700_v62, %v1197_v63  ;;  %v1199_v3 = vpop.f32.mrb[17].mxu1  ;;  %v976_v4 = vpop.f32.mrb[18].mxu0 }
 0x12b   :  { %v1200_v5 = vpop.f32.mrb[18].mxu1  ;;  %2036 = vtanh.f32 %v974_v0  ;;  %v977_v6 = vadd.f32 %v2700_v62, %v976_v4  ;;  %v978_v8 = vpop.f32.mrb[19].mxu0 }
 0x12c   :  { %v1201_v7 = vadd.f32 %v2700_v62, %v1200_v5  ;;  %v1202_v9 = vpop.f32.mrb[19].mxu1  ;;  %2038 = vtanh.f32 %v1198_v1 }
 0x12d   :  { %v2029_v10 = vpop.eup %2028  ;;  %2040 = vtanh.f32 %v977_v6 }
 0x12e   :  { %v2031_v11 = vpop.eup %2030  ;;  %1505 = vst.msk [vmem:[%s3269_s3 + $0x30] sm:$0xff] %vm1498_vm2, %v2029_v10  ;;  %2042 = vtanh.f32 %v1201_v7 }
 0x12f   :  { %v2033_v12 = vpop.eup %2032  ;;  %1561 = vst.msk [vmem:[%s3269_s3 + $0x1f0] sm:$0xff] %vm1498_vm2, %v2031_v11 }
 0x130   :  { %v2035_v13 = vpop.eup %2034  ;;  %1506 = vst.msk [vmem:[%s3269_s3 + $0x38] sm:$0xff] %vm1498_vm2, %v2033_v12  ;;  %v981_v14 = vpop.f32.mrb[20].mxu0 }
 0x131   :  { %v1205_v15 = vpop.f32.mrb[20].mxu1  ;;  %1562 = vst.msk [vmem:[%s3269_s3 + $0x1f8] sm:$0xff] %vm1498_vm2, %v2035_v13  ;;  %v982_v16 = vadd.f32 %v2700_v62, %v981_v14  ;;  %v983_v18 = vpop.f32.mrb[21].mxu0 }
 0x132   :  { %v1206_v17 = vadd.f32 %v2700_v62, %v1205_v15  ;;  %v1207_v19 = vpop.f32.mrb[21].mxu1  ;;  %v984_v20 = vpop.f32.mrb[22].mxu0 }
 0x133   :  { %v1208_v21 = vpop.f32.mrb[22].mxu1  ;;  %2044 = vtanh.f32 %v982_v16  ;;  %v985_v22 = vadd.f32 %v2700_v62, %v984_v20  ;;  %v986_v24 = vpop.f32.mrb[23].mxu0 }
 0x134   :  { %v1209_v23 = vadd.f32 %v2700_v62, %v1208_v21  ;;  %v1210_v25 = vpop.f32.mrb[23].mxu1  ;;  %2046 = vtanh.f32 %v1206_v17 }
 0x135   :  { %v2037_v26 = vpop.eup %2036  ;;  %2048 = vtanh.f32 %v985_v22 }
 0x136   :  { %v2039_v27 = vpop.eup %2038  ;;  %1507 = vst.msk [vmem:[%s3269_s3 + $0x40] sm:$0xff] %vm1498_vm2, %v2037_v26  ;;  %2050 = vtanh.f32 %v1209_v23 }
 0x137   :  { %v2041_v28 = vpop.eup %2040  ;;  %1563 = vst.msk [vmem:[%s3269_s3 + $0x200] sm:$0xff] %vm1498_vm2, %v2039_v27 }
 0x138   :  { %v2043_v29 = vpop.eup %2042  ;;  %1508 = vst.msk [vmem:[%s3269_s3 + $0x48] sm:$0xff] %vm1498_vm2, %v2041_v28  ;;  %v989_v30 = vpop.f32.mrb[24].mxu0 }
 0x139   :  { %v1213_v31 = vpop.f32.mrb[24].mxu1  ;;  %1564 = vst.msk [vmem:[%s3269_s3 + $0x208] sm:$0xff] %vm1498_vm2, %v2043_v29  ;;  %v990_v32 = vadd.f32 %v2700_v62, %v989_v30  ;;  %v991_v34 = vpop.f32.mrb[25].mxu0 }
 0x13a   :  { %v1214_v33 = vadd.f32 %v2700_v62, %v1213_v31  ;;  %v1215_v35 = vpop.f32.mrb[25].mxu1  ;;  %v992_v36 = vpop.f32.mrb[26].mxu0 }
 0x13b   :  { %v1216_v37 = vpop.f32.mrb[26].mxu1  ;;  %2052 = vtanh.f32 %v990_v32  ;;  %v993_v38 = vadd.f32 %v2700_v62, %v992_v36  ;;  %v994_v40 = vpop.f32.mrb[27].mxu0 }
 0x13c   :  { %v1217_v39 = vadd.f32 %v2700_v62, %v1216_v37  ;;  %v1218_v41 = vpop.f32.mrb[27].mxu1  ;;  %2054 = vtanh.f32 %v1214_v33 }
 0x13d   :  { %v2045_v42 = vpop.eup %2044  ;;  %2056 = vtanh.f32 %v993_v38 }
 0x13e   :  { %v2047_v43 = vpop.eup %2046  ;;  %1509 = vst.msk [vmem:[%s3269_s3 + $0x50] sm:$0xff] %vm1498_vm2, %v2045_v42  ;;  %2058 = vtanh.f32 %v1217_v39 }
 0x13f   :  { %v2049_v44 = vpop.eup %2048  ;;  %1565 = vst.msk [vmem:[%s3269_s3 + $0x210] sm:$0xff] %vm1498_vm2, %v2047_v43 }
 0x140   :  { %v2051_v45 = vpop.eup %2050  ;;  %1510 = vst.msk [vmem:[%s3269_s3 + $0x58] sm:$0xff] %vm1498_vm2, %v2049_v44  ;;  %v997_v46 = vpop.f32.mrb[28].mxu0 }
 0x141   :  { %v1221_v47 = vpop.f32.mrb[28].mxu1  ;;  %1566 = vst.msk [vmem:[%s3269_s3 + $0x218] sm:$0xff] %vm1498_vm2, %v2051_v45  ;;  %v998_v48 = vadd.f32 %v2700_v62, %v997_v46  ;;  %v999_v50 = vpop.f32.mrb[29].mxu0 }
 0x142   :  { %v1222_v49 = vadd.f32 %v2700_v62, %v1221_v47  ;;  %v1223_v51 = vpop.f32.mrb[29].mxu1  ;;  %v1000_v52 = vpop.f32.mrb[30].mxu0 }
 0x143   :  { %v1224_v53 = vpop.f32.mrb[30].mxu1  ;;  %2060 = vtanh.f32 %v998_v48  ;;  %v1001_v54 = vadd.f32 %v2700_v62, %v1000_v52  ;;  %v1002_v56 = vpop.f32.mrb[31].mxu0 }
 0x144   :  { %v1225_v55 = vadd.f32 %v2700_v62, %v1224_v53  ;;  %v1226_v57 = vpop.f32.mrb[31].mxu1  ;;  %2062 = vtanh.f32 %v1222_v49 }
 0x145   :  { %v2053_v58 = vpop.eup %2052  ;;  %2064 = vtanh.f32 %v1001_v54 }
 0x146   :  { %v2055_v59 = vpop.eup %2054  ;;  %1511 = vst.msk [vmem:[%s3269_s3 + $0x60] sm:$0xff] %vm1498_vm2, %v2053_v58  ;;  %2066 = vtanh.f32 %v1225_v55 }
 0x147   :  { %v2057_v60 = vpop.eup %2056  ;;  %1567 = vst.msk [vmem:[%s3269_s3 + $0x220] sm:$0xff] %vm1498_vm2, %v2055_v59 }
 0x148   :  { %v2059_v61 = vpop.eup %2058  ;;  %1512 = vst.msk [vmem:[%s3269_s3 + $0x68] sm:$0xff] %vm1498_vm2, %v2057_v60  ;;  %v1005_v63 = vpop.f32.mrb[32].mxu0 }
 0x149   :  { %v1229_v0 = vpop.f32.mrb[32].mxu1  ;;  %1568 = vst.msk [vmem:[%s3269_s3 + $0x228] sm:$0xff] %vm1498_vm2, %v2059_v61  ;;  %v1006_v1 = vadd.f32 %v2700_v62, %v1005_v63  ;;  %v1007_v3 = vpop.f32.mrb[33].mxu0 }
 0x14a   :  { %v1230_v2 = vadd.f32 %v2700_v62, %v1229_v0  ;;  %v1231_v4 = vpop.f32.mrb[33].mxu1  ;;  %v1008_v5 = vpop.f32.mrb[34].mxu0 }
 0x14b   :  { %v1232_v6 = vpop.f32.mrb[34].mxu1  ;;  %2068 = vtanh.f32 %v1006_v1  ;;  %v1009_v7 = vadd.f32 %v2700_v62, %v1008_v5  ;;  %v1010_v9 = vpop.f32.mrb[35].mxu0 }
 0x14c   :  { %v1233_v8 = vadd.f32 %v2700_v62, %v1232_v6  ;;  %v1234_v10 = vpop.f32.mrb[35].mxu1  ;;  %2070 = vtanh.f32 %v1230_v2 }
 0x14d   :  { %v2061_v11 = vpop.eup %2060  ;;  %2072 = vtanh.f32 %v1009_v7 }
 0x14e   :  { %v2063_v12 = vpop.eup %2062  ;;  %1513 = vst.msk [vmem:[%s3269_s3 + $0x70] sm:$0xff] %vm1498_vm2, %v2061_v11  ;;  %2074 = vtanh.f32 %v1233_v8 }
 0x14f   :  { %v2065_v13 = vpop.eup %2064  ;;  %1569 = vst.msk [vmem:[%s3269_s3 + $0x230] sm:$0xff] %vm1498_vm2, %v2063_v12 }
 0x150   :  { %v2067_v14 = vpop.eup %2066  ;;  %1514 = vst.msk [vmem:[%s3269_s3 + $0x78] sm:$0xff] %vm1498_vm2, %v2065_v13  ;;  %v1013_v15 = vpop.f32.mrb[36].mxu0 }
 0x151   :  { %v1237_v16 = vpop.f32.mrb[36].mxu1  ;;  %1570 = vst.msk [vmem:[%s3269_s3 + $0x238] sm:$0xff] %vm1498_vm2, %v2067_v14  ;;  %v1014_v17 = vadd.f32 %v2700_v62, %v1013_v15  ;;  %v1015_v19 = vpop.f32.mrb[37].mxu0 }
 0x152   :  { %v1238_v18 = vadd.f32 %v2700_v62, %v1237_v16  ;;  %v1239_v20 = vpop.f32.mrb[37].mxu1  ;;  %v1016_v21 = vpop.f32.mrb[38].mxu0 }
 0x153   :  { %v1240_v22 = vpop.f32.mrb[38].mxu1  ;;  %2076 = vtanh.f32 %v1014_v17  ;;  %v1017_v23 = vadd.f32 %v2700_v62, %v1016_v21  ;;  %v1018_v25 = vpop.f32.mrb[39].mxu0 }
 0x154   :  { %v1241_v24 = vadd.f32 %v2700_v62, %v1240_v22  ;;  %v1242_v26 = vpop.f32.mrb[39].mxu1  ;;  %2078 = vtanh.f32 %v1238_v18 }
 0x155   :  { %v2069_v27 = vpop.eup %2068  ;;  %2080 = vtanh.f32 %v1017_v23 }
 0x156   :  { %v2071_v28 = vpop.eup %2070  ;;  %1515 = vst.msk [vmem:[%s3269_s3 + $0x80] sm:$0xff] %vm1498_vm2, %v2069_v27  ;;  %2082 = vtanh.f32 %v1241_v24 }
 0x157   :  { %v2073_v29 = vpop.eup %2072  ;;  %1571 = vst.msk [vmem:[%s3269_s3 + $0x240] sm:$0xff] %vm1498_vm2, %v2071_v28 }
 0x158   :  { %v2075_v30 = vpop.eup %2074  ;;  %1516 = vst.msk [vmem:[%s3269_s3 + $0x88] sm:$0xff] %vm1498_vm2, %v2073_v29  ;;  %v1021_v31 = vpop.f32.mrb[40].mxu0 }
 0x159   :  { %v1245_v32 = vpop.f32.mrb[40].mxu1  ;;  %1572 = vst.msk [vmem:[%s3269_s3 + $0x248] sm:$0xff] %vm1498_vm2, %v2075_v30  ;;  %v1022_v33 = vadd.f32 %v2700_v62, %v1021_v31  ;;  %v1023_v35 = vpop.f32.mrb[41].mxu0 }
 0x15a   :  { %v1246_v34 = vadd.f32 %v2700_v62, %v1245_v32  ;;  %v1247_v36 = vpop.f32.mrb[41].mxu1  ;;  %v1024_v37 = vpop.f32.mrb[42].mxu0 }
 0x15b   :  { %v1248_v38 = vpop.f32.mrb[42].mxu1  ;;  %2084 = vtanh.f32 %v1022_v33  ;;  %v1025_v39 = vadd.f32 %v2700_v62, %v1024_v37  ;;  %v1026_v41 = vpop.f32.mrb[43].mxu0 }
 0x15c   :  { %v1249_v40 = vadd.f32 %v2700_v62, %v1248_v38  ;;  %v1250_v42 = vpop.f32.mrb[43].mxu1  ;;  %2086 = vtanh.f32 %v1246_v34 }
 0x15d   :  { %v2077_v43 = vpop.eup %2076  ;;  %2088 = vtanh.f32 %v1025_v39 }
 0x15e   :  { %v2079_v44 = vpop.eup %2078  ;;  %1517 = vst.msk [vmem:[%s3269_s3 + $0x90] sm:$0xff] %vm1498_vm2, %v2077_v43  ;;  %2090 = vtanh.f32 %v1249_v40 }
 0x15f   :  { %v2081_v45 = vpop.eup %2080  ;;  %1573 = vst.msk [vmem:[%s3269_s3 + $0x250] sm:$0xff] %vm1498_vm2, %v2079_v44 }
 0x160   :  { %v2083_v46 = vpop.eup %2082  ;;  %1518 = vst.msk [vmem:[%s3269_s3 + $0x98] sm:$0xff] %vm1498_vm2, %v2081_v45  ;;  %v1029_v47 = vpop.f32.mrb[44].mxu0 }
 0x161   :  { %v1253_v48 = vpop.f32.mrb[44].mxu1  ;;  %1574 = vst.msk [vmem:[%s3269_s3 + $0x258] sm:$0xff] %vm1498_vm2, %v2083_v46  ;;  %v1030_v49 = vadd.f32 %v2700_v62, %v1029_v47  ;;  %v1031_v51 = vpop.f32.mrb[45].mxu0 }
 0x162   :  { %v1254_v50 = vadd.f32 %v2700_v62, %v1253_v48  ;;  %v1255_v52 = vpop.f32.mrb[45].mxu1  ;;  %v1032_v53 = vpop.f32.mrb[46].mxu0 }
 0x163   :  { %v1256_v54 = vpop.f32.mrb[46].mxu1  ;;  %2092 = vtanh.f32 %v1030_v49  ;;  %v1033_v55 = vadd.f32 %v2700_v62, %v1032_v53  ;;  %v1034_v57 = vpop.f32.mrb[47].mxu0 }
 0x164   :  { %v1257_v56 = vadd.f32 %v2700_v62, %v1256_v54  ;;  %v1258_v58 = vpop.f32.mrb[47].mxu1  ;;  %2094 = vtanh.f32 %v1254_v50 }
 0x165   :  { %v2085_v59 = vpop.eup %2084  ;;  %2096 = vtanh.f32 %v1033_v55 }
 0x166   :  { %v2087_v60 = vpop.eup %2086  ;;  %1519 = vst.msk [vmem:[%s3269_s3 + $0xa0] sm:$0xff] %vm1498_vm2, %v2085_v59  ;;  %2098 = vtanh.f32 %v1257_v56 }
 0x167   :  { %v2089_v61 = vpop.eup %2088  ;;  %1575 = vst.msk [vmem:[%s3269_s3 + $0x260] sm:$0xff] %vm1498_vm2, %v2087_v60 }
 0x168   :  { %v2091_v63 = vpop.eup %2090  ;;  %1520 = vst.msk [vmem:[%s3269_s3 + $0xa8] sm:$0xff] %vm1498_vm2, %v2089_v61  ;;  %v1037_v0 = vpop.f32.mrb[48].mxu0 }
 0x169   :  { %v1261_v1 = vpop.f32.mrb[48].mxu1  ;;  %1576 = vst.msk [vmem:[%s3269_s3 + $0x268] sm:$0xff] %vm1498_vm2, %v2091_v63  ;;  %v1038_v2 = vadd.f32 %v2700_v62, %v1037_v0  ;;  %v1039_v4 = vpop.f32.mrb[49].mxu0 }
 0x16a   :  { %v1262_v3 = vadd.f32 %v2700_v62, %v1261_v1  ;;  %v1263_v5 = vpop.f32.mrb[49].mxu1  ;;  %v1040_v6 = vpop.f32.mrb[50].mxu0 }
 0x16b   :  { %v1264_v7 = vpop.f32.mrb[50].mxu1  ;;  %2100 = vtanh.f32 %v1038_v2  ;;  %v1041_v8 = vadd.f32 %v2700_v62, %v1040_v6  ;;  %v1042_v10 = vpop.f32.mrb[51].mxu0 }
 0x16c   :  { %v1265_v9 = vadd.f32 %v2700_v62, %v1264_v7  ;;  %v1266_v11 = vpop.f32.mrb[51].mxu1  ;;  %2102 = vtanh.f32 %v1262_v3 }
 0x16d   :  { %v2093_v12 = vpop.eup %2092  ;;  %2104 = vtanh.f32 %v1041_v8 }
 0x16e   :  { %v2095_v13 = vpop.eup %2094  ;;  %1521 = vst.msk [vmem:[%s3269_s3 + $0xb0] sm:$0xff] %vm1498_vm2, %v2093_v12  ;;  %2106 = vtanh.f32 %v1265_v9 }
 0x16f   :  { %v2097_v14 = vpop.eup %2096  ;;  %1577 = vst.msk [vmem:[%s3269_s3 + $0x270] sm:$0xff] %vm1498_vm2, %v2095_v13 }
 0x170   :  { %v2099_v15 = vpop.eup %2098  ;;  %1522 = vst.msk [vmem:[%s3269_s3 + $0xb8] sm:$0xff] %vm1498_vm2, %v2097_v14  ;;  %v1045_v16 = vpop.f32.mrb[52].mxu0 }
 0x171   :  { %v1269_v17 = vpop.f32.mrb[52].mxu1  ;;  %1578 = vst.msk [vmem:[%s3269_s3 + $0x278] sm:$0xff] %vm1498_vm2, %v2099_v15  ;;  %v1046_v18 = vadd.f32 %v2700_v62, %v1045_v16  ;;  %v1047_v20 = vpop.f32.mrb[53].mxu0 }
 0x172   :  { %v1270_v19 = vadd.f32 %v2700_v62, %v1269_v17  ;;  %v1271_v21 = vpop.f32.mrb[53].mxu1  ;;  %v1048_v22 = vpop.f32.mrb[54].mxu0 }
 0x173   :  { %v1272_v23 = vpop.f32.mrb[54].mxu1  ;;  %2108 = vtanh.f32 %v1046_v18  ;;  %v1049_v24 = vadd.f32 %v2700_v62, %v1048_v22  ;;  %v1050_v26 = vpop.f32.mrb[55].mxu0 }
 0x174   :  { %v1273_v25 = vadd.f32 %v2700_v62, %v1272_v23  ;;  %v1274_v27 = vpop.f32.mrb[55].mxu1  ;;  %2110 = vtanh.f32 %v1270_v19 }
 0x175   :  { %v2101_v28 = vpop.eup %2100  ;;  %2112 = vtanh.f32 %v1049_v24 }
 0x176   :  { %v2103_v29 = vpop.eup %2102  ;;  %1523 = vst.msk [vmem:[%s3269_s3 + $0xc0] sm:$0xff] %vm1498_vm2, %v2101_v28  ;;  %2114 = vtanh.f32 %v1273_v25 }
 0x177   :  { %v2105_v30 = vpop.eup %2104  ;;  %1579 = vst.msk [vmem:[%s3269_s3 + $0x280] sm:$0xff] %vm1498_vm2, %v2103_v29 }
 0x178   :  { %v2107_v31 = vpop.eup %2106  ;;  %1524 = vst.msk [vmem:[%s3269_s3 + $0xc8] sm:$0xff] %vm1498_vm2, %v2105_v30  ;;  %v1053_v32 = vpop.f32.mrb[56].mxu0 }
 0x179   :  { %v1277_v33 = vpop.f32.mrb[56].mxu1  ;;  %1580 = vst.msk [vmem:[%s3269_s3 + $0x288] sm:$0xff] %vm1498_vm2, %v2107_v31  ;;  %v1054_v34 = vadd.f32 %v2700_v62, %v1053_v32  ;;  %v1055_v36 = vpop.f32.mrb[57].mxu0 }
 0x17a   :  { %v1278_v35 = vadd.f32 %v2700_v62, %v1277_v33  ;;  %v1279_v37 = vpop.f32.mrb[57].mxu1  ;;  %v1056_v38 = vpop.f32.mrb[58].mxu0 }
 0x17b   :  { %v1280_v39 = vpop.f32.mrb[58].mxu1  ;;  %2116 = vtanh.f32 %v1054_v34  ;;  %v1057_v40 = vadd.f32 %v2700_v62, %v1056_v38  ;;  %v1058_v42 = vpop.f32.mrb[59].mxu0 }
 0x17c   :  { %v1281_v41 = vadd.f32 %v2700_v62, %v1280_v39  ;;  %v1282_v43 = vpop.f32.mrb[59].mxu1  ;;  %2118 = vtanh.f32 %v1278_v35 }
 0x17d   :  { %v2109_v44 = vpop.eup %2108  ;;  %2120 = vtanh.f32 %v1057_v40 }
 0x17e   :  { %v2111_v45 = vpop.eup %2110  ;;  %1525 = vst.msk [vmem:[%s3269_s3 + $0xd0] sm:$0xff] %vm1498_vm2, %v2109_v44  ;;  %2122 = vtanh.f32 %v1281_v41 }
 0x17f   :  { %v2113_v46 = vpop.eup %2112  ;;  %1581 = vst.msk [vmem:[%s3269_s3 + $0x290] sm:$0xff] %vm1498_vm2, %v2111_v45 }
 0x180   :  { %v2115_v47 = vpop.eup %2114  ;;  %1526 = vst.msk [vmem:[%s3269_s3 + $0xd8] sm:$0xff] %vm1498_vm2, %v2113_v46  ;;  %v1061_v48 = vpop.f32.mrb[60].mxu0 }
 0x181   :  { %v1285_v49 = vpop.f32.mrb[60].mxu1  ;;  %1582 = vst.msk [vmem:[%s3269_s3 + $0x298] sm:$0xff] %vm1498_vm2, %v2115_v47  ;;  %v1062_v50 = vadd.f32 %v2700_v62, %v1061_v48  ;;  %v1063_v52 = vpop.f32.mrb[61].mxu0 }
 0x182   :  { %v1286_v51 = vadd.f32 %v2700_v62, %v1285_v49  ;;  %v1287_v53 = vpop.f32.mrb[61].mxu1  ;;  %v1064_v54 = vpop.f32.mrb[62].mxu0 }
 0x183   :  { %v1288_v55 = vpop.f32.mrb[62].mxu1  ;;  %2124 = vtanh.f32 %v1062_v50  ;;  %v1065_v56 = vadd.f32 %v2700_v62, %v1064_v54  ;;  %v1066_v58 = vpop.f32.mrb[63].mxu0 }
 0x184   :  { %v1289_v57 = vadd.f32 %v2700_v62, %v1288_v55  ;;  %v1290_v59 = vpop.f32.mrb[63].mxu1  ;;  %2126 = vtanh.f32 %v1286_v51 }
 0x185   :  { %v2117_v60 = vpop.eup %2116  ;;  %2128 = vtanh.f32 %v1065_v56 }
 0x186   :  { %v2119_v61 = vpop.eup %2118  ;;  %1527 = vst.msk [vmem:[%s3269_s3 + $0xe0] sm:$0xff] %vm1498_vm2, %v2117_v60  ;;  %2130 = vtanh.f32 %v1289_v57 }
 0x187   :  { %v2121_v63 = vpop.eup %2120  ;;  %1583 = vst.msk [vmem:[%s3269_s3 + $0x2a0] sm:$0xff] %vm1498_vm2, %v2119_v61 }
 0x188   :  { %v2123_v0 = vpop.eup %2122  ;;  %1528 = vst.msk [vmem:[%s3269_s3 + $0xe8] sm:$0xff] %vm1498_vm2, %v2121_v63  ;;  %v1069_v1 = vpop.f32.mrb[64].mxu0 }
 0x189   :  { %v1293_v2 = vpop.f32.mrb[64].mxu1  ;;  %1584 = vst.msk [vmem:[%s3269_s3 + $0x2a8] sm:$0xff] %vm1498_vm2, %v2123_v0  ;;  %v1070_v3 = vadd.f32 %v2700_v62, %v1069_v1  ;;  %v1071_v5 = vpop.f32.mrb[65].mxu0 }
 0x18a   :  { %v1294_v4 = vadd.f32 %v2700_v62, %v1293_v2  ;;  %v1295_v6 = vpop.f32.mrb[65].mxu1  ;;  %v1072_v7 = vpop.f32.mrb[66].mxu0 }
 0x18b   :  { %v1296_v8 = vpop.f32.mrb[66].mxu1  ;;  %2132 = vtanh.f32 %v1070_v3  ;;  %v1073_v9 = vadd.f32 %v2700_v62, %v1072_v7  ;;  %v1074_v11 = vpop.f32.mrb[67].mxu0 }
 0x18c   :  { %v1297_v10 = vadd.f32 %v2700_v62, %v1296_v8  ;;  %v1298_v12 = vpop.f32.mrb[67].mxu1  ;;  %2134 = vtanh.f32 %v1294_v4 }
 0x18d   :  { %v2125_v13 = vpop.eup %2124  ;;  %2136 = vtanh.f32 %v1073_v9 }
 0x18e   :  { %v2127_v14 = vpop.eup %2126  ;;  %1529 = vst.msk [vmem:[%s3269_s3 + $0xf0] sm:$0xff] %vm1498_vm2, %v2125_v13  ;;  %2138 = vtanh.f32 %v1297_v10 }
 0x18f   :  { %v2129_v15 = vpop.eup %2128  ;;  %1585 = vst.msk [vmem:[%s3269_s3 + $0x2b0] sm:$0xff] %vm1498_vm2, %v2127_v14 }
 0x190   :  { %v2131_v16 = vpop.eup %2130  ;;  %1530 = vst.msk [vmem:[%s3269_s3 + $0xf8] sm:$0xff] %vm1498_vm2, %v2129_v15  ;;  %v1077_v17 = vpop.f32.mrb[68].mxu0 }
 0x191   :  { %v1301_v18 = vpop.f32.mrb[68].mxu1  ;;  %1586 = vst.msk [vmem:[%s3269_s3 + $0x2b8] sm:$0xff] %vm1498_vm2, %v2131_v16  ;;  %v1078_v19 = vadd.f32 %v2700_v62, %v1077_v17  ;;  %v1079_v21 = vpop.f32.mrb[69].mxu0 }
 0x192   :  { %v1302_v20 = vadd.f32 %v2700_v62, %v1301_v18  ;;  %v1303_v22 = vpop.f32.mrb[69].mxu1  ;;  %v1080_v23 = vpop.f32.mrb[70].mxu0 }
 0x193   :  { %v1304_v24 = vpop.f32.mrb[70].mxu1  ;;  %2140 = vtanh.f32 %v1078_v19  ;;  %v1081_v25 = vadd.f32 %v2700_v62, %v1080_v23  ;;  %v1082_v27 = vpop.f32.mrb[71].mxu0 }
 0x194   :  { %v1305_v26 = vadd.f32 %v2700_v62, %v1304_v24  ;;  %v1306_v28 = vpop.f32.mrb[71].mxu1  ;;  %2142 = vtanh.f32 %v1302_v20 }
 0x195   :  { %v2133_v29 = vpop.eup %2132  ;;  %2144 = vtanh.f32 %v1081_v25 }
 0x196   :  { %v2135_v30 = vpop.eup %2134  ;;  %1531 = vst.msk [vmem:[%s3269_s3 + $0x100] sm:$0xff] %vm1498_vm2, %v2133_v29  ;;  %2146 = vtanh.f32 %v1305_v26  ;;  %v3116_v26 = vld [vmem:[%s3268_s2] ss:$0 sm:$0xff] }
 0x197   :  { %v2137_v31 = vpop.eup %2136  ;;  %1587 = vst.msk [vmem:[%s3269_s3 + $0x2c0] sm:$0xff] %vm1498_vm2, %v2135_v30 }
 0x198   :  { %v2139_v32 = vpop.eup %2138  ;;  %1532 = vst.msk [vmem:[%s3269_s3 + $0x108] sm:$0xff] %vm1498_vm2, %v2137_v31  ;;  %v1085_v33 = vpop.f32.mrb[72].mxu0 }
 0x199   :  { %v1309_v34 = vpop.f32.mrb[72].mxu1  ;;  %1588 = vst.msk [vmem:[%s3269_s3 + $0x2c8] sm:$0xff] %vm1498_vm2, %v2139_v32  ;;  %v1086_v35 = vadd.f32 %v2700_v62, %v1085_v33  ;;  %v1087_v37 = vpop.f32.mrb[73].mxu0 }
 0x19a   :  { %v1310_v36 = vadd.f32 %v2700_v62, %v1309_v34  ;;  %v1311_v38 = vpop.f32.mrb[73].mxu1  ;;  %v1088_v39 = vpop.f32.mrb[74].mxu0 }
 0x19b   :  { %v1312_v40 = vpop.f32.mrb[74].mxu1  ;;  %2148 = vtanh.f32 %v1086_v35  ;;  %v1089_v41 = vadd.f32 %v2700_v62, %v1088_v39  ;;  %v1090_v43 = vpop.f32.mrb[75].mxu0 }
 0x19c   :  { %v1313_v42 = vadd.f32 %v2700_v62, %v1312_v40  ;;  %v1314_v44 = vpop.f32.mrb[75].mxu1  ;;  %2150 = vtanh.f32 %v1310_v36 }
 0x19d   :  { %v2141_v45 = vpop.eup %2140  ;;  %2152 = vtanh.f32 %v1089_v41 }
 0x19e   :  { %v2143_v46 = vpop.eup %2142  ;;  %1533 = vst.msk [vmem:[%s3269_s3 + $0x110] sm:$0xff] %vm1498_vm2, %v2141_v45  ;;  %2154 = vtanh.f32 %v1313_v42 }
 0x19f   :  { %v2145_v47 = vpop.eup %2144  ;;  %1589 = vst.msk [vmem:[%s3269_s3 + $0x2d0] sm:$0xff] %vm1498_vm2, %v2143_v46 }
 0x1a0   :  { %v2147_v48 = vpop.eup %2146  ;;  %1534 = vst.msk [vmem:[%s3269_s3 + $0x118] sm:$0xff] %vm1498_vm2, %v2145_v47  ;;  %v1093_v49 = vpop.f32.mrb[76].mxu0 }
 0x1a1   :  { %v1317_v50 = vpop.f32.mrb[76].mxu1  ;;  %1590 = vst.msk [vmem:[%s3269_s3 + $0x2d8] sm:$0xff] %vm1498_vm2, %v2147_v48  ;;  %v1094_v51 = vadd.f32 %v2700_v62, %v1093_v49  ;;  %v1095_v53 = vpop.f32.mrb[77].mxu0 }
 0x1a2   :  { %v1318_v52 = vadd.f32 %v2700_v62, %v1317_v50  ;;  %v1319_v54 = vpop.f32.mrb[77].mxu1  ;;  %v1096_v55 = vpop.f32.mrb[78].mxu0 }
 0x1a3   :  { %v1320_v56 = vpop.f32.mrb[78].mxu1  ;;  %2156 = vtanh.f32 %v1094_v51  ;;  %v1097_v57 = vadd.f32 %v2700_v62, %v1096_v55  ;;  %v1098_v59 = vpop.f32.mrb[79].mxu0 }
 0x1a4   :  { %v1321_v58 = vadd.f32 %v2700_v62, %v1320_v56  ;;  %v1322_v60 = vpop.f32.mrb[79].mxu1  ;;  %2158 = vtanh.f32 %v1318_v52 }
 0x1a5   :  { %v2149_v61 = vpop.eup %2148  ;;  %2160 = vtanh.f32 %v1097_v57 }
 0x1a6   :  { %v2151_v63 = vpop.eup %2150  ;;  %1535 = vst.msk [vmem:[%s3269_s3 + $0x120] sm:$0xff] %vm1498_vm2, %v2149_v61  ;;  %2162 = vtanh.f32 %v1321_v58 }
 0x1a7   :  { %v2153_v0 = vpop.eup %2152  ;;  %1591 = vst.msk [vmem:[%s3269_s3 + $0x2e0] sm:$0xff] %vm1498_vm2, %v2151_v63 }
 0x1a8   :  { %v2155_v1 = vpop.eup %2154  ;;  %1536 = vst.msk [vmem:[%s3269_s3 + $0x128] sm:$0xff] %vm1498_vm2, %v2153_v0  ;;  %v1101_v2 = vpop.f32.mrb[80].mxu0 }
 0x1a9   :  { %v1325_v3 = vpop.f32.mrb[80].mxu1  ;;  %1592 = vst.msk [vmem:[%s3269_s3 + $0x2e8] sm:$0xff] %vm1498_vm2, %v2155_v1  ;;  %v1102_v4 = vadd.f32 %v2700_v62, %v1101_v2  ;;  %v1103_v6 = vpop.f32.mrb[81].mxu0 }
 0x1aa   :  { %v1326_v5 = vadd.f32 %v2700_v62, %v1325_v3  ;;  %v1327_v7 = vpop.f32.mrb[81].mxu1  ;;  %v1104_v8 = vpop.f32.mrb[82].mxu0 }
 0x1ab   :  { %v1328_v9 = vpop.f32.mrb[82].mxu1  ;;  %2164 = vtanh.f32 %v1102_v4  ;;  %v1105_v10 = vadd.f32 %v2700_v62, %v1104_v8  ;;  %v1106_v12 = vpop.f32.mrb[83].mxu0 }
 0x1ac   :  { %v1329_v11 = vadd.f32 %v2700_v62, %v1328_v9  ;;  %v1330_v13 = vpop.f32.mrb[83].mxu1  ;;  %2166 = vtanh.f32 %v1326_v5 }
 0x1ad   :  { %v2157_v14 = vpop.eup %2156  ;;  %2168 = vtanh.f32 %v1105_v10 }
 0x1ae   :  { %v2159_v15 = vpop.eup %2158  ;;  %1537 = vst.msk [vmem:[%s3269_s3 + $0x130] sm:$0xff] %vm1498_vm2, %v2157_v14  ;;  %2170 = vtanh.f32 %v1329_v11 }
 0x1af   :  { %v2161_v16 = vpop.eup %2160  ;;  %1593 = vst.msk [vmem:[%s3269_s3 + $0x2f0] sm:$0xff] %vm1498_vm2, %v2159_v15 }
 0x1b0   :  { %v2163_v17 = vpop.eup %2162  ;;  %1538 = vst.msk [vmem:[%s3269_s3 + $0x138] sm:$0xff] %vm1498_vm2, %v2161_v16  ;;  %v1109_v18 = vpop.f32.mrb[84].mxu0 }
 0x1b1   :  { %v1333_v19 = vpop.f32.mrb[84].mxu1  ;;  %1594 = vst.msk [vmem:[%s3269_s3 + $0x2f8] sm:$0xff] %vm1498_vm2, %v2163_v17  ;;  %v1110_v20 = vadd.f32 %v2700_v62, %v1109_v18  ;;  %v1111_v22 = vpop.f32.mrb[85].mxu0 }
 0x1b2   :  { %v1334_v21 = vadd.f32 %v2700_v62, %v1333_v19  ;;  %v1335_v23 = vpop.f32.mrb[85].mxu1  ;;  %v1112_v24 = vpop.f32.mrb[86].mxu0 }
 0x1b3   :  { %v1336_v25 = vpop.f32.mrb[86].mxu1  ;;  %2172 = vtanh.f32 %v1110_v20  ;;  %v1113_v27 = vadd.f32 %v3116_v26, %v1112_v24  ;;  %v1114_v29 = vpop.f32.mrb[87].mxu0 }
 0x1b4   :  { %v1337_v28 = vadd.f32 %v3116_v26, %v1336_v25  ;;  %v1338_v30 = vpop.f32.mrb[87].mxu1  ;;  %2174 = vtanh.f32 %v1334_v21 }
 0x1b5   :  { %v2165_v31 = vpop.eup %2164  ;;  %2176 = vtanh.f32 %v1113_v27 }
 0x1b6   :  { %v2167_v62 = vpop.eup %2166  ;;  %1539 = vst.msk [vmem:[%s3269_s3 + $0x140] sm:$0xff] %vm1498_vm2, %v2165_v31  ;;  %2178 = vtanh.f32 %v1337_v28 }
 0x1b7   :  { %v2169_v32 = vpop.eup %2168  ;;  %1595 = vst.msk [vmem:[%s3269_s3 + $0x300] sm:$0xff] %vm1498_vm2, %v2167_v62 }
 0x1b8   :  { %v2171_v33 = vpop.eup %2170  ;;  %1540 = vst.msk [vmem:[%s3269_s3 + $0x148] sm:$0xff] %vm1498_vm2, %v2169_v32  ;;  %v1117_v34 = vpop.f32.mrb[88].mxu0 }
 0x1b9   :  { %v1341_v35 = vpop.f32.mrb[88].mxu1  ;;  %1596 = vst.msk [vmem:[%s3269_s3 + $0x308] sm:$0xff] %vm1498_vm2, %v2171_v33  ;;  %v1118_v36 = vadd.f32 %v3116_v26, %v1117_v34  ;;  %v1119_v38 = vpop.f32.mrb[89].mxu0 }
 0x1ba   :  { %v1342_v37 = vadd.f32 %v3116_v26, %v1341_v35  ;;  %v1343_v39 = vpop.f32.mrb[89].mxu1  ;;  %v1120_v40 = vpop.f32.mrb[90].mxu0 }
 0x1bb   :  { %v1344_v41 = vpop.f32.mrb[90].mxu1  ;;  %2180 = vtanh.f32 %v1118_v36  ;;  %v1121_v42 = vadd.f32 %v3116_v26, %v1120_v40  ;;  %v1122_v44 = vpop.f32.mrb[91].mxu0 }
 0x1bc   :  { %v1345_v43 = vadd.f32 %v3116_v26, %v1344_v41  ;;  %v1346_v45 = vpop.f32.mrb[91].mxu1  ;;  %2182 = vtanh.f32 %v1342_v37 }
 0x1bd   :  { %v2173_v46 = vpop.eup %2172  ;;  %2184 = vtanh.f32 %v1121_v42 }
 0x1be   :  { %v2175_v47 = vpop.eup %2174  ;;  %1541 = vst.msk [vmem:[%s3269_s3 + $0x150] sm:$0xff] %vm1498_vm2, %v2173_v46  ;;  %2186 = vtanh.f32 %v1345_v43 }
 0x1bf   :  { %v2177_v48 = vpop.eup %2176  ;;  %1597 = vst.msk [vmem:[%s3269_s3 + $0x310] sm:$0xff] %vm1498_vm2, %v2175_v47 }
 0x1c0   :  { %v2179_v49 = vpop.eup %2178  ;;  %1542 = vst.msk [vmem:[%s3269_s3 + $0x158] sm:$0xff] %vm1498_vm2, %v2177_v48  ;;  %v1125_v50 = vpop.f32.mrb[92].mxu0 }
 0x1c1   :  { %v1349_v51 = vpop.f32.mrb[92].mxu1  ;;  %1598 = vst.msk [vmem:[%s3269_s3 + $0x318] sm:$0xff] %vm1498_vm2, %v2179_v49  ;;  %v1126_v52 = vadd.f32 %v3116_v26, %v1125_v50  ;;  %v1127_v54 = vpop.f32.mrb[93].mxu0 }
 0x1c2   :  { %v1350_v53 = vadd.f32 %v3116_v26, %v1349_v51  ;;  %v1351_v55 = vpop.f32.mrb[93].mxu1  ;;  %v1128_v56 = vpop.f32.mrb[94].mxu0 }
 0x1c3   :  { %v1352_v57 = vpop.f32.mrb[94].mxu1  ;;  %2188 = vtanh.f32 %v1126_v52  ;;  %v1129_v58 = vadd.f32 %v3116_v26, %v1128_v56  ;;  %v1130_v60 = vpop.f32.mrb[95].mxu0 }
 0x1c4   :  { %v1353_v59 = vadd.f32 %v3116_v26, %v1352_v57  ;;  %v1354_v61 = vpop.f32.mrb[95].mxu1  ;;  %2190 = vtanh.f32 %v1350_v53 }
 0x1c5   :  { %v2181_v63 = vpop.eup %2180  ;;  %2192 = vtanh.f32 %v1129_v58 }
 0x1c6   :  { %v2183_v0 = vpop.eup %2182  ;;  %1543 = vst.msk [vmem:[%s3269_s3 + $0x160] sm:$0xff] %vm1498_vm2, %v2181_v63  ;;  %2194 = vtanh.f32 %v1353_v59 }
 0x1c7   :  { %v2185_v1 = vpop.eup %2184  ;;  %1599 = vst.msk [vmem:[%s3269_s3 + $0x320] sm:$0xff] %vm1498_vm2, %v2183_v0 }
 0x1c8   :  { %v2187_v2 = vpop.eup %2186  ;;  %1544 = vst.msk [vmem:[%s3269_s3 + $0x168] sm:$0xff] %vm1498_vm2, %v2185_v1  ;;  %v1133_v3 = vpop.f32.mrb[96].mxu0 }
 0x1c9   :  { %v1357_v4 = vpop.f32.mrb[96].mxu1  ;;  %1600 = vst.msk [vmem:[%s3269_s3 + $0x328] sm:$0xff] %vm1498_vm2, %v2187_v2  ;;  %v1134_v5 = vadd.f32 %v3116_v26, %v1133_v3  ;;  %v1135_v7 = vpop.f32.mrb[97].mxu0 }
 0x1ca   :  { %v1358_v6 = vadd.f32 %v3116_v26, %v1357_v4  ;;  %v1359_v8 = vpop.f32.mrb[97].mxu1  ;;  %v1136_v9 = vpop.f32.mrb[98].mxu0 }
 0x1cb   :  { %v1360_v10 = vpop.f32.mrb[98].mxu1  ;;  %2196 = vtanh.f32 %v1134_v5  ;;  %v1137_v11 = vadd.f32 %v3116_v26, %v1136_v9  ;;  %v1138_v13 = vpop.f32.mrb[99].mxu0 }
 0x1cc   :  { %v1361_v12 = vadd.f32 %v3116_v26, %v1360_v10  ;;  %v1362_v14 = vpop.f32.mrb[99].mxu1  ;;  %2198 = vtanh.f32 %v1358_v6 }
 0x1cd   :  { %v2189_v15 = vpop.eup %2188  ;;  %2200 = vtanh.f32 %v1137_v11 }
 0x1ce   :  { %v2191_v16 = vpop.eup %2190  ;;  %1545 = vst.msk [vmem:[%s3269_s3 + $0x170] sm:$0xff] %vm1498_vm2, %v2189_v15  ;;  %2202 = vtanh.f32 %v1361_v12 }
 0x1cf   :  { %v2193_v17 = vpop.eup %2192  ;;  %1601 = vst.msk [vmem:[%s3269_s3 + $0x330] sm:$0xff] %vm1498_vm2, %v2191_v16 }
 0x1d0   :  { %v2195_v18 = vpop.eup %2194  ;;  %1546 = vst.msk [vmem:[%s3269_s3 + $0x178] sm:$0xff] %vm1498_vm2, %v2193_v17  ;;  %v1141_v19 = vpop.f32.mrb[100].mxu0 }
 0x1d1   :  { %v1365_v20 = vpop.f32.mrb[100].mxu1  ;;  %1602 = vst.msk [vmem:[%s3269_s3 + $0x338] sm:$0xff] %vm1498_vm2, %v2195_v18  ;;  %v1142_v21 = vadd.f32 %v3116_v26, %v1141_v19  ;;  %v1143_v23 = vpop.f32.mrb[101].mxu0 }
 0x1d2   :  { %v1366_v22 = vadd.f32 %v3116_v26, %v1365_v20  ;;  %v1367_v24 = vpop.f32.mrb[101].mxu1  ;;  %v1144_v25 = vpop.f32.mrb[102].mxu0 }
 0x1d3   :  { %v1368_v27 = vpop.f32.mrb[102].mxu1  ;;  %2204 = vtanh.f32 %v1142_v21  ;;  %v1145_v28 = vadd.f32 %v3116_v26, %v1144_v25  ;;  %v1146_v30 = vpop.f32.mrb[103].mxu0 }
 0x1d4   :  { %v1369_v29 = vadd.f32 %v3116_v26, %v1368_v27  ;;  %v1370_v31 = vpop.f32.mrb[103].mxu1  ;;  %2206 = vtanh.f32 %v1366_v22 }
 0x1d5   :  { %v2197_v62 = vpop.eup %2196  ;;  %2208 = vtanh.f32 %v1145_v28 }
 0x1d6   :  { %v2199_v32 = vpop.eup %2198  ;;  %1547 = vst.msk [vmem:[%s3269_s3 + $0x180] sm:$0xff] %vm1498_vm2, %v2197_v62  ;;  %2210 = vtanh.f32 %v1369_v29 }
 0x1d7   :  { %v2201_v33 = vpop.eup %2200  ;;  %1603 = vst.msk [vmem:[%s3269_s3 + $0x340] sm:$0xff] %vm1498_vm2, %v2199_v32 }
 0x1d8   :  { %v2203_v34 = vpop.eup %2202  ;;  %1548 = vst.msk [vmem:[%s3269_s3 + $0x188] sm:$0xff] %vm1498_vm2, %v2201_v33  ;;  %v1149_v35 = vpop.f32.mrb[104].mxu0 }
 0x1d9   :  { %v1373_v36 = vpop.f32.mrb[104].mxu1  ;;  %1604 = vst.msk [vmem:[%s3269_s3 + $0x348] sm:$0xff] %vm1498_vm2, %v2203_v34  ;;  %v1150_v37 = vadd.f32 %v3116_v26, %v1149_v35  ;;  %v1151_v39 = vpop.f32.mrb[105].mxu0 }
 0x1da   :  { %v1374_v38 = vadd.f32 %v3116_v26, %v1373_v36  ;;  %v1375_v40 = vpop.f32.mrb[105].mxu1  ;;  %v1152_v41 = vpop.f32.mrb[106].mxu0 }
 0x1db   :  { %v1376_v42 = vpop.f32.mrb[106].mxu1  ;;  %2212 = vtanh.f32 %v1150_v37  ;;  %v1153_v43 = vadd.f32 %v3116_v26, %v1152_v41  ;;  %v1154_v45 = vpop.f32.mrb[107].mxu0 }
 0x1dc   :  { %v1377_v44 = vadd.f32 %v3116_v26, %v1376_v42  ;;  %v1378_v46 = vpop.f32.mrb[107].mxu1  ;;  %2214 = vtanh.f32 %v1374_v38 }
 0x1dd   :  { %v2205_v47 = vpop.eup %2204  ;;  %2216 = vtanh.f32 %v1153_v43 }
 0x1de   :  { %v2207_v48 = vpop.eup %2206  ;;  %1549 = vst.msk [vmem:[%s3269_s3 + $0x190] sm:$0xff] %vm1498_vm2, %v2205_v47  ;;  %2218 = vtanh.f32 %v1377_v44 }
 0x1df   :  { %v2209_v49 = vpop.eup %2208  ;;  %1605 = vst.msk [vmem:[%s3269_s3 + $0x350] sm:$0xff] %vm1498_vm2, %v2207_v48 }
 0x1e0   :  { %v2211_v50 = vpop.eup %2210  ;;  %1550 = vst.msk [vmem:[%s3269_s3 + $0x198] sm:$0xff] %vm1498_vm2, %v2209_v49  ;;  %v1157_v51 = vpop.f32.mrb[108].mxu0 }
 0x1e1   :  { %v1381_v52 = vpop.f32.mrb[108].mxu1  ;;  %1606 = vst.msk [vmem:[%s3269_s3 + $0x358] sm:$0xff] %vm1498_vm2, %v2211_v50  ;;  %v1158_v53 = vadd.f32 %v3116_v26, %v1157_v51  ;;  %v1159_v55 = vpop.f32.mrb[109].mxu0 }
 0x1e2   :  { %v1382_v54 = vadd.f32 %v3116_v26, %v1381_v52  ;;  %v1383_v56 = vpop.f32.mrb[109].mxu1  ;;  %v1160_v57 = vpop.f32.mrb[110].mxu0 }
 0x1e3   :  { %v1384_v58 = vpop.f32.mrb[110].mxu1  ;;  %2220 = vtanh.f32 %v1158_v53  ;;  %v1161_v59 = vadd.f32 %v3116_v26, %v1160_v57  ;;  %v1162_v60 = vpop.f32.mrb[111].mxu0 }
 0x1e4   :  { %v1385_v61 = vpop.f32.mrb[111].mxu1  ;;  %2222 = vtanh.f32 %v1382_v54 }
 0x1e5   :  { %v2213_v63 = vpop.eup %2212  ;;  %2224 = vtanh.f32 %v1161_v59 }
 0x1e6   :  { %v2215_v0 = vpop.eup %2214  ;;  %1551 = vst.msk [vmem:[%s3269_s3 + $0x1a0] sm:$0xff] %vm1498_vm2, %v2213_v63 }
 0x1e7   :  { %v2217_v1 = vpop.eup %2216  ;;  %1607 = vst.msk [vmem:[%s3269_s3 + $0x360] sm:$0xff] %vm1498_vm2, %v2215_v0 }
 0x1e8   :  { %v2219_v2 = vpop.eup %2218  ;;  %1552 = vst.msk [vmem:[%s3269_s3 + $0x1a8] sm:$0xff] %vm1498_vm2, %v2217_v1 }
 0x1e9   :  { %1608 = vst.msk [vmem:[%s3269_s3 + $0x368] sm:$0xff] %vm1498_vm2, %v2219_v2 }
 0x1ed   :  { %v2221_v26 = vpop.eup %2220 }
 0x1ee   :  { %v2223_v3 = vpop.eup %2222  ;;  %1553 = vst.msk [vmem:[%s3269_s3 + $0x1b0] sm:$0xff] %vm1498_vm2, %v2221_v26 }
 0x1ef   :  { %v2225_v4 = vpop.eup %2224  ;;  %1610 = vst.msk [vmem:[%s3269_s3 + $0x370] sm:$0x3] %vm1609_vm3, %v2223_v3 }
 0x1f0   :  { %1554 = vst.msk [vmem:[%s3269_s3 + $0x1b8] sm:$0xff] %vm1498_vm2, %v2225_v4 }

// kernel: seq_cvae_forward.5
= control target key start
LH: loop header
LB: loop body
LE: loop exit
PB: predicated region body
PF: predicated region fallthrough
CT: control target
= control target key end

     0   :  { %s1129_s12 = smov 0   ;;  %s1276_s0 = inlined_call_operand.vmem [shape: bf16[2,128,288], index: 0, kind: input, shape index: {}]   ;;  %s1277_s1 = inlined_call_operand.vmem [shape: bf16[2,288,32], index: 1, kind: input, shape index: {}]   ;;  %s1278_s2 = inlined_call_operand.vmem [shape: f32[2,1,32], index: 2, kind: input, shape index: {}]   ;;  %s1279_s3 = inlined_call_operand.vmem [shape: f32[2,128,32], index: 3, kind: output, shape index: {}]  }
   0x1 LB: > { %s836_s13 = sadd.s32 4294967295, %s1107_s12   ;;  %p840_p0 = scmp.ge.s32.totalorder %s1107_s12, 1  ;;  %s1107_s12 = sphi %s1129_s12, %s13_s12  }
   0x2   : > { %p155_p1 = scmp.lt.s32.totalorder %s1107_s12, 3 }
   0x4   : > { %p156_p2 = pnand %p840_p0, %p155_p1 }
   0x5   : > { %p187_p3 = scmp.lt.s32.totalorder (!%p156_p2), %s836_s13, 1  ;;  %vm509_vm0 = vcmask (!%p156_p2), 261120  }
   0x6   : > { %159 = sbr.rel (%p156_p2) target bundleno = 324 (0x144), region = 32 }
   0xd   : > { %s1281_s13 = smov (!%p187_p3, %s836_s13), 1 }
   0xe   : > { %s1010_s14 = smul.u32 144, %s1281_s13  ;;  %s199_s24 = scalar_lea.vmem %s1278_s2, %s1281_s13 }
   0xf   : > { %s1009_s18 = smul.u32 192, %s1281_s13  ;;  %s898_s25 = sshll.u32 %s1281_s13, 7 }
  0x10   : > { %s1143_s17 = scalar_lea.vmem %s1277_s1, %s1010_s14  ;;  %s1225_s28 = scalar_lea.vmem %s1279_s3, %s898_s25 }
  0x11   : > { %v1019_v0 = vld [vmem:[%s1143_s17 + $0x40] sm:$0xff]   ;;  %v1021_v2 = vld [vmem:[%s1143_s17 + $0x48] sm:$0xff]   ;;  %v1023_v4 = vld [vmem:[%s1143_s17 + $0x50] sm:$0xff]   ;;  %s1158_s21 = scalar_lea.vmem %s1276_s0, %s1009_s18 }
  0x12   : > { %v1020_v1 = vld [vmem:[%s1143_s17] sm:$0xff]   ;;  %899 = vmatprep.subr.bf16.mxu0 %v1019_v0  ;;  %993 = vmatprep.subr.bf16.mxu1 %v1019_v0  ;;  %v1022_v3 = vld [vmem:[%s1143_s17 + $0x8] sm:$0xff]   ;;  %v1024_v5 = vld [vmem:[%s1143_s17 + $0x10] sm:$0xff]  }
  0x13   : > { %900 = vmatpush3.bf16.msra.mxu0 %v1020_v1  ;;  %1001 = vmatpush3.bf16.msra.mxu1 %v1020_v1  ;;  %v1025_v6 = vld [vmem:[%s1143_s17 + $0x58] sm:$0xff]   ;;  %v1027_v8 = vld [vmem:[%s1143_s17 + $0x60] sm:$0xff]   ;;  %v1029_v10 = vld [vmem:[%s1143_s17 + $0x68] sm:$0xff]  }
  0x14   : > { %901 = vmatprep.subr.bf16.mxu0 %v1021_v2  ;;  %994 = vmatprep.subr.bf16.mxu1 %v1021_v2  ;;  %v1026_v7 = vld [vmem:[%s1143_s17 + $0x18] sm:$0xff]   ;;  %v1028_v9 = vld [vmem:[%s1143_s17 + $0x20] sm:$0xff]   ;;  %v1030_v13 = vld [vmem:[%s1143_s17 + $0x28] sm:$0xff]  }
  0x15   : > { %v1037_v11 = vld [vmem:[%s1158_s21 + $0x4] ss:$12 sps:$4 sm:$0xff]   ;;  %v1040_v12 = vld [vmem:[%s1158_s21 + $0x94] ss:$12 sps:$4 sm:$0xff]   ;;  %v1033_v16 = vld [vmem:[%s1143_s17 + $0x78] sm:$0xff]  }
  0x16   : > { %v1031_v14 = vld [vmem:[%s1143_s17 + $0x70] sm:$0xff]   ;;  %566 = vmatprep.mubr.bf16.mxu0 %v1037_v11  ;;  %614 = vmatprep.mubr.bf16.mxu1 %v1040_v12  ;;  %v1034_v17 = vld [vmem:[%s1143_s17 + $0x38] sm:$0xff]   ;;  %v1035_v18 = vld [vmem:[%s1158_s21] ss:$12 sps:$4 sm:$0xff]  }
  0x17   : > { %902 = vmatpush3.bf16.msra.mxu0 %v1022_v3  ;;  %1002 = vmatpush3.bf16.msra.mxu1 %v1022_v3  ;;  %v1032_v15 = vld [vmem:[%s1143_s17 + $0x30] sm:$0xff]   ;;  %v1041_v19 = vld [vmem:[%s1143_s17 + $0x80] sm:$0xff]   ;;  %v1042_v21 = vld [vmem:[%s1158_s21 + $0x1c] ss:$12 sps:$4 sm:$0xff]  }
  0x18   : > { %903 = vmatprep.subr.bf16.mxu0 %v1023_v4  ;;  %995 = vmatprep.subr.bf16.mxu1 %v1023_v4  ;;  %v1038_v20 = vld [vmem:[%s1158_s21 + $0x90] ss:$12 sps:$4 sm:$0xff]   ;;  %v1044_v22 = vld [vmem:[%s1158_s21 + $0xac] ss:$12 sps:$4 sm:$0xff]   ;;  %v1047_v25 = vld [vmem:[%s1158_s21 + $0xa8] ss:$12 sps:$4 sm:$0xff]  }
  0x19   : > { %v1048_v23 = vld [vmem:[%s1143_s17 + $0x88] sm:$0xff]   ;;  %v1046_v24 = vld [vmem:[%s1158_s21 + $0x18] ss:$12 sps:$4 sm:$0xff]   ;;  %v1049_v26 = vld [vmem:[%s1158_s21 + $0x34] ss:$12 sps:$4 sm:$0xff]  }
  0x1a   : > { %v1051_v27 = vld [vmem:[%s1158_s21 + $0x8] ss:$12 sps:$4 sm:$0xff]   ;;  %v1052_v28 = vld [vmem:[%s1158_s21 + $0x30] ss:$12 sps:$4 sm:$0xff]   ;;  %v1053_v29 = vld [vmem:[%s1158_s21 + $0x20] ss:$12 sps:$4 sm:$0xff]  }
  0x1b   : > { %904 = vmatpush3.bf16.msra.mxu0 %v1024_v5  ;;  %1003 = vmatpush3.bf16.msra.mxu1 %v1024_v5  ;;  %v1054_v30 = vld [vmem:[%s1158_s21 + $0x4c] ss:$12 sps:$4 sm:$0xff]   ;;  %v1057_v32 = vld [vmem:[%s1158_s21 + $0x48] ss:$12 sps:$4 sm:$0xff]   ;;  %v1058_v33 = vld [vmem:[%s1158_s21 + $0x50] ss:$12 sps:$4 sm:$0xff]  }
  0x1c   : > { %905 = vmatprep.subr.bf16.mxu0 %v1025_v6  ;;  %996 = vmatprep.subr.bf16.mxu1 %v1025_v6  ;;  %v1056_v31 = vld [vmem:[%s1158_s21 + $0x38] ss:$12 sps:$4 sm:$0xff]   ;;  %v1061_v35 = vld [vmem:[%s1158_s21 + $0x68] ss:$12 sps:$4 sm:$0xff]   ;;  %v1062_v36 = vld [vmem:[%s1158_s21 + $0x60] ss:$12 sps:$4 sm:$0xff]  }
  0x1d   : > { %v1059_v34 = vld [vmem:[%s1158_s21 + $0x64] ss:$12 sps:$4 sm:$0xff]   ;;  %v1063_v37 = vld [vmem:[%s1158_s21 + $0x80] ss:$12 sps:$4 sm:$0xff]   ;;  %v1064_v38 = vld [vmem:[%s1158_s21 + $0x7c] ss:$12 sps:$4 sm:$0xff]  }
  0x1e   : > { %v1066_v39 = vld [vmem:[%s1158_s21 + $0x98] ss:$12 sps:$4 sm:$0xff]   ;;  %v1068_v41 = vld [vmem:[%s1158_s21 + $0xb0] ss:$12 sps:$4 sm:$0xff]   ;;  %v1213_v2 = vld [vmem:[%s199_s24] ss:$0 sm:$0xff] }
  0x1f   : > { %906 = vmatpush3.bf16.msra.mxu0 %v1026_v7  ;;  %1004 = vmatpush3.bf16.msra.mxu1 %v1026_v7  ;;  %v1067_v40 = vld [vmem:[%s1158_s21 + $0x78] ss:$12 sps:$4 sm:$0xff]  }
  0x20   : > { %907 = vmatprep.subr.bf16.mxu0 %v1027_v8  ;;  %997 = vmatprep.subr.bf16.mxu1 %v1027_v8 }
  0x23   : > { %908 = vmatpush3.bf16.msra.mxu0 %v1028_v9  ;;  %1005 = vmatpush3.bf16.msra.mxu1 %v1028_v9 }
  0x24   : > { %909 = vmatprep.subr.bf16.mxu0 %v1029_v10  ;;  %998 = vmatprep.subr.bf16.mxu1 %v1029_v10 }
  0x27   : > { %910 = vmatpush3.bf16.msra.mxu0 %v1030_v13  ;;  %1006 = vmatpush3.bf16.msra.mxu1 %v1030_v13 }
  0x28   : > { %911 = vmatprep.subr.bf16.mxu0 %v1031_v14  ;;  %999 = vmatprep.subr.bf16.mxu1 %v1031_v14 }
  0x2b   : > { %912 = vmatpush3.bf16.msra.mxu0 %v1032_v15  ;;  %1007 = vmatpush3.bf16.msra.mxu1 %v1032_v15 }
  0x2c   : > { %913 = vmatprep.subr.bf16.mxu0 %v1033_v16  ;;  %1000 = vmatprep.subr.bf16.mxu1 %v1033_v16 }
  0x2f   : > { %914 = vmatpush3.bf16.msra.mxu0 %v1034_v17  ;;  %1008 = vmatpush3.bf16.msra.mxu1 %v1034_v17 }
  0x30   : > { %973 = vmatprep.subr.bf16.mxu1 %v1041_v19 }
  0x32   : > { %567 = vmatmul.mubr.bf16.vlgmr.msra.gmra.mrb[0].mxu0 %v1035_v18  ;;  %615 = vmatmul.mubr.bf16.vlgmr.msra.gmra.mrb[0].mxu1 %v1038_v20 }
  0x33   : > { %974 = vmatpush3.bf16.msra.mxu1 %v1041_v19  ;;  %574 = vmatprep.mubr.bf16.mxu0 %v1042_v21 }
  0x34   : > { %622 = vmatprep.mubr.bf16.mxu1 %v1044_v22  ;;  %975 = vmatprep.subr.bf16.mxu1 %v1048_v23 }
  0x37   : > { %976 = vmatpush3.bf16.msra.mxu1 %v1048_v23 }
  0x3a   : > { %575 = vmatmul.mubr.bf16.gmra.mrb[4].mxu0 %v1046_v24  ;;  %623 = vmatmul.mubr.bf16.gmra.mrb[4].mxu1 %v1047_v25 }
  0x3b   : > { %582 = vmatprep.mubr.bf16.mxu0 %v1049_v26  ;;  %977 = vmatprep.mubr.msk.bf16.mxu1 %vm509_vm0, %v1051_v27 }
  0x42   : > { %583 = vmatmul.mubr.bf16.gmra.mrb[8].mxu0 %v1052_v28  ;;  %978 = vmatmul.mubr.msk.bf16.vlgmr.msra.gmra.mrb[8].mxu1 %vm509_vm0, %v1053_v29 }
  0x43   : > { %590 = vmatprep.mubr.bf16.mxu0 %v1054_v30  ;;  %981 = vmatprep.mubr.msk.bf16.mxu1 %vm509_vm0, %v1056_v31 }
  0x4a   : > { %591 = vmatmul.mubr.bf16.gmra.mrb[12].mxu0 %v1057_v32  ;;  %982 = vmatmul.mubr.msk.bf16.gmra.mrb[12].mxu1 %vm509_vm0, %v1058_v33 }
  0x4b   : > { %598 = vmatprep.mubr.bf16.mxu0 %v1059_v34  ;;  %985 = vmatprep.mubr.msk.bf16.mxu1 %vm509_vm0, %v1061_v35 }
  0x52   : > { %599 = vmatmul.mubr.bf16.gmra.mrb[16].mxu0 %v1062_v36  ;;  %986 = vmatmul.mubr.msk.bf16.gmra.mrb[16].mxu1 %vm509_vm0, %v1063_v37 }
  0x53   : > { %606 = vmatprep.mubr.bf16.mxu0 %v1064_v38  ;;  %989 = vmatprep.mubr.msk.bf16.mxu1 %vm509_vm0, %v1066_v39 }
  0x5a   : > { %607 = vmatmul.mubr.bf16.gmra.mrb[20].mxu0 %v1067_v40  ;;  %990 = vmatmul.mubr.msk.bf16.gmra.mrb[20].mxu1 %vm509_vm0, %v1068_v41 }
 0x105   : > { %v915_v42 = vpop.f32.mrb[0].mxu0  ;;  %v951_v43 = vpop.f32.mrb[0].mxu1 }
 0x106   : > { %v916_v44 = vpop.f32.mrb[1].mxu0  ;;  %v952_v45 = vpop.f32.mrb[1].mxu1 }
 0x107   : > { %v917_v46 = vadd.f32 %v916_v44, %v915_v42  ;;  %v918_v47 = vpop.f32.mrb[2].mxu0  ;;  %v1201_v48 = vadd.f32 %v952_v45, %v951_v43  ;;  %v954_v49 = vpop.f32.mrb[2].mxu1 }
 0x108   : > { %v919_v50 = vpop.f32.mrb[3].mxu0  ;;  %v955_v51 = vpop.f32.mrb[3].mxu1 }
 0x109   : > { %v920_v52 = vadd.f32 %v919_v50, %v918_v47  ;;  %v1203_v53 = vadd.f32 %v955_v51, %v954_v49  ;;  %v569_v6 = vadd.f32 %v917_v46, %v1213_v2 }
 0x10b   : > { %v572_v15 = vadd.f32 %v920_v52, %v1213_v2 }
 0x10d   : > { %v921_v54 = vpop.f32.mrb[4].mxu0  ;;  %v957_v55 = vpop.f32.mrb[4].mxu1 }
 0x10e   : > { %v922_v56 = vpop.f32.mrb[5].mxu0  ;;  %v958_v57 = vpop.f32.mrb[5].mxu1 }
 0x10f   : > { %v923_v58 = vadd.f32 %v922_v56, %v921_v54  ;;  %v924_v59 = vpop.f32.mrb[6].mxu0  ;;  %v1205_v60 = vadd.f32 %v958_v57, %v957_v55  ;;  %v960_v61 = vpop.f32.mrb[6].mxu1 }
 0x110   : > { %v925_v62 = vpop.f32.mrb[7].mxu0  ;;  %v961_v63 = vpop.f32.mrb[7].mxu1 }
 0x111   : > { %v926_v0 = vadd.f32 %v925_v62, %v924_v59  ;;  %v1211_v1 = vadd.f32 %v961_v63, %v960_v61  ;;  %v577_v3 = vadd.f32 %v923_v58, %v1213_v2  ;;  %v625_v59 = vadd.f32 %v1205_v60, %v1213_v2 }
 0x113   : > { %v580_v10 = vadd.f32 %v926_v0, %v1213_v2 }
 0x115   : > { %v927_v4 = vpop.f32.mrb[8].mxu0  ;;  %v979_v5 = vpop.f32.mrb[8].mxu1 }
 0x116   : > { %v674_v7 = vadd.f32 %v979_v5, %v577_v3  ;;  %v928_v8 = vpop.f32.mrb[9].mxu0  ;;  %v665_v9 = vpop.f32.mrb[9].mxu1  ;;  %v617_v3 = vadd.f32 %v1201_v48, %v1213_v2 }
 0x117   : > { %v929_v11 = vadd.f32 %v928_v8, %v927_v4  ;;  %v666_v12 = vadd.f32 %v665_v9, %v569_v6  ;;  %v930_v13 = vpop.f32.mrb[10].mxu0  ;;  %v980_v14 = vpop.f32.mrb[10].mxu1 }
 0x118   : > { %1069 = vtanh.f32 %v674_v7  ;;  %v677_v16 = vadd.f32 %v980_v14, %v580_v10  ;;  %v931_v17 = vpop.f32.mrb[11].mxu0  ;;  %v668_v18 = vpop.f32.mrb[11].mxu1  ;;  %v628_v7 = vadd.f32 %v1211_v1, %v1213_v2 }
 0x119   : > { %1071 = vtanh.f32 %v666_v12  ;;  %v932_v19 = vadd.f32 %v931_v17, %v930_v13  ;;  %v669_v20 = vadd.f32 %v668_v18, %v572_v15  ;;  %v585_v23 = vadd.f32 %v929_v11, %v1213_v2 }
 0x11a   : > { %1073 = vtanh.f32 %v677_v16  ;;  %v620_v12 = vadd.f32 %v1203_v53, %v1213_v2 }
 0x11b   : > { %1075 = vtanh.f32 %v669_v20  ;;  %v588_v30 = vadd.f32 %v932_v19, %v1213_v2 }
 0x11d   : > { %v933_v21 = vpop.f32.mrb[12].mxu0  ;;  %v983_v22 = vpop.f32.mrb[12].mxu1 }
 0x11e   : > { %v934_v24 = vpop.f32.mrb[13].mxu0  ;;  %v681_v25 = vpop.f32.mrb[13].mxu1 }
 0x11f   : > { %v935_v26 = vadd.f32 %v934_v24, %v933_v21  ;;  %v682_v27 = vadd.f32 %v681_v25, %v585_v23  ;;  %v936_v28 = vpop.f32.mrb[14].mxu0  ;;  %v984_v29 = vpop.f32.mrb[14].mxu1 }
 0x120   : > { %v937_v31 = vpop.f32.mrb[15].mxu0  ;;  %v684_v32 = vpop.f32.mrb[15].mxu1 }
 0x121   : > { %v593_v33 = vadd.f32 %v935_v26, %v1213_v2  ;;  %1077 = vtanh.f32 %v682_v27  ;;  %v938_v34 = vadd.f32 %v937_v31, %v936_v28  ;;  %v685_v35 = vadd.f32 %v684_v32, %v588_v30 }
 0x122   : > { %v1070_v36 = vpop.eup %1069 }
 0x123   : > { %v1072_v37 = vpop.eup %1071  ;;  %746 = vst.msk [vmem:[%s1225_s28 + $0x10] sm:$0xff] %vm509_vm0, %v1070_v36  ;;  %v690_v38 = vadd.f32 %v983_v22, %v593_v33  ;;  %v596_v39 = vadd.f32 %v938_v34, %v1213_v2  ;;  %1079 = vtanh.f32 %v685_v35 }
 0x124   : > { %v1074_v40 = vpop.eup %1073  ;;  %744 = vst.msk [vmem:[%s1225_s28] sm:$0xff] %vm509_vm0, %v1072_v37 }
 0x125   : > { %v1076_v41 = vpop.eup %1075  ;;  %747 = vst.msk [vmem:[%s1225_s28 + $0x18] sm:$0xff] %vm509_vm0, %v1074_v40  ;;  %1081 = vtanh.f32 %v690_v38  ;;  %v693_v42 = vadd.f32 %v984_v29, %v596_v39  ;;  %v939_v43 = vpop.f32.mrb[16].mxu0 }
 0x126   : > { %v987_v44 = vpop.f32.mrb[16].mxu1  ;;  %745 = vst.msk [vmem:[%s1225_s28 + $0x8] sm:$0xff] %vm509_vm0, %v1076_v41  ;;  %v940_v45 = vpop.f32.mrb[17].mxu0 }
 0x127   : > { %v697_v46 = vpop.f32.mrb[17].mxu1  ;;  %1083 = vtanh.f32 %v693_v42  ;;  %v941_v47 = vadd.f32 %v940_v45, %v939_v43  ;;  %v942_v49 = vpop.f32.mrb[18].mxu0 }
 0x128   : > { %v988_v50 = vpop.f32.mrb[18].mxu1  ;;  %v943_v51 = vpop.f32.mrb[19].mxu0 }
 0x129   : > { %v700_v52 = vpop.f32.mrb[19].mxu1  ;;  %v601_v54 = vadd.f32 %v941_v47, %v1213_v2  ;;  %v944_v55 = vadd.f32 %v943_v51, %v942_v49 }
 0x12b   : > { %v1078_v56 = vpop.eup %1077  ;;  %v698_v57 = vadd.f32 %v697_v46, %v601_v54  ;;  %v604_v58 = vadd.f32 %v944_v55, %v1213_v2 }
 0x12c   : > { %748 = vst.msk [vmem:[%s1225_s28 + $0x20] sm:$0xff] %vm509_vm0, %v1078_v56 }
 0x12d   : > { %v1080_v61 = vpop.eup %1079  ;;  %1085 = vtanh.f32 %v698_v57  ;;  %v701_v62 = vadd.f32 %v700_v52, %v604_v58  ;;  %v945_v63 = vpop.f32.mrb[20].mxu0 }
 0x12e   : > { %v991_v0 = vpop.f32.mrb[20].mxu1  ;;  %749 = vst.msk [vmem:[%s1225_s28 + $0x28] sm:$0xff] %vm509_vm0, %v1080_v61  ;;  %v946_v5 = vpop.f32.mrb[21].mxu0 }
 0x12f   : > { %v722_v4 = vadd.f32 %v991_v0, %v625_v59  ;;  %v713_v6 = vpop.f32.mrb[21].mxu1  ;;  %v1082_v8 = vpop.eup %1081  ;;  %1087 = vtanh.f32 %v701_v62  ;;  %v947_v60 = vadd.f32 %v946_v5, %v945_v63 }
 0x130   : > { %v714_v9 = vadd.f32 %v713_v6, %v617_v3  ;;  %v948_v10 = vpop.f32.mrb[22].mxu0  ;;  %v992_v11 = vpop.f32.mrb[22].mxu1  ;;  %750 = vst.msk [vmem:[%s1225_s28 + $0x30] sm:$0xff] %vm509_vm0, %v1082_v8 }
 0x131   : > { %1089 = vtanh.f32 %v722_v4  ;;  %v725_v48 = vadd.f32 %v992_v11, %v628_v7  ;;  %v949_v13 = vpop.f32.mrb[23].mxu0  ;;  %v716_v14 = vpop.f32.mrb[23].mxu1  ;;  %v609_v1 = vadd.f32 %v947_v60, %v1213_v2 }
 0x132   : > { %v1084_v15 = vpop.eup %1083  ;;  %1091 = vtanh.f32 %v714_v9  ;;  %v950_v16 = vadd.f32 %v949_v13, %v948_v10  ;;  %v717_v17 = vadd.f32 %v716_v14, %v620_v12 }
 0x133   : > { %751 = vst.msk [vmem:[%s1225_s28 + $0x38] sm:$0xff] %vm509_vm0, %v1084_v15  ;;  %1093 = vtanh.f32 %v725_v48  ;;  %v706_v53 = vadd.f32 %v987_v44, %v609_v1 }
 0x134   : > { %v612_v18 = vadd.f32 %v950_v16, %v1213_v2  ;;  %1095 = vtanh.f32 %v717_v17 }
 0x135   : > { %1097 = vtanh.f32 %v706_v53 }
 0x136   : > { %v709_v19 = vadd.f32 %v988_v50, %v612_v18 }
 0x137   : > { %v1086_v20 = vpop.eup %1085 }
 0x138   : > { %1099 = vtanh.f32 %v709_v19  ;;  %752 = vst.msk [vmem:[%s1225_s28 + $0x40] sm:$0xff] %vm509_vm0, %v1086_v20 }
 0x139   : > { %v1088_v21 = vpop.eup %1087 }
 0x13a   : > { %753 = vst.msk [vmem:[%s1225_s28 + $0x48] sm:$0xff] %vm509_vm0, %v1088_v21 }
 0x13b   : > { %v1090_v22 = vpop.eup %1089 }
 0x13c   : > { %v1092_v23 = vpop.eup %1091  ;;  %758 = vst.msk [vmem:[%s1225_s28 + $0x70] sm:$0xff] %vm509_vm0, %v1090_v22 }
 0x13d   : > { %v1094_v24 = vpop.eup %1093  ;;  %756 = vst.msk [vmem:[%s1225_s28 + $0x60] sm:$0xff] %vm509_vm0, %v1092_v23 }
 0x13e   : > { %v1096_v2 = vpop.eup %1095  ;;  %759 = vst.msk [vmem:[%s1225_s28 + $0x78] sm:$0xff] %vm509_vm0, %v1094_v24 }
 0x13f   : > { %757 = vst.msk [vmem:[%s1225_s28 + $0x68] sm:$0xff] %vm509_vm0, %v1096_v2  ;;  %v1098_v25 = vpop.eup %1097 }
 0x140   : > { %754 = vst.msk [vmem:[%s1225_s28 + $0x50] sm:$0xff] %vm509_vm0, %v1098_v25 }
 0x142   : > { %v1100_v26 = vpop.eup %1099 }
 0x143   : > { %755 = vst.msk [vmem:[%s1225_s28 + $0x58] sm:$0xff] %vm509_vm0, %v1100_v26 }
 0x144 PF: > { %s13_s12 = sadd.s32 1, %s1107_s12  }
 0x145   : > { %p10_p4 = scmp.ge.s32.totalorder %s13_s12, 4  }
 0x147   :  { %12 = sbr.rel (!%p10_p4) target bundleno = 1 (0x1), region = 68 }

// kernel: seq_cvae_forward.7
= control target key start
LH: loop header
LB: loop body
LE: loop exit
PB: predicated region body
PF: predicated region fallthrough
CT: control target
= control target key end

     0   :  { %vm129_vm0 = vcmask 1043456   ;;  %vm75_vm1 = vcmask 1044480   ;;  %v2546_v0 = vmov 0.0   ;;  %vm2547_vm2 = vmmov 0   ;;  %s2551_s29 = smov 32   ;;  %s3032_s5 = inlined_call_operand.vmem [shape: bf16[8,32], index: 5, kind: input, shape index: {}]   ;;  %s3033_s6 = inlined_call_operand.vmem [shape: bf16[10,32], index: 6, kind: input, shape index: {}]   ;;  %s3034_s0 = inlined_call_operand.vmem [shape: bf16[16,8], index: 0, kind: input, shape index: {}]   ;;  %s3035_s1 = inlined_call_operand.vmem [shape: bf16[16,10], index: 1, kind: input, shape index: {}]   ;;  %s3036_s8 = inlined_call_operand.vmem [shape: bf16[32,32], index: 8, kind: input, shape index: {}]   ;;  %s3037_s3 = inlined_call_operand.vmem [shape: bf16[288,32], index: 3, kind: input, shape index: {}]   ;;  %s3038_s7 = inlined_call_operand.vmem [shape: f32[1,32], index: 7, kind: input, shape index: {}]   ;;  %s3039_s10 = inlined_call_operand.vmem [shape: bf16[32,128], index: 10, kind: input, shape index: {}]   ;;  %s3040_s2 = inlined_call_operand.vmem [shape: bf16[2,288], index: 2, kind: input, shape index: {}]   ;;  %s3041_s9 = inlined_call_operand.vmem [shape: f32[1,32], index: 9, kind: input, shape index: {}]   ;;  %s3042_s11 = inlined_call_operand.vmem [shape: bf16[32,128], index: 11, kind: input, shape index: {}]   ;;  %s3043_s13 = inlined_call_operand.vmem [shape: f32[32,128], index: 13, kind: input, shape index: {}]   ;;  %s3044_s4 = inlined_call_operand.vmem [shape: f32[1,32], index: 4, kind: input, shape index: {}]   ;;  %s3045_s12 = inlined_call_operand.vmem [shape: f32[1,128], index: 12, kind: input, shape index: {}]   ;;  %s3046_s14 = inlined_call_operand.vmem [shape: bf16[32,6], index: 14, kind: input, shape index: {}]   ;;  %s3047_s15 = inlined_call_operand.vmem [shape: f32[1,6], index: 15, kind: input, shape index: {}]   ;;  %s3048_s16 = inlined_call_operand.vmem [shape: f32[8,2,6], index: 16, kind: output, shape index: {}]  }
   0x1   :  { %3049 = sst [smem:[#allocation2_spill]] %s3032_s5  ;;  %2167 = vmatprep.subr.bf16.mxu1 %v2546_v0  ;;  %2161 = vmatprep.subr.bf16.mxu0 %v2546_v0  ;;  %v2411_v3 = vld [vmem:[%s3033_s6] sm:$0x1f]   ;;  %vm125_vm3 = vcmask 64512   ;;  %vm71_vm4 = vcmask 80896   ;;  %v2415_v8 = vld [vmem:[%s3036_s8 + $0x8] sm:$0xff]   ;;  %v373_v38 = vlaneseq }
   0x2   :  { %s3050_s23 = sld [smem:[#allocation2_spill]]  ;;  %2169 = vmatprep.mubr.msk.bf16.mxu1 %vm2547_vm2, %v2546_v0  ;;  %v2412_v4 = vld [vmem:[%s3034_s0] sm:$0xff]   ;;  %2163 = vmatprep.mubr.msk.bf16.mxu0 %vm2547_vm2, %v2546_v0  ;;  %v77_v5 = vsel %vm75_vm1, %v2411_v3, 0  ;;  %vm209_vm5 = vcmask 261120   ;;  %v2418_v27 = vld [vmem:[%s3037_s3 + $0x48] sm:$0xff]   ;;  %v2420_v29 = vld [vmem:[%s3037_s3 + $0x50] sm:$0xff]  }
   0x3   :  { %v2413_v6 = vld [vmem:[%s3035_s1] sm:$0xff]   ;;  %2162 = vmatpush3.bf16.msra.mxu0 %v77_v5  ;;  %v2419_v28 = vld [vmem:[%s3037_s3 + $0x8] sm:$0xff]   ;;  %v2421_v30 = vld [vmem:[%s3037_s3 + $0x10] sm:$0xff]   ;;  %v2548_v40 = vmov 1966171168   ;;  %v374_v43 = vshrl.u32 %v373_v38, 7 }
   0x4   :  { %2173 = vmatprep.subr.bf16.mxu0 %v2546_v0  ;;  %v2414_v7 = vld [vmem:[%s3036_s8] sm:$0xff]   ;;  %v2422_v31 = vld [vmem:[%s3037_s3 + $0x58] sm:$0xff]   ;;  %v2426_v35 = vld [vmem:[%s3037_s3 + $0x68] sm:$0xff]   ;;  %v371_v41 = vunpack.c.l.s4 %v2548_v40  ;;  %vm825_vm6 = vcmask 41984  }
   0x5   :  { %v2416_v9 = vld [vmem:[%s3037_s3 + $0x40] sm:$0xff]   ;;  %v2423_v32 = vld [vmem:[%s3037_s3 + $0x18] sm:$0xff]   ;;  %v2427_v36 = vld [vmem:[%s3037_s3 + $0x28] sm:$0xff]  }
   0x6   :  { %2164 = vmatmul.mubr.msk.bf16.vlgmr.msra.gmra.mrb[0].mxu0 %vm71_vm4, %v2413_v6  ;;  %v1985_v13 = vld [vmem:[%s3038_s7] ss:$0 sm:$0xff]  ;;  %v2429_v37 = vld [vmem:[%s3037_s3 + $0x70] sm:$0xff]   ;;  %v2431_v44 = vld [vmem:[%s3039_s10 + $0x8] sm:$0xff]   ;;  %v372_v47 = vunpack.c.0.s8 %v371_v41 }
   0x7   :  { %2177 = vmatprep.mubr.msk.bf16.mxu0 %vm2547_vm2, %v2546_v0  ;;  %2174 = vmatpush3.bf16.msra.mxu0 %v2414_v7  ;;  %v2417_v25 = vld [vmem:[%s3037_s3] sm:$0xff]   ;;  %v2430_v42 = vld [vmem:[%s3037_s3 + $0x30] sm:$0xff]   ;;  %v2432_v45 = vld [vmem:[%s3037_s3 + $0x78] sm:$0xff]  }
   0x8   :  { %v56_v1 = vld [vmem:[%s3050_s23] sm:$0xf]  ;;  %2175 = vmatprep.subr.bf16.mxu0 %v2546_v0  ;;  %v375_v49 = vsub.s32 %v372_v47, %v374_v43  ;;  %v2433_v50 = vld [vmem:[%s3037_s3 + $0x38] sm:$0xff]  }
   0x9   :  { %v131_v2 = vsel %vm129_vm0, %v56_v1, 0  ;;  %v2424_v33 = vld [vmem:[%s3037_s3 + $0x60] sm:$0xff]   ;;  %v2435_v1 = vld [vmem:[%s3037_s3 + $0x88] sm:$0xff]  }
   0xa   :  { %2168 = vmatpush3.bf16.msra.mxu1 %v131_v2  ;;  %v2425_v34 = vld [vmem:[%s3037_s3 + $0x20] sm:$0xff]  }
   0xb   :  { %2181 = vmatprep.subr.bf16.mxu1 %v2546_v0  ;;  %2176 = vmatpush3.bf16.msra.mxu0 %v2415_v8  ;;  %v2428_v39 = vld [vmem:[%s3039_s10] sm:$0xff]  }
   0xc   :  { %2069 = vmatprep.subr.bf16.mxu0 %v2416_v9  ;;  %v1994_v46 = vld.sshfl [vmem:[%s3040_s2] sm:$0x13 pattern:$0x75316420]  ;;  %v2437_v9 = vld [vmem:[%s3042_s11 + $0x8] sm:$0xff]  }
   0xd   :  { %2170 = vmatmul.mubr.msk.bf16.vlgmr.msra.gmra.mrb[0].mxu1 %vm125_vm3, %v2412_v4  ;;  %v369_v48 = vcombine.high %v1994_v46, %v1994_v46  ;;  %v376_v52 = vrot.slane %v1994_v46, %v375_v49  ;;  %v1986_v53 = vld [vmem:[%s3041_s9] ss:$0 sm:$0xff] }
   0xe   :  { %2185 = vmatprep.mubr.msk.bf16.mxu1 %vm2547_vm2, %v2546_v0  ;;  %2182 = vmatpush3.bf16.msra.mxu1 %v2428_v39  ;;  %v2434_v62 = vld [vmem:[%s3037_s3 + $0x80] sm:$0xff]  }
   0xf   :  { %2183 = vmatprep.subr.bf16.mxu1 %v2546_v0  ;;  %v383_v51 = vrot.slane %v369_v48, %v375_v49  ;;  %v384_v2 = vcombine.high %v376_v52, %v376_v52  ;;  %v2436_v8 = vld [vmem:[%s3042_s11] sm:$0xff]  }
  0x12   :  { %2184 = vmatpush3.bf16.msra.mxu1 %v2431_v44 }
  0x13   :  { %2189 = vmatprep.subr.bf16.mxu1 %v2546_v0 }
  0xd9   :  { %v113_v12 = vpop.f32.mrb[0].mxu0 }
  0xda   :  { %v2165_v16 = vpop.f32.mrb[1].mxu0 }
  0xdb   :  { %v116_v18 = vpop.f32.mrb[2].mxu0 }
  0xdc   :  { %v2166_v21 = vpop.f32.mrb[3].mxu0 }
  0xe0   :  { %v167_v10 = vpop.f32.mrb[0].mxu1 }
  0xe1   :  { %v2171_v11 = vpop.f32.mrb[1].mxu1  ;;  %v168_v15 = vadd.f32 %v167_v10, %v113_v12  ;;  %v646_v10 = vld [vmem:[%s3043_s13] sm:$0xff]  ;;  %v2549_v12 = vmov 0.0|0.0  }
  0xe2   :  { %v170_v14 = vpop.f32.mrb[2].mxu1  ;;  %v647_v11 = vld [vmem:[%s3043_s13 + $0x8] sm:$0xff] }
  0xe3   :  { %v2172_v17 = vpop.f32.mrb[3].mxu1  ;;  %v181_v19 = vadd.f32 %v1985_v13, %v168_v15  ;;  %v171_v20 = vadd.f32 %v170_v14, %v116_v18  ;;  %v648_v14 = vld [vmem:[%s3043_s13 + $0x10] sm:$0xff]  ;;  %v649_v15 = vld [vmem:[%s3043_s13 + $0x18] sm:$0xff] }
  0xe4   :  { %v2775_v16 = vpack.c.bf16 %v649_v15, %v648_v14 }
  0xe5   :  { %v182_v22 = vadd.f32 %v1985_v13, %v171_v20  ;;  %2440 = vtanh.f32 %v181_v19  ;;  %v2764_v13 = vpack.c.bf16 %v647_v11, %v646_v10  ;;  %v1993_v20 = vld [vmem:[%s3044_s4] ss:$0 sm:$0xff] }
  0xe7   :  { %2442 = vtanh.f32 %v182_v22 }
  0xef   :  { %v2441_v23 = vpop.eup %2440 }
  0xf1   :  { %v2443_v24 = vpop.eup %2442 }
  0xf2   :  { %v185_v26 = vpack.c.bf16 %v2443_v24, %v2441_v23 }
  0xf4   :  { %2178 = vmatmul.mubr.msk.bf16.vlgmr.msra.gmra.mrb[4].mxu0 %vm209_vm5, %v185_v26 }
  0xf5   :  { %2070 = vmatpush3.bf16.msra.mxu0 %v2417_v25  ;;  %530 = vmatprep.mubr.bf16.mxu0 %v383_v51 }
  0xf6   :  { %2071 = vmatprep.subr.bf16.mxu0 %v2418_v27 }
  0xf9   :  { %2072 = vmatpush3.bf16.msra.mxu0 %v2419_v28 }
  0xfa   :  { %2073 = vmatprep.subr.bf16.mxu0 %v2420_v29 }
  0xfd   :  { %2074 = vmatpush3.bf16.msra.mxu0 %v2421_v30  ;;  %v2014_v30 = vld [vmem:[%s3045_s12] ss:$0 sm:$0xff]  ;;  %s2550_s12 = smov 64  }
  0xfe   :  { %2075 = vmatprep.subr.bf16.mxu0 %v2422_v31 }
 0x101   :  { %2076 = vmatpush3.bf16.msra.mxu0 %v2423_v32 }
 0x102   :  { %2077 = vmatprep.subr.bf16.mxu0 %v2424_v33 }
 0x105   :  { %2078 = vmatpush3.bf16.msra.mxu0 %v2425_v34 }
 0x106   :  { %2079 = vmatprep.subr.bf16.mxu0 %v2426_v35 }
 0x109   :  { %2080 = vmatpush3.bf16.msra.mxu0 %v2427_v36 }
 0x10a   :  { %2081 = vmatprep.subr.bf16.mxu0 %v2429_v37 }
 0x10d   :  { %2082 = vmatpush3.bf16.msra.mxu0 %v2430_v42 }
 0x10e   :  { %2083 = vmatprep.subr.bf16.mxu0 %v2432_v45 }
 0x111   :  { %2084 = vmatpush3.bf16.msra.mxu0 %v2433_v50 }
 0x112   :  { %2363 = vmatprep.subr.bf16.mxu0 %v2549_v12 }
 0x114   :  { %531 = vmatmul.mubr.bf16.vlgmr.msra.gmra.mrb[8].mxu0 %v376_v52 }
 0x115   :  { %2232 = vmatprep.mubr.msk.f32.mxu0 %vm2547_vm2, %v2546_v0  ;;  %2365 = vmatpush3.bf16.msra.mxu0 %v2764_v13 }
 0x116   :  { %2366 = vmatprep.subr.bf16.mxu0 %v2549_v12 }
 0x119   :  { %2368 = vmatpush3.bf16.msra.mxu0 %v2775_v16 }
 0x11a   :  { %2369 = vmatprep.subr.bf16.mxu0 %v2549_v12 }
 0x1c7   :  { %v247_v54 = vpop.f32.mrb[4].mxu0 }
 0x1c8   :  { %v248_v55 = vadd.f32 %v1986_v53, %v247_v54  ;;  %v2179_v56 = vpop.f32.mrb[5].mxu0 }
 0x1c9   :  { %v250_v57 = vpop.f32.mrb[6].mxu0 }
 0x1ca   :  { %v251_v58 = vadd.f32 %v1986_v53, %v250_v57  ;;  %v2180_v59 = vpop.f32.mrb[7].mxu0  ;;  %2444 = vtanh.f32 %v248_v55 }
 0x1cc   :  { %2446 = vtanh.f32 %v251_v58 }
 0x1d4   :  { %v2445_v60 = vpop.eup %2444 }
 0x1d6   :  { %v2447_v61 = vpop.eup %2446 }
 0x1d7   :  { %v256_v63 = vpack.c.bf16 %v2447_v61, %v2445_v60 }
 0x1d9   :  { %2186 = vmatmul.mubr.msk.bf16.vlgmr.msra.gmra.mrb[4].mxu1 %vm209_vm5, %v256_v63 }
 0x1da   :  { %2190 = vmatpush3.bf16.msra.mxu1 %v2434_v62  ;;  %2193 = vmatprep.mubr.msk.bf16.mxu1 %vm2547_vm2, %v2546_v0 }
 0x1db   :  { %2191 = vmatprep.subr.bf16.mxu1 %v2546_v0 }
 0x1de   :  { %2192 = vmatpush3.bf16.msra.mxu1 %v2435_v1 }
 0x1df   :  { %2197 = vmatprep.subr.bf16.mxu1 %v2546_v0 }
 0x1e1   :  { %2194 = vmatmul.mubr.msk.bf16.vlgmr.msra.gmra.mrb[8].mxu1 %vm209_vm5, %v384_v2 }
 0x1e2   :  { %2201 = vmatprep.mubr.msk.bf16.mxu1 %vm2547_vm2, %v2546_v0  ;;  %2198 = vmatpush3.bf16.msra.mxu1 %v2436_v8 }
 0x1e3   :  { %2199 = vmatprep.subr.bf16.mxu1 %v2546_v0 }
 0x1e6   :  { %2200 = vmatpush3.bf16.msra.mxu1 %v2437_v9 }
 0x1e7   :  { %v2085_v3 = vpop.f32.mrb[8].mxu0  ;;  %2357 = vmatprep.subr.bf16.mxu1 %v2549_v12 }
 0x1e8   :  { %v2086_v4 = vpop.f32.mrb[9].mxu0 }
 0x1e9   :  { %v2087_v5 = vadd.f32 %v2086_v4, %v2085_v3  ;;  %v2088_v6 = vpop.f32.mrb[10].mxu0 }
 0x1ea   :  { %v2089_v7 = vpop.f32.mrb[11].mxu0 }
 0x1eb   :  { %v533_v22 = vadd.f32 %v2087_v5, %v1993_v20 }
 0x2ac   :  { %v310_v17 = vpop.f32.mrb[4].mxu1 }
 0x2ad   :  { %v2187_v18 = vpop.f32.mrb[5].mxu1 }
 0x2ae   :  { %v313_v19 = vpop.f32.mrb[6].mxu1 }
 0x2af   :  { %v2188_v21 = vpop.f32.mrb[7].mxu1 }
 0x2b4   :  { %v572_v23 = vpop.f32.mrb[8].mxu1 }
 0x2b5   :  { %v573_v24 = vadd.f32 %v572_v23, %v533_v22  ;;  %v2195_v25 = vpop.f32.mrb[9].mxu1 }
 0x2b6   :  { %v575_v26 = vpop.f32.mrb[10].mxu1 }
 0x2b7   :  { %2448 = vtanh.f32 %v573_v24  ;;  %v2196_v27 = vpop.f32.mrb[11].mxu1 }
 0x2c1   :  { %v2449_v28 = vpop.eup %2448 }
 0x2c2   :  { %v579_v29 = vpack.c.bf16 %v2449_v28, %v2449_v28 }
 0x2c4   :  { %2202 = vmatmul.mubr.msk.bf16.vlgmr.msra.gmra.mrb[12].mxu1 %vm209_vm5, %v579_v29 }
 0x2c5   :  { %2359 = vmatpush3.bf16.msra.mxu1 %v2764_v13  ;;  %2213 = vmatprep.mubr.msk.f32.mxu1 %vm2547_vm2, %v2546_v0 }
 0x2c6   :  { %2360 = vmatprep.subr.bf16.mxu1 %v2549_v12 }
 0x2c9   :  { %2362 = vmatpush3.bf16.msra.mxu1 %v2775_v16 }
 0x2ca   :  { %2216 = vmatprep.subr.bf16.mxu1 %v2546_v0 }
 0x2cc   :  { %2214 = vmatmul.mubr.f32.vlgmr.msra.gmra.mrb[16].mxu1 %v2546_v0 }
 0x2cd   :  { %2220 = vmatprep.mubr.msk.bf16.mxu1 %vm2547_vm2, %v2546_v0 }
 0x397   :  { %v640_v31 = vpop.f32.mrb[12].mxu1 }
 0x398   :  { %v641_v32 = vadd.f32 %v2014_v30, %v640_v31  ;;  %v2203_v33 = vpop.f32.mrb[13].mxu1 }
 0x399   :  { %v643_v34 = vpop.f32.mrb[14].mxu1 }
 0x39a   :  { %v2204_v35 = vpop.f32.mrb[15].mxu1  ;;  %v655_v36 = vadd.f32 %v641_v32, %v310_v17  ;;  %v828_v37 = vrot.slane %v641_v32, 6  ;;  %v993_v38 = vrot.slane %v641_v32, 4  ;;  %v1159_v39 = vrot.slane %v641_v32, 2 }
 0x39b   :  { %v2795_v40 = vadd.f32 %v641_v32, %v313_v19 }
 0x39c   :  { %v830_v41 = vadd.f32 %v828_v37, %v310_v17  ;;  %v2797_v42 = vadd.f32 %v993_v38, %v310_v17  ;;  %v2799_v43 = vadd.f32 %v1159_v39, %v310_v17  ;;  %v2801_v44 = vadd.f32 %v828_v37, %v313_v19 }
 0x39d   :  { %v2803_v45 = vadd.f32 %v993_v38, %v313_v19  ;;  %v2805_v46 = vadd.f32 %v1159_v39, %v313_v19 }
 0x39f   :  { %v725_v47 = vpop.f32.mrb[16].mxu1 }
 0x3a0   :  { %v729_v48 = vadd.f32 %v725_v47, %v655_v36  ;;  %v2215_v49 = vpop.f32.mrb[17].mxu1 }
 0x3a2   :  { %2450 = vtanh.f32 %v729_v48  ;;  %v2018_v51 = vmul.f32 -1.442695, %v729_v48 }
 0x3a4   :  { %2452 = vpow2.f32 %v2018_v51 }
 0x3ac   :  { %v2451_v50 = vpop.eup %2450 }
 0x3ad   :  { %739 = vrot.lane.b32.xlu0 %v2451_v50, %s2550_s12 }
 0x3ae   :  { %v2453_v52 = vpop.eup %2452 }
 0x3af   :  { %v733_v53 = vadd.f32 1.0, %v2453_v52 }
 0x3b1   :  { %2454 = vrcp.f32 %v733_v53 }
 0x3bb   :  { %v2455_v54 = vpop.eup %2454 }
 0x3bc   :  { %v737_v57 = vmul.f32 0.0, %v2455_v54 }
 0x41f   :  { %v740_v55 = vpop.permute.xlu0 %739 }
 0x420   :  { %v742_v56 = vmul.f32 %v2455_v54, %v740_v55 }
 0x422   :  { %744 = vrot.lane.b32.xlu0 %v742_v56, %s2551_s29 }
 0x494   :  { %v745_v58 = vpop.permute.xlu0 %744 }
 0x495   :  { %v747_v59 = vadd.f32 %v745_v58, %v737_v57 }
 0x497   :  { %2456 = vtanh.f32 %v747_v59  ;;  %v918_v14 = vrot.slane %v747_v59, 6 }
 0x4a1   :  { %v2457_v60 = vpop.eup %2456 }
 0x4a2   :  { %750 = vrot.lane.b32.xlu1 %v2457_v60, %s2550_s12 }
 0x514   :  { %v751_v61 = vpop.permute.xlu1 %750 }
 0x515   :  { %v2810_v62 = vmul.f32 %v2455_v54, %v751_v61 }
 0x517   :  { %832 = vrot.lane.b32.xlu1 %v2810_v62, %s2551_s29 }
 0x589   :  { %v833_v63 = vpop.permute.xlu1 %832 }
 0x58a   :  { %2233 = vmatmul.mubr.msk.f32.vlgmr.msra.gmra.mrb[12].mxu0 %vm209_vm5, %v833_v63 }
 0x58b   :  { %2371 = vmatpush3.bf16.msra.mxu0 %v2764_v13  ;;  %2251 = vmatprep.mubr.msk.f32.mxu0 %vm2547_vm2, %v2546_v0 }
 0x58c   :  { %2372 = vmatprep.subr.bf16.mxu0 %v2549_v12 }
 0x58f   :  { %2374 = vmatpush3.bf16.msra.mxu0 %v2775_v16 }
 0x590   :  { %2375 = vmatprep.subr.bf16.mxu0 %v2549_v12 }
 0x65d   :  { %v902_v1 = vpop.f32.mrb[12].mxu0 }
 0x65e   :  { %v907_v2 = vrot.slane %v902_v1, 6  ;;  %v2234_v3 = vpop.f32.mrb[13].mxu0 }
 0x660   :  { %v909_v4 = vadd.f32 %v907_v2, %v830_v41 }
 0x662   :  { %2458 = vtanh.f32 %v909_v4  ;;  %v2025_v6 = vmul.f32 -1.442695, %v909_v4 }
 0x664   :  { %2460 = vpow2.f32 %v2025_v6 }
 0x66c   :  { %v2459_v5 = vpop.eup %2458 }
 0x66d   :  { %922 = vrot.lane.b32.xlu0 %v2459_v5, %s2550_s12 }
 0x66e   :  { %v2461_v7 = vpop.eup %2460 }
 0x66f   :  { %v913_v8 = vadd.f32 1.0, %v2461_v7 }
 0x671   :  { %2462 = vrcp.f32 %v913_v8 }
 0x67b   :  { %v2463_v9 = vpop.eup %2462 }
 0x67c   :  { %v920_v15 = vmul.f32 %v2463_v9, %v918_v14 }
 0x6df   :  { %v923_v10 = vpop.permute.xlu0 %922 }
 0x6e0   :  { %v925_v11 = vmul.f32 %v2463_v9, %v923_v10 }
 0x6e2   :  { %927 = vrot.lane.b32.xlu1 %v925_v11, %s2551_s29 }
 0x754   :  { %v928_v17 = vpop.permute.xlu1 %927 }
 0x755   :  { %v930_v18 = vadd.f32 %v928_v17, %v920_v15 }
 0x757   :  { %2464 = vtanh.f32 %v930_v18  ;;  %v1084_v35 = vrot.slane %v930_v18, 6 }
 0x761   :  { %v2465_v19 = vpop.eup %2464 }
 0x762   :  { %933 = vrot.lane.b32.xlu0 %v2465_v19, %s2550_s12 }
 0x7d4   :  { %v934_v20 = vpop.permute.xlu0 %933 }
 0x7d5   :  { %v2824_v21 = vmul.f32 %v2463_v9, %v934_v20 }
 0x7d7   :  { %v997_v22 = vrot.slane %v2824_v21, 2 }
 0x7d9   :  { %998 = vrot.lane.b32.xlu1 %v997_v22, %s2551_s29 }
 0x84b   :  { %v999_v23 = vpop.permute.xlu1 %998 }
 0x84c   :  { %2252 = vmatmul.mubr.msk.f32.vlgmr.msra.gmra.mrb[14].mxu0 %vm209_vm5, %v999_v23 }
 0x84d   :  { %2377 = vmatpush3.bf16.msra.mxu0 %v2764_v13  ;;  %2270 = vmatprep.mubr.msk.f32.mxu0 %vm2547_vm2, %v2546_v0 }
 0x84e   :  { %2378 = vmatprep.subr.bf16.mxu0 %v2549_v12 }
 0x851   :  { %2380 = vmatpush3.bf16.msra.mxu0 %v2775_v16 }
 0x852   :  { %2381 = vmatprep.subr.bf16.mxu0 %v2549_v12 }
 0x91f   :  { %v1068_v24 = vpop.f32.mrb[14].mxu0 }
 0x920   :  { %v1073_v25 = vrot.slane %v1068_v24, 4  ;;  %v2253_v26 = vpop.f32.mrb[15].mxu0 }
 0x922   :  { %v1075_v27 = vadd.f32 %v1073_v25, %v2797_v42 }
 0x924   :  { %2466 = vtanh.f32 %v1075_v27  ;;  %v2030_v29 = vmul.f32 -1.442695, %v1075_v27 }
 0x926   :  { %2468 = vpow2.f32 %v2030_v29 }
 0x92e   :  { %v2467_v28 = vpop.eup %2466 }
 0x92f   :  { %1088 = vrot.lane.b32.xlu0 %v2467_v28, %s2550_s12 }
 0x930   :  { %v2469_v30 = vpop.eup %2468 }
 0x931   :  { %v1079_v31 = vadd.f32 1.0, %v2469_v30 }
 0x933   :  { %2470 = vrcp.f32 %v1079_v31 }
 0x93d   :  { %v2471_v32 = vpop.eup %2470 }
 0x93e   :  { %v1086_v36 = vmul.f32 %v2471_v32, %v1084_v35 }
 0x9a1   :  { %v1089_v33 = vpop.permute.xlu0 %1088 }
 0x9a2   :  { %v1091_v34 = vmul.f32 %v2471_v32, %v1089_v33 }
 0x9a4   :  { %1093 = vrot.lane.b32.xlu1 %v1091_v34, %s2551_s29 }
 0xa16   :  { %v1094_v37 = vpop.permute.xlu1 %1093 }
 0xa17   :  { %v1096_v38 = vadd.f32 %v1094_v37, %v1086_v36 }
 0xa19   :  { %2472 = vtanh.f32 %v1096_v38  ;;  %v1250_v60 = vrot.slane %v1096_v38, 6 }
 0xa23   :  { %v2473_v39 = vpop.eup %2472 }
 0xa24   :  { %1099 = vrot.lane.b32.xlu0 %v2473_v39, %s2550_s12 }
 0xa96   :  { %v1100_v41 = vpop.permute.xlu0 %1099 }
 0xa97   :  { %v2839_v42 = vmul.f32 %v2471_v32, %v1100_v41 }
 0xa99   :  { %v1163_v47 = vrot.slane %v2839_v42, 4 }
 0xa9b   :  { %1164 = vrot.lane.b32.xlu1 %v1163_v47, %s2551_s29 }
 0xb0d   :  { %v1165_v48 = vpop.permute.xlu1 %1164 }
 0xb0e   :  { %2271 = vmatmul.mubr.msk.f32.vlgmr.msra.gmra.mrb[16].mxu0 %vm209_vm5, %v1165_v48 }
 0xb0f   :  { %2383 = vmatpush3.bf16.msra.mxu0 %v2764_v13  ;;  %2289 = vmatprep.mubr.msk.f32.mxu0 %vm2547_vm2, %v2546_v0 }
 0xb10   :  { %2384 = vmatprep.subr.bf16.mxu0 %v2549_v12 }
 0xb13   :  { %2386 = vmatpush3.bf16.msra.mxu0 %v2775_v16 }
 0xb14   :  { %2387 = vmatprep.subr.bf16.mxu0 %v2549_v12 }
 0xbe1   :  { %v1234_v49 = vpop.f32.mrb[16].mxu0 }
 0xbe2   :  { %v1239_v50 = vrot.slane %v1234_v49, 2  ;;  %v2272_v51 = vpop.f32.mrb[17].mxu0 }
 0xbe4   :  { %v1241_v52 = vadd.f32 %v1239_v50, %v2799_v43 }
 0xbe6   :  { %2474 = vtanh.f32 %v1241_v52  ;;  %v2035_v54 = vmul.f32 -1.442695, %v1241_v52 }
 0xbe8   :  { %2476 = vpow2.f32 %v2035_v54 }
 0xbf0   :  { %v2475_v53 = vpop.eup %2474 }
 0xbf1   :  { %1254 = vrot.lane.b32.xlu0 %v2475_v53, %s2550_s12 }
 0xbf2   :  { %v2477_v55 = vpop.eup %2476 }
 0xbf3   :  { %v1245_v56 = vadd.f32 1.0, %v2477_v55 }
 0xbf5   :  { %2478 = vrcp.f32 %v1245_v56 }
 0xbff   :  { %v2479_v57 = vpop.eup %2478 }
 0xc00   :  { %v1252_v61 = vmul.f32 %v2479_v57, %v1250_v60 }
 0xc63   :  { %v1255_v58 = vpop.permute.xlu0 %1254 }
 0xc64   :  { %v1257_v59 = vmul.f32 %v2479_v57, %v1255_v58 }
 0xc66   :  { %1259 = vrot.lane.b32.xlu1 %v1257_v59, %s2551_s29 }
 0xcd8   :  { %v1260_v63 = vpop.permute.xlu1 %1259 }
 0xcd9   :  { %v1262_v1 = vadd.f32 %v1260_v63, %v1252_v61 }
 0xcdb   :  { %2480 = vtanh.f32 %v1262_v1  ;;  %v1411_v19 = vrot.slane %v1262_v1, 6 }
 0xce5   :  { %v2481_v43 = vpop.eup %2480 }
 0xce6   :  { %1265 = vrot.lane.b32.xlu0 %v2481_v43, %s2550_s12 }
 0xd58   :  { %v1266_v2 = vpop.permute.xlu0 %1265 }
 0xd59   :  { %v2854_v3 = vmul.f32 %v2479_v57, %v1266_v2 }
 0xd5b   :  { %v1327_v4 = vrot.slane %v2854_v3, 6 }
 0xd5d   :  { %1328 = vrot.lane.b32.xlu1 %v1327_v4, %s2551_s29 }
 0xdcf   :  { %v1329_v5 = vpop.permute.xlu1 %1328 }
 0xdd0   :  { %2290 = vmatmul.mubr.msk.f32.vlgmr.msra.gmra.mrb[18].mxu0 %vm209_vm5, %v1329_v5 }
 0xdd1   :  { %2389 = vmatpush3.bf16.msra.mxu0 %v2764_v13  ;;  %2308 = vmatprep.mubr.msk.f32.mxu0 %vm2547_vm2, %v2546_v0 }
 0xdd2   :  { %2390 = vmatprep.subr.bf16.mxu0 %v2549_v12 }
 0xdd5   :  { %2392 = vmatpush3.bf16.msra.mxu0 %v2775_v16 }
 0xdd6   :  { %2393 = vmatprep.subr.bf16.mxu0 %v2549_v12 }
 0xea3   :  { %v1398_v6 = vpop.f32.mrb[18].mxu0 }
 0xea4   :  { %v1402_v7 = vadd.f32 %v1398_v6, %v2795_v40  ;;  %v2291_v8 = vpop.f32.mrb[19].mxu0 }
 0xea6   :  { %2482 = vtanh.f32 %v1402_v7  ;;  %v2040_v10 = vmul.f32 -1.442695, %v1402_v7 }
 0xea8   :  { %2484 = vpow2.f32 %v2040_v10 }
 0xeb0   :  { %v2483_v9 = vpop.eup %2482 }
 0xeb1   :  { %1415 = vrot.lane.b32.xlu0 %v2483_v9, %s2550_s12 }
 0xeb2   :  { %v2485_v11 = vpop.eup %2484 }
 0xeb3   :  { %v1406_v14 = vadd.f32 1.0, %v2485_v11  ;;  %v2905_v11 = vld [vmem:[%s3046_s14] sm:$0xff]  }
 0xeb4   :  { %2217 = vmatpush3.bf16.msra.mxu1 %v2905_v11 }
 0xeb5   :  { %2486 = vrcp.f32 %v1406_v14  ;;  %2218 = vmatprep.subr.bf16.mxu1 %v2546_v0 }
 0xebf   :  { %v2487_v15 = vpop.eup %2486 }
 0xec0   :  { %v1413_v20 = vmul.f32 %v2487_v15, %v1411_v19 }
 0xf23   :  { %v1416_v17 = vpop.permute.xlu0 %1415 }
 0xf24   :  { %v1418_v18 = vmul.f32 %v2487_v15, %v1416_v17 }
 0xf26   :  { %1420 = vrot.lane.b32.xlu1 %v1418_v18, %s2551_s29 }
 0xf98   :  { %v1421_v22 = vpop.permute.xlu1 %1420 }
 0xf99   :  { %v1423_v23 = vadd.f32 %v1421_v22, %v1413_v20  ;;  %v754_v22 = vpack.c.bf16 %v2810_v62, %v2810_v62 }
 0xf9b   :  { %2488 = vtanh.f32 %v1423_v23  ;;  %v1573_v38 = vrot.slane %v1423_v23, 6  ;;  %v1103_v23 = vpack.c.bf16 %v2839_v42, %v2839_v42 }
 0xfa5   :  { %v2489_v40 = vpop.eup %2488 }
 0xfa6   :  { %1426 = vrot.lane.b32.xlu0 %v2489_v40, %s2550_s12  ;;  %v1105_v40 = vrot.slane %v1103_v23, 2 }
0x1018   :  { %v1427_v24 = vpop.permute.xlu0 %1426 }
0x1019   :  { %v2869_v25 = vmul.f32 %v2487_v15, %v1427_v24 }
0x101b   :  { %1487 = vrot.lane.b32.xlu1 %v2869_v25, %s2551_s29  ;;  %v1430_v24 = vpack.c.bf16 %v2869_v25, %v2869_v25  ;;  %v937_v25 = vpack.c.bf16 %v2824_v21, %v2824_v21 }
0x108d   :  { %v1488_v26 = vpop.permute.xlu1 %1487 }
0x108e   :  { %2309 = vmatmul.mubr.msk.f32.vlgmr.msra.gmra.mrb[20].mxu0 %vm209_vm5, %v1488_v26 }
0x108f   :  { %2395 = vmatpush3.bf16.msra.mxu0 %v2764_v13  ;;  %2327 = vmatprep.mubr.msk.f32.mxu0 %vm2547_vm2, %v2546_v0 }
0x1090   :  { %2396 = vmatprep.subr.bf16.mxu0 %v2549_v12 }
0x1093   :  { %2398 = vmatpush3.bf16.msra.mxu0 %v2775_v16 }
0x1094   :  { %2399 = vmatprep.subr.bf16.mxu0 %v2549_v12 }
0x1161   :  { %v1557_v27 = vpop.f32.mrb[20].mxu0 }
0x1162   :  { %v1562_v28 = vrot.slane %v1557_v27, 6  ;;  %v2310_v29 = vpop.f32.mrb[21].mxu0 }
0x1164   :  { %v1564_v30 = vadd.f32 %v1562_v28, %v2801_v44 }
0x1166   :  { %2490 = vtanh.f32 %v1564_v30  ;;  %v2045_v32 = vmul.f32 -1.442695, %v1564_v30 }
0x1168   :  { %2492 = vpow2.f32 %v2045_v32  ;;  %v939_v32 = vrot.slane %v937_v25, 1 }
0x1170   :  { %v2491_v31 = vpop.eup %2490 }
0x1171   :  { %1577 = vrot.lane.b32.xlu0 %v2491_v31, %s2550_s12 }
0x1172   :  { %v2493_v33 = vpop.eup %2492 }
0x1173   :  { %v1568_v34 = vadd.f32 1.0, %v2493_v33  ;;  %v1269_v33 = vpack.c.bf16 %v2854_v3, %v2854_v3 }
0x1175   :  { %2494 = vrcp.f32 %v1568_v34  ;;  %v1271_v34 = vrot.slane %v1269_v33, 3 }
0x117f   :  { %v2495_v35 = vpop.eup %2494 }
0x1180   :  { %v1575_v39 = vmul.f32 %v2495_v35, %v1573_v38 }
0x11e3   :  { %v1578_v36 = vpop.permute.xlu0 %1577 }
0x11e4   :  { %v1580_v37 = vmul.f32 %v2495_v35, %v1578_v36 }
0x11e6   :  { %1582 = vrot.lane.b32.xlu1 %v1580_v37, %s2551_s29 }
0x1258   :  { %v1583_v41 = vpop.permute.xlu1 %1582 }
0x1259   :  { %v1585_v47 = vadd.f32 %v1583_v41, %v1575_v39 }
0x125b   :  { %2496 = vtanh.f32 %v1585_v47 }
0x1265   :  { %v2497_v44 = vpop.eup %2496 }
0x1266   :  { %1588 = vrot.lane.b32.xlu0 %v2497_v44, %s2550_s12 }
0x12d8   :  { %v1589_v48 = vpop.permute.xlu0 %1588 }
0x12d9   :  { %v2884_v49 = vmul.f32 %v2495_v35, %v1589_v48 }
0x12db   :  { %v1650_v50 = vrot.slane %v2884_v49, 2  ;;  %v1592_v35 = vpack.c.bf16 %v2884_v49, %v2884_v49 }
0x12dd   :  { %1651 = vrot.lane.b32.xlu1 %v1650_v50, %s2551_s29  ;;  %v1594_v36 = vrot.slane %v1592_v35, 1  ;;  %v2989_v50 = vld [vmem:[%s3047_s15] ss:$0 sm:$0xff] }
0x134f   :  { %v1652_v51 = vpop.permute.xlu1 %1651 }
0x1350   :  { %2328 = vmatmul.mubr.msk.f32.vlgmr.msra.gmra.mrb[22].mxu0 %vm209_vm5, %v1652_v51 }
0x1351   :  { %2401 = vmatpush3.bf16.msra.mxu0 %v2764_v13  ;;  %2346 = vmatprep.mubr.msk.f32.mxu0 %vm2547_vm2, %v2546_v0 }
0x1352   :  { %2402 = vmatprep.subr.bf16.mxu0 %v2549_v12  ;;  %v1737_v12 = vrot.slane %v1585_v47, 6 }
0x1355   :  { %2404 = vmatpush3.bf16.msra.mxu0 %v2775_v16 }
0x1423   :  { %v1721_v52 = vpop.f32.mrb[22].mxu0 }
0x1424   :  { %v1726_v53 = vrot.slane %v1721_v52, 4  ;;  %v2329_v54 = vpop.f32.mrb[23].mxu0 }
0x1426   :  { %v1728_v55 = vadd.f32 %v1726_v53, %v2803_v45 }
0x1428   :  { %2498 = vtanh.f32 %v1728_v55  ;;  %v2050_v57 = vmul.f32 -1.442695, %v1728_v55 }
0x142a   :  { %2500 = vpow2.f32 %v2050_v57 }
0x1432   :  { %v2499_v56 = vpop.eup %2498 }
0x1433   :  { %1741 = vrot.lane.b32.xlu0 %v2499_v56, %s2550_s12 }
0x1434   :  { %v2501_v58 = vpop.eup %2500 }
0x1435   :  { %v1732_v13 = vadd.f32 1.0, %v2501_v58 }
0x1437   :  { %2502 = vrcp.f32 %v1732_v13 }
0x1441   :  { %v2503_v59 = vpop.eup %2502 }
0x1442   :  { %v1739_v16 = vmul.f32 %v2503_v59, %v1737_v12 }
0x14a5   :  { %v1742_v60 = vpop.permute.xlu0 %1741 }
0x14a6   :  { %v1744_v61 = vmul.f32 %v2503_v59, %v1742_v60 }
0x14a8   :  { %1746 = vrot.lane.b32.xlu1 %v1744_v61, %s2551_s29 }
0x151a   :  { %v1747_v63 = vpop.permute.xlu1 %1746 }
0x151b   :  { %v1749_v1 = vadd.f32 %v1747_v63, %v1739_v16 }
0x151d   :  { %2504 = vtanh.f32 %v1749_v1  ;;  %v1901_v28 = vrot.slane %v1749_v1, 6 }
0x1527   :  { %v2505_v45 = vpop.eup %2504 }
0x1528   :  { %1752 = vrot.lane.b32.xlu0 %v2505_v45, %s2550_s12 }
0x159a   :  { %v1753_v43 = vpop.permute.xlu0 %1752 }
0x159b   :  { %v1755_v2 = vmul.f32 %v2503_v59, %v1753_v43 }
0x159d   :  { %v1814_v4 = vrot.slane %v1755_v2, 4  ;;  %v1756_v26 = vpack.c.bf16 %v1755_v2, %v1755_v2 }
0x159f   :  { %1815 = vrot.lane.b32.xlu1 %v1814_v4, %s2551_s29  ;;  %v1758_v27 = vrot.slane %v1756_v26, 2 }
0x1611   :  { %v1816_v5 = vpop.permute.xlu1 %1815 }
0x1612   :  { %2347 = vmatmul.mubr.msk.f32.vlgmr.msra.gmra.mrb[24].mxu0 %vm209_vm5, %v1816_v5 }
0x16e5   :  { %v1885_v6 = vpop.f32.mrb[24].mxu0 }
0x16e6   :  { %v1890_v7 = vrot.slane %v1885_v6, 2  ;;  %v2348_v8 = vpop.f32.mrb[25].mxu0 }
0x16e8   :  { %v1892_v9 = vadd.f32 %v1890_v7, %v2805_v46  ;;  %v2912_v46 = vld [vmem:[%s3046_s14 + $0x8] sm:$0xff]  }
0x16e9   :  { %2219 = vmatpush3.bf16.msra.mxu1 %v2912_v46 }
0x16ea   :  { %2506 = vtanh.f32 %v1892_v9  ;;  %v2055_v14 = vmul.f32 -1.442695, %v1892_v9  ;;  %2235 = vmatprep.subr.bf16.mxu1 %v2546_v0 }
0x16ec   :  { %2508 = vpow2.f32 %v2055_v14 }
0x16f4   :  { %v2507_v10 = vpop.eup %2506 }
0x16f5   :  { %1905 = vrot.lane.b32.xlu0 %v2507_v10, %s2550_s12 }
0x16f6   :  { %v2509_v15 = vpop.eup %2508 }
0x16f7   :  { %v1896_v17 = vadd.f32 1.0, %v2509_v15 }
0x16f9   :  { %2510 = vrcp.f32 %v1896_v17 }
0x1703   :  { %v2511_v18 = vpop.eup %2510 }
0x1704   :  { %v1903_v29 = vmul.f32 %v2511_v18, %v1901_v28 }
0x1767   :  { %v1906_v19 = vpop.permute.xlu0 %1905 }
0x1768   :  { %v1908_v20 = vmul.f32 %v2511_v18, %v1906_v19 }
0x176a   :  { %1910 = vrot.lane.b32.xlu1 %v1908_v20, %s2551_s29 }
0x176e   :  { %762 = vrot.lane.b32.xlu1 %v754_v22, %s2551_s29 }
0x1772   :  { %1106 = vrot.lane.b32.xlu1 %v1105_v40, %s2551_s29 }
0x1776   :  { %1432 = vrot.lane.b32.xlu1 %v1430_v24, %s2551_s29 }
0x177a   :  { %1759 = vrot.lane.b32.xlu1 %v1758_v27, %s2551_s29 }
0x17dc   :  { %v1911_v62 = vpop.permute.xlu1 %1910 }
0x17dd   :  { %v1913_v30 = vadd.f32 %v1911_v62, %v1903_v29 }
0x17df   :  { %2512 = vtanh.f32 %v1913_v30 }
0x17e0   :  { %v763_v42 = vpop.permute.xlu1 %762 }
0x17e1   :  { %2221 = vmatmul.mubr.msk.bf16.vlgmr.msra.gmra.mrb[20].mxu1 %vm209_vm5, %v763_v42 }
0x17e2   :  { %2236 = vmatpush3.bf16.msra.mxu1 %v2905_v11  ;;  %2239 = vmatprep.mubr.msk.bf16.mxu1 %vm2547_vm2, %v2546_v0 }
0x17e3   :  { %2237 = vmatprep.subr.bf16.mxu1 %v2546_v0 }
0x17e4   :  { %v1107_v3 = vpop.permute.xlu1 %1106 }
0x17e6   :  { %2238 = vmatpush3.bf16.msra.mxu1 %v2912_v46 }
0x17e7   :  { %2254 = vmatprep.subr.bf16.mxu1 %v2546_v0 }
0x17e8   :  { %v1433_v44 = vpop.permute.xlu1 %1432 }
0x17e9   :  { %v2513_v31 = vpop.eup %2512 }
0x17ea   :  { %1916 = vrot.lane.b32.xlu0 %v2513_v31, %s2550_s12 }
0x17ec   :  { %v1760_v49 = vpop.permute.xlu1 %1759 }
0x17ee   :  { %940 = vrot.lane.b32.xlu0 %v939_v32, %s2551_s29 }
0x17f2   :  { %1272 = vrot.lane.b32.xlu0 %v1271_v34, %s2551_s29 }
0x17f6   :  { %1595 = vrot.lane.b32.xlu0 %v1594_v36, %s2551_s29 }
0x185c   :  { %v1917_v37 = vpop.permute.xlu0 %1916 }
0x185d   :  { %v1919_v21 = vmul.f32 %v2511_v18, %v1917_v37 }
0x185f   :  { %v1920_v38 = vpack.c.bf16 %v1919_v21, %v1919_v21 }
0x1860   :  { %v941_v39 = vpop.permute.xlu0 %940 }
0x1861   :  { %v1922_v41 = vrot.slane %v1920_v38, 3  ;;  %2240 = vmatmul.mubr.msk.bf16.vlgmr.msra.gmra.mrb[24].mxu1 %vm209_vm5, %v941_v39 }
0x1862   :  { %2255 = vmatpush3.bf16.msra.mxu1 %v2905_v11  ;;  %2258 = vmatprep.mubr.msk.bf16.mxu1 %vm2547_vm2, %v2546_v0 }
0x1863   :  { %1923 = vrot.lane.b32.xlu0 %v1922_v41, %s2551_s29  ;;  %2256 = vmatprep.subr.bf16.mxu1 %v2546_v0 }
0x1864   :  { %v1273_v47 = vpop.permute.xlu0 %1272 }
0x1866   :  { %2257 = vmatpush3.bf16.msra.mxu1 %v2912_v46 }
0x1867   :  { %2273 = vmatprep.subr.bf16.mxu1 %v2546_v0 }
0x1868   :  { %v1596_v48 = vpop.permute.xlu0 %1595 }
0x1869   :  { %2259 = vmatmul.mubr.msk.bf16.vlgmr.msra.gmra.mrb[28].mxu1 %vm209_vm5, %v1107_v3 }
0x186a   :  { %2274 = vmatpush3.bf16.msra.mxu1 %v2905_v11  ;;  %2277 = vmatprep.mubr.msk.bf16.mxu1 %vm2547_vm2, %v2546_v0 }
0x186b   :  { %2275 = vmatprep.subr.bf16.mxu1 %v2546_v0 }
0x186e   :  { %2276 = vmatpush3.bf16.msra.mxu1 %v2912_v46 }
0x186f   :  { %2292 = vmatprep.subr.bf16.mxu1 %v2546_v0 }
0x1871   :  { %2278 = vmatmul.mubr.msk.bf16.vlgmr.msra.gmra.mrb[32].mxu1 %vm209_vm5, %v1273_v47 }
0x1872   :  { %2293 = vmatpush3.bf16.msra.mxu1 %v2905_v11  ;;  %2296 = vmatprep.mubr.msk.bf16.mxu1 %vm2547_vm2, %v2546_v0 }
0x1873   :  { %2294 = vmatprep.subr.bf16.mxu1 %v2546_v0 }
0x1876   :  { %2295 = vmatpush3.bf16.msra.mxu1 %v2912_v46 }
0x1877   :  { %2311 = vmatprep.subr.bf16.mxu1 %v2546_v0 }
0x1879   :  { %2297 = vmatmul.mubr.msk.bf16.vlgmr.msra.gmra.mrb[36].mxu1 %vm209_vm5, %v1433_v44 }
0x187a   :  { %2312 = vmatpush3.bf16.msra.mxu1 %v2905_v11  ;;  %2315 = vmatprep.mubr.msk.bf16.mxu1 %vm2547_vm2, %v2546_v0 }
0x187b   :  { %2313 = vmatprep.subr.bf16.mxu1 %v2546_v0 }
0x187e   :  { %2314 = vmatpush3.bf16.msra.mxu1 %v2912_v46 }
0x187f   :  { %2330 = vmatprep.subr.bf16.mxu1 %v2546_v0 }
0x1881   :  { %2316 = vmatmul.mubr.msk.bf16.vlgmr.msra.gmra.mrb[40].mxu1 %vm209_vm5, %v1596_v48 }
0x1882   :  { %2331 = vmatpush3.bf16.msra.mxu1 %v2905_v11  ;;  %2334 = vmatprep.mubr.msk.bf16.mxu1 %vm2547_vm2, %v2546_v0 }
0x1883   :  { %2332 = vmatprep.subr.bf16.mxu1 %v2546_v0 }
0x1886   :  { %2333 = vmatpush3.bf16.msra.mxu1 %v2912_v46 }
0x1887   :  { %2349 = vmatprep.subr.bf16.mxu1 %v2546_v0 }
0x1889   :  { %2335 = vmatmul.mubr.msk.bf16.vlgmr.msra.gmra.mrb[44].mxu1 %vm209_vm5, %v1760_v49 }
0x188a   :  { %2350 = vmatpush3.bf16.msra.mxu1 %v2905_v11  ;;  %2353 = vmatprep.mubr.msk.bf16.mxu1 %vm2547_vm2, %v2546_v0 }
0x188b   :  { %2351 = vmatprep.subr.bf16.mxu1 %v2546_v0 }
0x188e   :  { %2352 = vmatpush3.bf16.msra.mxu1 %v2912_v46 }
0x18b4   :  { %v813_v51 = vpop.f32.mrb[20].mxu1 }
0x18b5   :  { %v814_v52 = vadd.f32 %v2989_v50, %v813_v51  ;;  %v2222_v53 = vpop.f32.mrb[21].mxu1 }
0x18b6   :  { %v816_v54 = vpop.f32.mrb[22].mxu1 }
0x18b7   :  { %v2023_v55 = vmul.f32 -1.442695, %v814_v52  ;;  %v2223_v56 = vpop.f32.mrb[23].mxu1 }
0x18b9   :  { %2514 = vpow2.f32 %v2023_v55 }
0x18c3   :  { %v2515_v57 = vpop.eup %2514 }
0x18c4   :  { %v822_v58 = vadd.f32 1.0, %v2515_v57 }
0x18c6   :  { %2516 = vrcp.f32 %v822_v58 }
0x18d0   :  { %v2517_v0 = vpop.eup %2516 }
0x18d1   :  { %826 = vst.msk [vmem:[%s3048_s16] sm:$0x3] %vm825_vm6, %v2517_v0 }
0x18d5   :  { %v1924_v13 = vpop.permute.xlu0 %1923 }
0x18d6   :  { %2354 = vmatmul.mubr.msk.bf16.vlgmr.msra.gmra.mrb[48].mxu1 %vm209_vm5, %v1924_v13 }
0x1934   :  { %v979_v59 = vpop.f32.mrb[24].mxu1 }
0x1935   :  { %v980_v60 = vadd.f32 %v2989_v50, %v979_v59  ;;  %v2241_v61 = vpop.f32.mrb[25].mxu1 }
0x1936   :  { %v982_v12 = vpop.f32.mrb[26].mxu1 }
0x1937   :  { %v2027_v16 = vmul.f32 -1.442695, %v980_v60  ;;  %v2242_v63 = vpop.f32.mrb[27].mxu1 }
0x1939   :  { %2518 = vpow2.f32 %v2027_v16 }
0x193c   :  { %v1145_v1 = vpop.f32.mrb[28].mxu1 }
0x193d   :  { %v1146_v45 = vadd.f32 %v2989_v50, %v1145_v1  ;;  %v2260_v43 = vpop.f32.mrb[29].mxu1 }
0x193e   :  { %v1148_v2 = vpop.f32.mrb[30].mxu1 }
0x193f   :  { %v2032_v4 = vmul.f32 -1.442695, %v1146_v45  ;;  %v2261_v5 = vpop.f32.mrb[31].mxu1 }
0x1941   :  { %2520 = vpow2.f32 %v2032_v4 }
0x1943   :  { %v2519_v6 = vpop.eup %2518 }
0x1944   :  { %v988_v7 = vadd.f32 1.0, %v2519_v6  ;;  %v1311_v8 = vpop.f32.mrb[32].mxu1 }
0x1945   :  { %v1312_v9 = vadd.f32 %v2989_v50, %v1311_v8  ;;  %v2279_v10 = vpop.f32.mrb[33].mxu1 }
0x1946   :  { %2522 = vrcp.f32 %v988_v7  ;;  %v1314_v11 = vpop.f32.mrb[34].mxu1 }
0x1947   :  { %v2037_v14 = vmul.f32 -1.442695, %v1312_v9  ;;  %v2280_v15 = vpop.f32.mrb[35].mxu1 }
0x1949   :  { %2524 = vpow2.f32 %v2037_v14 }
0x194b   :  { %v2521_v17 = vpop.eup %2520 }
0x194c   :  { %v1154_v46 = vadd.f32 1.0, %v2521_v17  ;;  %v1471_v18 = vpop.f32.mrb[36].mxu1 }
0x194d   :  { %v1472_v19 = vadd.f32 %v2989_v50, %v1471_v18  ;;  %v2298_v20 = vpop.f32.mrb[37].mxu1 }
0x194e   :  { %2526 = vrcp.f32 %v1154_v46  ;;  %v1474_v22 = vpop.f32.mrb[38].mxu1 }
0x194f   :  { %v2042_v23 = vmul.f32 -1.442695, %v1472_v19  ;;  %v2299_v40 = vpop.f32.mrb[39].mxu1 }
0x1950   :  { %v2523_v24 = vpop.eup %2522 }
0x1951   :  { %2028 = vst.msk [vmem:[%s3048_s16 + $0x2] sm:$0x3] %vm825_vm6, %v2523_v24  ;;  %2528 = vpow2.f32 %v2042_v23 }
0x1953   :  { %v2525_v26 = vpop.eup %2524 }
0x1954   :  { %v1320_v27 = vadd.f32 1.0, %v2525_v26  ;;  %v1634_v28 = vpop.f32.mrb[40].mxu1 }
0x1955   :  { %v1635_v29 = vadd.f32 %v2989_v50, %v1634_v28  ;;  %v2317_v62 = vpop.f32.mrb[41].mxu1 }
0x1956   :  { %2530 = vrcp.f32 %v1320_v27  ;;  %v1637_v30 = vpop.f32.mrb[42].mxu1 }
0x1957   :  { %v2047_v42 = vmul.f32 -1.442695, %v1635_v29  ;;  %v2318_v25 = vpop.f32.mrb[43].mxu1 }
0x1958   :  { %v2527_v31 = vpop.eup %2526 }
0x1959   :  { %2033 = vst.msk [vmem:[%s3048_s16 + $0x4] sm:$0x3] %vm825_vm6, %v2527_v31  ;;  %2532 = vpow2.f32 %v2047_v42 }
0x195b   :  { %v2529_v32 = vpop.eup %2528 }
0x195c   :  { %v1480_v33 = vadd.f32 1.0, %v2529_v32  ;;  %v1798_v34 = vpop.f32.mrb[44].mxu1 }
0x195d   :  { %v1799_v35 = vadd.f32 %v2989_v50, %v1798_v34  ;;  %v2336_v36 = vpop.f32.mrb[45].mxu1 }
0x195e   :  { %2534 = vrcp.f32 %v1480_v33  ;;  %v1801_v37 = vpop.f32.mrb[46].mxu1 }
0x195f   :  { %v2052_v21 = vmul.f32 -1.442695, %v1799_v35  ;;  %v2337_v38 = vpop.f32.mrb[47].mxu1 }
0x1960   :  { %v2531_v39 = vpop.eup %2530 }
0x1961   :  { %2038 = vst.msk [vmem:[%s3048_s16 + $0x6] sm:$0x3] %vm825_vm6, %v2531_v39  ;;  %2536 = vpow2.f32 %v2052_v21 }
0x1963   :  { %v2533_v41 = vpop.eup %2532 }
0x1964   :  { %v1643_v3 = vadd.f32 1.0, %v2533_v41 }
0x1966   :  { %2538 = vrcp.f32 %v1643_v3 }
0x1968   :  { %v2535_v47 = vpop.eup %2534 }
0x1969   :  { %2043 = vst.msk [vmem:[%s3048_s16 + $0x8] sm:$0x3] %vm825_vm6, %v2535_v47 }
0x196b   :  { %v2537_v44 = vpop.eup %2536 }
0x196c   :  { %v1807_v48 = vadd.f32 1.0, %v2537_v44 }
0x196e   :  { %2540 = vrcp.f32 %v1807_v48 }
0x1970   :  { %v2539_v49 = vpop.eup %2538 }
0x1971   :  { %2048 = vst.msk [vmem:[%s3048_s16 + $0xa] sm:$0x3] %vm825_vm6, %v2539_v49 }
0x1978   :  { %v2541_v51 = vpop.eup %2540 }
0x1979   :  { %2053 = vst.msk [vmem:[%s3048_s16 + $0xc] sm:$0x3] %vm825_vm6, %v2541_v51 }
0x19a9   :  { %v1962_v52 = vpop.f32.mrb[48].mxu1 }
0x19aa   :  { %v1963_v53 = vadd.f32 %v2989_v50, %v1962_v52  ;;  %v2355_v54 = vpop.f32.mrb[49].mxu1 }
0x19ab   :  { %v1965_v55 = vpop.f32.mrb[50].mxu1 }
0x19ac   :  { %v2057_v56 = vmul.f32 -1.442695, %v1963_v53  ;;  %v2356_v57 = vpop.f32.mrb[51].mxu1 }
0x19ae   :  { %2542 = vpow2.f32 %v2057_v56 }
0x19b8   :  { %v2543_v58 = vpop.eup %2542 }
0x19b9   :  { %v1971_v0 = vadd.f32 1.0, %v2543_v58 }
0x19bb   :  { %2544 = vrcp.f32 %v1971_v0 }
0x19c5   :  { %v2545_v13 = vpop.eup %2544 }
0x19c6   :  { %2058 = vst.msk [vmem:[%s3048_s16 + $0xe] sm:$0x3] %vm825_vm6, %v2545_v13 }

// kernel: seq_cvae_forward.6
= control target key start
LH: loop header
LB: loop body
LE: loop exit
PB: predicated region body
PF: predicated region fallthrough
CT: control target
= control target key end

     0   :  { %vm135_vm0 = vcmask 1042432   ;;  %vm81_vm1 = vcmask 1044480   ;;  %v2659_v0 = vmov 0.0   ;;  %vm2660_vm2 = vmmov 0   ;;  %s3307_s6 = inlined_call_operand.vmem [shape: bf16[6,32], index: 6, kind: input, shape index: {}]   ;;  %s3308_s7 = inlined_call_operand.vmem [shape: bf16[10,32], index: 7, kind: input, shape index: {}]   ;;  %s3309_s0 = inlined_call_operand.vmem [shape: bf16[16,6], index: 0, kind: input, shape index: {}]   ;;  %s3310_s1 = inlined_call_operand.vmem [shape: bf16[16,10], index: 1, kind: input, shape index: {}]   ;;  %s3311_s9 = inlined_call_operand.vmem [shape: bf16[32,32], index: 9, kind: input, shape index: {}]   ;;  %s3312_s4 = inlined_call_operand.vmem [shape: bf16[288,32], index: 4, kind: input, shape index: {}]   ;;  %s3313_s8 = inlined_call_operand.vmem [shape: f32[1,32], index: 8, kind: input, shape index: {}]   ;;  %s3314_s11 = inlined_call_operand.vmem [shape: bf16[32,128], index: 11, kind: input, shape index: {}]   ;;  %s3315_s3 = inlined_call_operand.vmem [shape: bf16[2,288], index: 3, kind: input, shape index: {}]   ;;  %s3316_s10 = inlined_call_operand.vmem [shape: f32[1,32], index: 10, kind: input, shape index: {}]   ;;  %s3317_s12 = inlined_call_operand.vmem [shape: bf16[32,128], index: 12, kind: input, shape index: {}]   ;;  %s3318_s14 = inlined_call_operand.vmem [shape: f32[32,128], index: 14, kind: input, shape index: {}]   ;;  %s3319_s5 = inlined_call_operand.vmem [shape: f32[1,32], index: 5, kind: input, shape index: {}]   ;;  %s3320_s13 = inlined_call_operand.vmem [shape: f32[1,128], index: 13, kind: input, shape index: {}]   ;;  %s3321_s15 = inlined_call_operand.vmem [shape: bf16[32,16], index: 15, kind: input, shape index: {}]   ;;  %s3322_s16 = inlined_call_operand.vmem [shape: f32[1,16], index: 16, kind: input, shape index: {}]   ;;  %s3323_s17 = inlined_call_operand.vmem [shape: f32[8,2,8], index: 17, kind: output, shape index: {0}]   ;;  %s3324_s2 = inlined_call_operand.vmem [shape: f32[8,2,8], index: 2, kind: input, shape index: {}]   ;;  %s3325_s19 = inlined_call_operand.vmem [shape: f32[8,2,8], index: 19, kind: output, shape index: {2}]   ;;  %s3326_s18 = inlined_call_operand.vmem [shape: f32[8,2,8], index: 18, kind: output, shape index: {1}]  }
   0x1   :  { %3327 = sst [smem:[#allocation2_spill]] %s3307_s6  ;;  %2295 = vmatprep.subr.bf16.mxu1 %v2659_v0  ;;  %2289 = vmatprep.subr.bf16.mxu0 %v2659_v0  ;;  %vm131_vm3 = vcmask 48128   ;;  %vm77_vm4 = vcmask 80896   ;;  %v2543_v7 = vld [vmem:[%s3311_s9] sm:$0xff]   ;;  %v2544_v8 = vld [vmem:[%s3311_s9 + $0x8] sm:$0xff]   ;;  %vm215_vm5 = vcmask 261120   ;;  %v379_v38 = vlaneseq }
   0x2   :  { %3328 = sst [smem:[#allocation3_spill]] %s3308_s7  ;;  %s3331_s20 = sld [smem:[#allocation2_spill]]  ;;  %2297 = vmatprep.mubr.msk.bf16.mxu1 %vm2660_vm2, %v2659_v0  ;;  %2291 = vmatprep.mubr.msk.bf16.mxu0 %vm2660_vm2, %v2659_v0  ;;  %v2545_v9 = vld [vmem:[%s3312_s4 + $0x40] sm:$0xff]   ;;  %v2547_v27 = vld [vmem:[%s3312_s4 + $0x48] sm:$0xff]   ;;  %v2549_v29 = vld [vmem:[%s3312_s4 + $0x50] sm:$0xff]   ;;  %vm825_vm6 = vcmask 58368  }
   0x3   :  { %3329 = sst [smem:[#allocation4_spill]] %s3309_s0  ;;  %s3332_s22 = sld [smem:[#allocation3_spill]]  ;;  %v2100_v13 = vld [vmem:[%s3313_s8] ss:$0 sm:$0xff]  ;;  %v2548_v28 = vld [vmem:[%s3312_s4 + $0x8] sm:$0xff]   ;;  %v2550_v30 = vld [vmem:[%s3312_s4 + $0x10] sm:$0xff]  }
   0x4   :  { %3330 = sst [smem:[#allocation5_spill]] %s3310_s1  ;;  %s3333_s24 = sld [smem:[#allocation4_spill]]  ;;  %v2546_v25 = vld [vmem:[%s3312_s4] sm:$0xff]   ;;  %v2551_v31 = vld [vmem:[%s3312_s4 + $0x58] sm:$0xff]   ;;  %v2555_v35 = vld [vmem:[%s3312_s4 + $0x68] sm:$0xff]   ;;  %v380_v43 = vshrl.u32 %v379_v38, 7 }
   0x5   :  { %s3334_s26 = sld [smem:[#allocation5_spill]]  ;;  %v2552_v32 = vld [vmem:[%s3312_s4 + $0x18] sm:$0xff]   ;;  %v2553_v33 = vld [vmem:[%s3312_s4 + $0x60] sm:$0xff]   ;;  %v2556_v36 = vld [vmem:[%s3312_s4 + $0x28] sm:$0xff]   ;;  %v2661_v40 = vmov 1966171168  }
   0x6   :  { %v2554_v34 = vld [vmem:[%s3312_s4 + $0x20] sm:$0xff]   ;;  %v2558_v37 = vld [vmem:[%s3312_s4 + $0x70] sm:$0xff]   ;;  %v377_v41 = vunpack.c.l.s4 %v2661_v40  ;;  %v2560_v44 = vld [vmem:[%s3314_s11 + $0x8] sm:$0xff]   ;;  %s2664_s9 = smov 32  }
   0x7   :  { %v2557_v39 = vld [vmem:[%s3314_s11] sm:$0xff]   ;;  %v2559_v42 = vld [vmem:[%s3312_s4 + $0x30] sm:$0xff]   ;;  %v2561_v45 = vld [vmem:[%s3312_s4 + $0x78] sm:$0xff]  }
   0x8   :  { %v62_v1 = vld [vmem:[%s3331_s20] sm:$0x7]  ;;  %v378_v47 = vunpack.c.0.s8 %v377_v41  ;;  %v2562_v50 = vld [vmem:[%s3312_s4 + $0x38] sm:$0xff]  }
   0x9   :  { %v137_v2 = vsel %vm135_vm0, %v62_v1, 0  ;;  %v2540_v3 = vld [vmem:[%s3332_s22] sm:$0x1f]   ;;  %v2564_v1 = vld [vmem:[%s3312_s4 + $0x88] sm:$0xff]  }
   0xa   :  { %v2541_v4 = vld [vmem:[%s3333_s24] sm:$0xff]   ;;  %2296 = vmatpush3.bf16.msra.mxu1 %v137_v2  ;;  %v83_v5 = vsel %vm81_vm1, %v2540_v3, 0  ;;  %v381_v49 = vsub.s32 %v378_v47, %v380_v43 }
   0xb   :  { %v2542_v6 = vld [vmem:[%s3334_s26] sm:$0xff]   ;;  %2309 = vmatprep.subr.bf16.mxu1 %v2659_v0  ;;  %2290 = vmatpush3.bf16.msra.mxu0 %v83_v5 }
   0xc   :  { %2301 = vmatprep.subr.bf16.mxu0 %v2659_v0  ;;  %v2109_v46 = vld.sshfl [vmem:[%s3315_s3] sm:$0x13 pattern:$0x75316420] }
   0xd   :  { %2298 = vmatmul.mubr.msk.bf16.vlgmr.msra.gmra.mrb[0].mxu1 %vm131_vm3, %v2541_v4  ;;  %v375_v48 = vcombine.high %v2109_v46, %v2109_v46  ;;  %v382_v52 = vrot.slane %v2109_v46, %v381_v49  ;;  %v2101_v53 = vld [vmem:[%s3316_s10] ss:$0 sm:$0xff] }
   0xe   :  { %2313 = vmatprep.mubr.msk.bf16.mxu1 %vm2660_vm2, %v2659_v0  ;;  %2292 = vmatmul.mubr.msk.bf16.vlgmr.msra.gmra.mrb[0].mxu0 %vm77_vm4, %v2542_v6  ;;  %v2563_v62 = vld [vmem:[%s3312_s4 + $0x80] sm:$0xff]  }
   0xf   :  { %2305 = vmatprep.mubr.msk.bf16.mxu0 %vm2660_vm2, %v2659_v0  ;;  %2302 = vmatpush3.bf16.msra.mxu0 %v2543_v7  ;;  %v389_v51 = vrot.slane %v375_v48, %v381_v49  ;;  %v390_v2 = vcombine.high %v382_v52, %v382_v52 }
  0x10   :  { %2303 = vmatprep.subr.bf16.mxu0 %v2659_v0  ;;  %2310 = vmatpush3.bf16.msra.mxu1 %v2557_v39 }
  0x11   :  { %2311 = vmatprep.subr.bf16.mxu1 %v2659_v0 }
  0x13   :  { %2304 = vmatpush3.bf16.msra.mxu0 %v2544_v8  ;;  %v2565_v8 = vld [vmem:[%s3317_s12] sm:$0xff]  }
  0x14   :  { %2197 = vmatprep.subr.bf16.mxu0 %v2545_v9  ;;  %2312 = vmatpush3.bf16.msra.mxu1 %v2560_v44  ;;  %v2566_v9 = vld [vmem:[%s3317_s12 + $0x8] sm:$0xff]  }
  0x15   :  { %2317 = vmatprep.subr.bf16.mxu1 %v2659_v0 }
  0xe0   :  { %v173_v10 = vpop.f32.mrb[0].mxu1 }
  0xe1   :  { %v2299_v11 = vpop.f32.mrb[1].mxu1  ;;  %v119_v12 = vpop.f32.mrb[0].mxu0 }
  0xe2   :  { %v176_v14 = vpop.f32.mrb[2].mxu1  ;;  %v174_v15 = vadd.f32 %v173_v10, %v119_v12  ;;  %v2293_v16 = vpop.f32.mrb[1].mxu0  ;;  %v652_v10 = vld [vmem:[%s3318_s14] sm:$0xff]  ;;  %v653_v11 = vld [vmem:[%s3318_s14 + $0x8] sm:$0xff]  ;;  %v2662_v12 = vmov 0.0|0.0  }
  0xe3   :  { %v2300_v17 = vpop.f32.mrb[3].mxu1  ;;  %v122_v18 = vpop.f32.mrb[2].mxu0 }
  0xe4   :  { %v187_v19 = vadd.f32 %v2100_v13, %v174_v15  ;;  %v177_v20 = vadd.f32 %v176_v14, %v122_v18  ;;  %v2294_v21 = vpop.f32.mrb[3].mxu0  ;;  %v654_v14 = vld [vmem:[%s3318_s14 + $0x10] sm:$0xff]  ;;  %v655_v15 = vld [vmem:[%s3318_s14 + $0x18] sm:$0xff] }
  0xe5   :  { %v2904_v16 = vpack.c.bf16 %v655_v15, %v654_v14 }
  0xe6   :  { %v188_v22 = vadd.f32 %v2100_v13, %v177_v20  ;;  %2569 = vtanh.f32 %v187_v19  ;;  %v2893_v13 = vpack.c.bf16 %v653_v11, %v652_v10  ;;  %v2108_v20 = vld [vmem:[%s3319_s5] ss:$0 sm:$0xff] }
  0xe8   :  { %2571 = vtanh.f32 %v188_v22 }
  0xf0   :  { %v2570_v23 = vpop.eup %2569 }
  0xf2   :  { %v2572_v24 = vpop.eup %2571 }
  0xf3   :  { %v191_v26 = vpack.c.bf16 %v2572_v24, %v2570_v23 }
  0xf5   :  { %2306 = vmatmul.mubr.msk.bf16.vlgmr.msra.gmra.mrb[4].mxu0 %vm215_vm5, %v191_v26 }
  0xf6   :  { %2198 = vmatpush3.bf16.msra.mxu0 %v2546_v25  ;;  %536 = vmatprep.mubr.bf16.mxu0 %v389_v51 }
  0xf7   :  { %2199 = vmatprep.subr.bf16.mxu0 %v2547_v27 }
  0xfa   :  { %2200 = vmatpush3.bf16.msra.mxu0 %v2548_v28 }
  0xfb   :  { %2201 = vmatprep.subr.bf16.mxu0 %v2549_v29 }
  0xfe   :  { %2202 = vmatpush3.bf16.msra.mxu0 %v2550_v30  ;;  %v2129_v30 = vld [vmem:[%s3320_s13] ss:$0 sm:$0xff]  ;;  %s2663_s13 = smov 64  }
  0xff   :  { %2203 = vmatprep.subr.bf16.mxu0 %v2551_v31 }
 0x102   :  { %2204 = vmatpush3.bf16.msra.mxu0 %v2552_v32 }
 0x103   :  { %2205 = vmatprep.subr.bf16.mxu0 %v2553_v33 }
 0x106   :  { %2206 = vmatpush3.bf16.msra.mxu0 %v2554_v34 }
 0x107   :  { %2207 = vmatprep.subr.bf16.mxu0 %v2555_v35 }
 0x10a   :  { %2208 = vmatpush3.bf16.msra.mxu0 %v2556_v36 }
 0x10b   :  { %2209 = vmatprep.subr.bf16.mxu0 %v2558_v37 }
 0x10e   :  { %2210 = vmatpush3.bf16.msra.mxu0 %v2559_v42 }
 0x10f   :  { %2211 = vmatprep.subr.bf16.mxu0 %v2561_v45 }
 0x112   :  { %2212 = vmatpush3.bf16.msra.mxu0 %v2562_v50 }
 0x113   :  { %2491 = vmatprep.subr.bf16.mxu0 %v2662_v12 }
 0x115   :  { %537 = vmatmul.mubr.bf16.vlgmr.msra.gmra.mrb[8].mxu0 %v382_v52 }
 0x116   :  { %2360 = vmatprep.mubr.msk.f32.mxu0 %vm2660_vm2, %v2659_v0  ;;  %2493 = vmatpush3.bf16.msra.mxu0 %v2893_v13 }
 0x117   :  { %2494 = vmatprep.subr.bf16.mxu0 %v2662_v12 }
 0x11a   :  { %2496 = vmatpush3.bf16.msra.mxu0 %v2904_v16 }
 0x11b   :  { %2497 = vmatprep.subr.bf16.mxu0 %v2662_v12 }
 0x1c8   :  { %v253_v54 = vpop.f32.mrb[4].mxu0 }
 0x1c9   :  { %v254_v55 = vadd.f32 %v2101_v53, %v253_v54  ;;  %v2307_v56 = vpop.f32.mrb[5].mxu0 }
 0x1ca   :  { %v256_v57 = vpop.f32.mrb[6].mxu0 }
 0x1cb   :  { %v257_v58 = vadd.f32 %v2101_v53, %v256_v57  ;;  %v2308_v59 = vpop.f32.mrb[7].mxu0  ;;  %2573 = vtanh.f32 %v254_v55 }
 0x1cd   :  { %2575 = vtanh.f32 %v257_v58 }
 0x1d5   :  { %v2574_v60 = vpop.eup %2573 }
 0x1d7   :  { %v2576_v61 = vpop.eup %2575 }
 0x1d8   :  { %v262_v63 = vpack.c.bf16 %v2576_v61, %v2574_v60 }
 0x1da   :  { %2314 = vmatmul.mubr.msk.bf16.vlgmr.msra.gmra.mrb[4].mxu1 %vm215_vm5, %v262_v63 }
 0x1db   :  { %2318 = vmatpush3.bf16.msra.mxu1 %v2563_v62  ;;  %2321 = vmatprep.mubr.msk.bf16.mxu1 %vm2660_vm2, %v2659_v0 }
 0x1dc   :  { %2319 = vmatprep.subr.bf16.mxu1 %v2659_v0 }
 0x1df   :  { %2320 = vmatpush3.bf16.msra.mxu1 %v2564_v1 }
 0x1e0   :  { %2325 = vmatprep.subr.bf16.mxu1 %v2659_v0 }
 0x1e2   :  { %2322 = vmatmul.mubr.msk.bf16.vlgmr.msra.gmra.mrb[8].mxu1 %vm215_vm5, %v390_v2 }
 0x1e3   :  { %2329 = vmatprep.mubr.msk.bf16.mxu1 %vm2660_vm2, %v2659_v0  ;;  %2326 = vmatpush3.bf16.msra.mxu1 %v2565_v8 }
 0x1e4   :  { %2327 = vmatprep.subr.bf16.mxu1 %v2659_v0 }
 0x1e7   :  { %2328 = vmatpush3.bf16.msra.mxu1 %v2566_v9 }
 0x1e8   :  { %v2213_v3 = vpop.f32.mrb[8].mxu0  ;;  %2485 = vmatprep.subr.bf16.mxu1 %v2662_v12 }
 0x1e9   :  { %v2214_v4 = vpop.f32.mrb[9].mxu0 }
 0x1ea   :  { %v2215_v5 = vadd.f32 %v2214_v4, %v2213_v3  ;;  %v2216_v6 = vpop.f32.mrb[10].mxu0 }
 0x1eb   :  { %v2217_v7 = vpop.f32.mrb[11].mxu0 }
 0x1ec   :  { %v539_v22 = vadd.f32 %v2215_v5, %v2108_v20 }
 0x2ad   :  { %v316_v17 = vpop.f32.mrb[4].mxu1 }
 0x2ae   :  { %v2315_v18 = vpop.f32.mrb[5].mxu1 }
 0x2af   :  { %v319_v19 = vpop.f32.mrb[6].mxu1 }
 0x2b0   :  { %v2316_v21 = vpop.f32.mrb[7].mxu1 }
 0x2b5   :  { %v578_v23 = vpop.f32.mrb[8].mxu1 }
 0x2b6   :  { %v579_v24 = vadd.f32 %v578_v23, %v539_v22  ;;  %v2323_v25 = vpop.f32.mrb[9].mxu1 }
 0x2b7   :  { %v581_v26 = vpop.f32.mrb[10].mxu1 }
 0x2b8   :  { %2577 = vtanh.f32 %v579_v24  ;;  %v2324_v27 = vpop.f32.mrb[11].mxu1 }
 0x2c2   :  { %v2578_v28 = vpop.eup %2577 }
 0x2c3   :  { %v585_v29 = vpack.c.bf16 %v2578_v28, %v2578_v28 }
 0x2c5   :  { %2330 = vmatmul.mubr.msk.bf16.vlgmr.msra.gmra.mrb[12].mxu1 %vm215_vm5, %v585_v29 }
 0x2c6   :  { %2487 = vmatpush3.bf16.msra.mxu1 %v2893_v13  ;;  %2341 = vmatprep.mubr.msk.f32.mxu1 %vm2660_vm2, %v2659_v0 }
 0x2c7   :  { %2488 = vmatprep.subr.bf16.mxu1 %v2662_v12 }
 0x2ca   :  { %2490 = vmatpush3.bf16.msra.mxu1 %v2904_v16 }
 0x2cb   :  { %2344 = vmatprep.subr.bf16.mxu1 %v2659_v0 }
 0x2cd   :  { %2342 = vmatmul.mubr.f32.vlgmr.msra.gmra.mrb[16].mxu1 %v2659_v0 }
 0x2ce   :  { %2348 = vmatprep.mubr.msk.bf16.mxu1 %vm2660_vm2, %v2659_v0 }
 0x398   :  { %v646_v31 = vpop.f32.mrb[12].mxu1 }
 0x399   :  { %v647_v32 = vadd.f32 %v2129_v30, %v646_v31  ;;  %v2331_v33 = vpop.f32.mrb[13].mxu1 }
 0x39a   :  { %v649_v34 = vpop.f32.mrb[14].mxu1 }
 0x39b   :  { %v2332_v35 = vpop.f32.mrb[15].mxu1  ;;  %v661_v36 = vadd.f32 %v647_v32, %v316_v17  ;;  %v844_v37 = vrot.slane %v647_v32, 6  ;;  %v1022_v38 = vrot.slane %v647_v32, 4  ;;  %v1201_v39 = vrot.slane %v647_v32, 2 }
 0x39c   :  { %v2924_v40 = vadd.f32 %v647_v32, %v319_v19 }
 0x39d   :  { %v846_v41 = vadd.f32 %v844_v37, %v316_v17  ;;  %v2926_v42 = vadd.f32 %v1022_v38, %v316_v17  ;;  %v2928_v43 = vadd.f32 %v1201_v39, %v316_v17  ;;  %v2930_v44 = vadd.f32 %v844_v37, %v319_v19 }
 0x39e   :  { %v2932_v45 = vadd.f32 %v1022_v38, %v319_v19  ;;  %v2934_v46 = vadd.f32 %v1201_v39, %v319_v19 }
 0x3a0   :  { %v731_v47 = vpop.f32.mrb[16].mxu1 }
 0x3a1   :  { %v735_v48 = vadd.f32 %v731_v47, %v661_v36  ;;  %v2343_v49 = vpop.f32.mrb[17].mxu1 }
 0x3a3   :  { %2579 = vtanh.f32 %v735_v48  ;;  %v2133_v51 = vmul.f32 -1.442695, %v735_v48 }
 0x3a5   :  { %2581 = vpow2.f32 %v2133_v51 }
 0x3ad   :  { %v2580_v50 = vpop.eup %2579 }
 0x3ae   :  { %745 = vrot.lane.b32.xlu0 %v2580_v50, %s2663_s13 }
 0x3af   :  { %v2582_v52 = vpop.eup %2581 }
 0x3b0   :  { %v739_v53 = vadd.f32 1.0, %v2582_v52 }
 0x3b2   :  { %2583 = vrcp.f32 %v739_v53 }
 0x3bc   :  { %v2584_v54 = vpop.eup %2583 }
 0x3bd   :  { %v743_v57 = vmul.f32 0.0, %v2584_v54 }
 0x420   :  { %v746_v55 = vpop.permute.xlu0 %745 }
 0x421   :  { %v748_v56 = vmul.f32 %v2584_v54, %v746_v55 }
 0x423   :  { %750 = vrot.lane.b32.xlu0 %v748_v56, %s2664_s9 }
 0x495   :  { %v751_v58 = vpop.permute.xlu0 %750 }
 0x496   :  { %v753_v59 = vadd.f32 %v751_v58, %v743_v57 }
 0x498   :  { %2585 = vtanh.f32 %v753_v59  ;;  %v934_v14 = vrot.slane %v753_v59, 6 }
 0x4a2   :  { %v2586_v60 = vpop.eup %2585 }
 0x4a3   :  { %756 = vrot.lane.b32.xlu1 %v2586_v60, %s2663_s13 }
 0x515   :  { %v757_v61 = vpop.permute.xlu1 %756 }
 0x516   :  { %v2939_v62 = vmul.f32 %v2584_v54, %v757_v61 }
 0x518   :  { %848 = vrot.lane.b32.xlu1 %v2939_v62, %s2664_s9 }
 0x58a   :  { %v849_v63 = vpop.permute.xlu1 %848 }
 0x58b   :  { %2361 = vmatmul.mubr.msk.f32.vlgmr.msra.gmra.mrb[12].mxu0 %vm215_vm5, %v849_v63 }
 0x58c   :  { %2499 = vmatpush3.bf16.msra.mxu0 %v2893_v13  ;;  %2379 = vmatprep.mubr.msk.f32.mxu0 %vm2660_vm2, %v2659_v0 }
 0x58d   :  { %2500 = vmatprep.subr.bf16.mxu0 %v2662_v12 }
 0x590   :  { %2502 = vmatpush3.bf16.msra.mxu0 %v2904_v16 }
 0x591   :  { %2503 = vmatprep.subr.bf16.mxu0 %v2662_v12 }
 0x65e   :  { %v918_v1 = vpop.f32.mrb[12].mxu0 }
 0x65f   :  { %v923_v2 = vrot.slane %v918_v1, 6  ;;  %v2362_v3 = vpop.f32.mrb[13].mxu0 }
 0x661   :  { %v925_v4 = vadd.f32 %v923_v2, %v846_v41 }
 0x663   :  { %2587 = vtanh.f32 %v925_v4  ;;  %v2139_v6 = vmul.f32 -1.442695, %v925_v4 }
 0x665   :  { %2589 = vpow2.f32 %v2139_v6 }
 0x66d   :  { %v2588_v5 = vpop.eup %2587 }
 0x66e   :  { %938 = vrot.lane.b32.xlu0 %v2588_v5, %s2663_s13 }
 0x66f   :  { %v2590_v7 = vpop.eup %2589 }
 0x670   :  { %v929_v8 = vadd.f32 1.0, %v2590_v7 }
 0x672   :  { %2591 = vrcp.f32 %v929_v8 }
 0x67c   :  { %v2592_v9 = vpop.eup %2591 }
 0x67d   :  { %v936_v15 = vmul.f32 %v2592_v9, %v934_v14 }
 0x6e0   :  { %v939_v10 = vpop.permute.xlu0 %938 }
 0x6e1   :  { %v941_v11 = vmul.f32 %v2592_v9, %v939_v10 }
 0x6e3   :  { %943 = vrot.lane.b32.xlu1 %v941_v11, %s2664_s9 }
 0x755   :  { %v944_v17 = vpop.permute.xlu1 %943 }
 0x756   :  { %v946_v18 = vadd.f32 %v944_v17, %v936_v15 }
 0x758   :  { %2593 = vtanh.f32 %v946_v18  ;;  %v1113_v35 = vrot.slane %v946_v18, 6 }
 0x762   :  { %v2594_v19 = vpop.eup %2593 }
 0x763   :  { %949 = vrot.lane.b32.xlu0 %v2594_v19, %s2663_s13 }
 0x7d5   :  { %v950_v20 = vpop.permute.xlu0 %949 }
 0x7d6   :  { %v2953_v21 = vmul.f32 %v2592_v9, %v950_v20 }
 0x7d8   :  { %v1026_v22 = vrot.slane %v2953_v21, 2 }
 0x7da   :  { %1027 = vrot.lane.b32.xlu1 %v1026_v22, %s2664_s9 }
 0x84c   :  { %v1028_v23 = vpop.permute.xlu1 %1027 }
 0x84d   :  { %2380 = vmatmul.mubr.msk.f32.vlgmr.msra.gmra.mrb[14].mxu0 %vm215_vm5, %v1028_v23 }
 0x84e   :  { %2505 = vmatpush3.bf16.msra.mxu0 %v2893_v13  ;;  %2398 = vmatprep.mubr.msk.f32.mxu0 %vm2660_vm2, %v2659_v0 }
 0x84f   :  { %2506 = vmatprep.subr.bf16.mxu0 %v2662_v12 }
 0x852   :  { %2508 = vmatpush3.bf16.msra.mxu0 %v2904_v16 }
 0x853   :  { %2509 = vmatprep.subr.bf16.mxu0 %v2662_v12 }
 0x920   :  { %v1097_v24 = vpop.f32.mrb[14].mxu0 }
 0x921   :  { %v1102_v25 = vrot.slane %v1097_v24, 4  ;;  %v2381_v26 = vpop.f32.mrb[15].mxu0 }
 0x923   :  { %v1104_v27 = vadd.f32 %v1102_v25, %v2926_v42 }
 0x925   :  { %2595 = vtanh.f32 %v1104_v27  ;;  %v2146_v29 = vmul.f32 -1.442695, %v1104_v27 }
 0x927   :  { %2597 = vpow2.f32 %v2146_v29 }
 0x92f   :  { %v2596_v28 = vpop.eup %2595 }
 0x930   :  { %1117 = vrot.lane.b32.xlu0 %v2596_v28, %s2663_s13 }
 0x931   :  { %v2598_v30 = vpop.eup %2597 }
 0x932   :  { %v1108_v31 = vadd.f32 1.0, %v2598_v30 }
 0x934   :  { %2599 = vrcp.f32 %v1108_v31 }
 0x93e   :  { %v2600_v32 = vpop.eup %2599 }
 0x93f   :  { %v1115_v36 = vmul.f32 %v2600_v32, %v1113_v35 }
 0x9a2   :  { %v1118_v33 = vpop.permute.xlu0 %1117 }
 0x9a3   :  { %v1120_v34 = vmul.f32 %v2600_v32, %v1118_v33 }
 0x9a5   :  { %1122 = vrot.lane.b32.xlu1 %v1120_v34, %s2664_s9 }
 0xa17   :  { %v1123_v37 = vpop.permute.xlu1 %1122 }
 0xa18   :  { %v1125_v38 = vadd.f32 %v1123_v37, %v1115_v36 }
 0xa1a   :  { %2601 = vtanh.f32 %v1125_v38  ;;  %v1292_v60 = vrot.slane %v1125_v38, 6 }
 0xa24   :  { %v2602_v39 = vpop.eup %2601 }
 0xa25   :  { %1128 = vrot.lane.b32.xlu0 %v2602_v39, %s2663_s13 }
 0xa97   :  { %v1129_v41 = vpop.permute.xlu0 %1128 }
 0xa98   :  { %v2968_v42 = vmul.f32 %v2600_v32, %v1129_v41 }
 0xa9a   :  { %v1205_v47 = vrot.slane %v2968_v42, 4 }
 0xa9c   :  { %1206 = vrot.lane.b32.xlu1 %v1205_v47, %s2664_s9 }
 0xb0e   :  { %v1207_v48 = vpop.permute.xlu1 %1206 }
 0xb0f   :  { %2399 = vmatmul.mubr.msk.f32.vlgmr.msra.gmra.mrb[16].mxu0 %vm215_vm5, %v1207_v48 }
 0xb10   :  { %2511 = vmatpush3.bf16.msra.mxu0 %v2893_v13  ;;  %2417 = vmatprep.mubr.msk.f32.mxu0 %vm2660_vm2, %v2659_v0 }
 0xb11   :  { %2512 = vmatprep.subr.bf16.mxu0 %v2662_v12 }
 0xb14   :  { %2514 = vmatpush3.bf16.msra.mxu0 %v2904_v16 }
 0xb15   :  { %2515 = vmatprep.subr.bf16.mxu0 %v2662_v12 }
 0xbe2   :  { %v1276_v49 = vpop.f32.mrb[16].mxu0 }
 0xbe3   :  { %v1281_v50 = vrot.slane %v1276_v49, 2  ;;  %v2400_v51 = vpop.f32.mrb[17].mxu0 }
 0xbe5   :  { %v1283_v52 = vadd.f32 %v1281_v50, %v2928_v43 }
 0xbe7   :  { %2603 = vtanh.f32 %v1283_v52  ;;  %v2153_v54 = vmul.f32 -1.442695, %v1283_v52 }
 0xbe9   :  { %2605 = vpow2.f32 %v2153_v54 }
 0xbf1   :  { %v2604_v53 = vpop.eup %2603 }
 0xbf2   :  { %1296 = vrot.lane.b32.xlu0 %v2604_v53, %s2663_s13 }
 0xbf3   :  { %v2606_v55 = vpop.eup %2605 }
 0xbf4   :  { %v1287_v56 = vadd.f32 1.0, %v2606_v55 }
 0xbf6   :  { %2607 = vrcp.f32 %v1287_v56 }
 0xc00   :  { %v2608_v57 = vpop.eup %2607 }
 0xc01   :  { %v1294_v61 = vmul.f32 %v2608_v57, %v1292_v60 }
 0xc64   :  { %v1297_v58 = vpop.permute.xlu0 %1296 }
 0xc65   :  { %v1299_v59 = vmul.f32 %v2608_v57, %v1297_v58 }
 0xc67   :  { %1301 = vrot.lane.b32.xlu1 %v1299_v59, %s2664_s9 }
 0xcd9   :  { %v1302_v63 = vpop.permute.xlu1 %1301 }
 0xcda   :  { %v1304_v1 = vadd.f32 %v1302_v63, %v1294_v61 }
 0xcdc   :  { %2609 = vtanh.f32 %v1304_v1  ;;  %v1466_v19 = vrot.slane %v1304_v1, 6 }
 0xce6   :  { %v2610_v43 = vpop.eup %2609 }
 0xce7   :  { %1307 = vrot.lane.b32.xlu0 %v2610_v43, %s2663_s13 }
 0xd59   :  { %v1308_v2 = vpop.permute.xlu0 %1307 }
 0xd5a   :  { %v2983_v3 = vmul.f32 %v2608_v57, %v1308_v2 }
 0xd5c   :  { %v1382_v4 = vrot.slane %v2983_v3, 6 }
 0xd5e   :  { %1383 = vrot.lane.b32.xlu1 %v1382_v4, %s2664_s9 }
 0xdd0   :  { %v1384_v5 = vpop.permute.xlu1 %1383 }
 0xdd1   :  { %2418 = vmatmul.mubr.msk.f32.vlgmr.msra.gmra.mrb[18].mxu0 %vm215_vm5, %v1384_v5 }
 0xdd2   :  { %2517 = vmatpush3.bf16.msra.mxu0 %v2893_v13  ;;  %2436 = vmatprep.mubr.msk.f32.mxu0 %vm2660_vm2, %v2659_v0 }
 0xdd3   :  { %2518 = vmatprep.subr.bf16.mxu0 %v2662_v12 }
 0xdd6   :  { %2520 = vmatpush3.bf16.msra.mxu0 %v2904_v16 }
 0xdd7   :  { %2521 = vmatprep.subr.bf16.mxu0 %v2662_v12 }
 0xea4   :  { %v1453_v6 = vpop.f32.mrb[18].mxu0 }
 0xea5   :  { %v1457_v7 = vadd.f32 %v1453_v6, %v2924_v40  ;;  %v2419_v8 = vpop.f32.mrb[19].mxu0 }
 0xea7   :  { %2611 = vtanh.f32 %v1457_v7  ;;  %v2160_v10 = vmul.f32 -1.442695, %v1457_v7 }
 0xea9   :  { %2613 = vpow2.f32 %v2160_v10 }
 0xeb1   :  { %v2612_v9 = vpop.eup %2611 }
 0xeb2   :  { %1470 = vrot.lane.b32.xlu0 %v2612_v9, %s2663_s13 }
 0xeb3   :  { %v2614_v11 = vpop.eup %2613 }
 0xeb4   :  { %v1461_v14 = vadd.f32 1.0, %v2614_v11  ;;  %v3034_v11 = vld [vmem:[%s3321_s15] sm:$0xff]  }
 0xeb5   :  { %2345 = vmatpush3.bf16.msra.mxu1 %v3034_v11 }
 0xeb6   :  { %2615 = vrcp.f32 %v1461_v14  ;;  %2346 = vmatprep.subr.bf16.mxu1 %v2659_v0 }
 0xec0   :  { %v2616_v15 = vpop.eup %2615 }
 0xec1   :  { %v1468_v20 = vmul.f32 %v2616_v15, %v1466_v19 }
 0xf24   :  { %v1471_v17 = vpop.permute.xlu0 %1470 }
 0xf25   :  { %v1473_v18 = vmul.f32 %v2616_v15, %v1471_v17 }
 0xf27   :  { %1475 = vrot.lane.b32.xlu1 %v1473_v18, %s2664_s9 }
 0xf99   :  { %v1476_v22 = vpop.permute.xlu1 %1475 }
 0xf9a   :  { %v1478_v23 = vadd.f32 %v1476_v22, %v1468_v20  ;;  %v760_v22 = vpack.c.bf16 %v2939_v62, %v2939_v62 }
 0xf9c   :  { %2617 = vtanh.f32 %v1478_v23  ;;  %v1641_v38 = vrot.slane %v1478_v23, 6  ;;  %v1132_v23 = vpack.c.bf16 %v2968_v42, %v2968_v42 }
 0xfa6   :  { %v2618_v40 = vpop.eup %2617 }
 0xfa7   :  { %1481 = vrot.lane.b32.xlu0 %v2618_v40, %s2663_s13  ;;  %v1134_v40 = vrot.slane %v1132_v23, 2 }
0x1019   :  { %v1482_v24 = vpop.permute.xlu0 %1481 }
0x101a   :  { %v2998_v25 = vmul.f32 %v2616_v15, %v1482_v24 }
0x101c   :  { %1555 = vrot.lane.b32.xlu1 %v2998_v25, %s2664_s9  ;;  %v1485_v24 = vpack.c.bf16 %v2998_v25, %v2998_v25  ;;  %v953_v25 = vpack.c.bf16 %v2953_v21, %v2953_v21 }
0x108e   :  { %v1556_v26 = vpop.permute.xlu1 %1555 }
0x108f   :  { %2437 = vmatmul.mubr.msk.f32.vlgmr.msra.gmra.mrb[20].mxu0 %vm215_vm5, %v1556_v26 }
0x1090   :  { %2523 = vmatpush3.bf16.msra.mxu0 %v2893_v13  ;;  %2455 = vmatprep.mubr.msk.f32.mxu0 %vm2660_vm2, %v2659_v0 }
0x1091   :  { %2524 = vmatprep.subr.bf16.mxu0 %v2662_v12 }
0x1094   :  { %2526 = vmatpush3.bf16.msra.mxu0 %v2904_v16 }
0x1095   :  { %2527 = vmatprep.subr.bf16.mxu0 %v2662_v12 }
0x1162   :  { %v1625_v27 = vpop.f32.mrb[20].mxu0 }
0x1163   :  { %v1630_v28 = vrot.slane %v1625_v27, 6  ;;  %v2438_v29 = vpop.f32.mrb[21].mxu0 }
0x1165   :  { %v1632_v30 = vadd.f32 %v1630_v28, %v2930_v44 }
0x1167   :  { %2619 = vtanh.f32 %v1632_v30  ;;  %v2167_v32 = vmul.f32 -1.442695, %v1632_v30 }
0x1169   :  { %2621 = vpow2.f32 %v2167_v32  ;;  %v955_v32 = vrot.slane %v953_v25, 1 }
0x1171   :  { %v2620_v31 = vpop.eup %2619 }
0x1172   :  { %1645 = vrot.lane.b32.xlu0 %v2620_v31, %s2663_s13 }
0x1173   :  { %v2622_v33 = vpop.eup %2621 }
0x1174   :  { %v1636_v34 = vadd.f32 1.0, %v2622_v33  ;;  %v1311_v33 = vpack.c.bf16 %v2983_v3, %v2983_v3 }
0x1176   :  { %2623 = vrcp.f32 %v1636_v34  ;;  %v1313_v34 = vrot.slane %v1311_v33, 3 }
0x1180   :  { %v2624_v35 = vpop.eup %2623 }
0x1181   :  { %v1643_v39 = vmul.f32 %v2624_v35, %v1641_v38 }
0x11e4   :  { %v1646_v36 = vpop.permute.xlu0 %1645 }
0x11e5   :  { %v1648_v37 = vmul.f32 %v2624_v35, %v1646_v36 }
0x11e7   :  { %1650 = vrot.lane.b32.xlu1 %v1648_v37, %s2664_s9 }
0x1259   :  { %v1651_v41 = vpop.permute.xlu1 %1650 }
0x125a   :  { %v1653_v47 = vadd.f32 %v1651_v41, %v1643_v39 }
0x125c   :  { %2625 = vtanh.f32 %v1653_v47 }
0x1266   :  { %v2626_v44 = vpop.eup %2625 }
0x1267   :  { %1656 = vrot.lane.b32.xlu0 %v2626_v44, %s2663_s13 }
0x12d9   :  { %v1657_v48 = vpop.permute.xlu0 %1656 }
0x12da   :  { %v3013_v49 = vmul.f32 %v2624_v35, %v1657_v48 }
0x12dc   :  { %v1731_v50 = vrot.slane %v3013_v49, 2  ;;  %v1660_v35 = vpack.c.bf16 %v3013_v49, %v3013_v49 }
0x12de   :  { %1732 = vrot.lane.b32.xlu1 %v1731_v50, %s2664_s9  ;;  %v1662_v36 = vrot.slane %v1660_v35, 1  ;;  %v3118_v50 = vld [vmem:[%s3322_s16] ss:$0 sm:$0xff]  ;;  %s2665_s16 = smov 120  }
0x1350   :  { %v1733_v51 = vpop.permute.xlu1 %1732 }
0x1351   :  { %2456 = vmatmul.mubr.msk.f32.vlgmr.msra.gmra.mrb[22].mxu0 %vm215_vm5, %v1733_v51 }
0x1352   :  { %2529 = vmatpush3.bf16.msra.mxu0 %v2893_v13  ;;  %2474 = vmatprep.mubr.msk.f32.mxu0 %vm2660_vm2, %v2659_v0 }
0x1353   :  { %2530 = vmatprep.subr.bf16.mxu0 %v2662_v12  ;;  %v1818_v12 = vrot.slane %v1653_v47, 6 }
0x1356   :  { %2532 = vmatpush3.bf16.msra.mxu0 %v2904_v16 }
0x1424   :  { %v1802_v52 = vpop.f32.mrb[22].mxu0 }
0x1425   :  { %v1807_v53 = vrot.slane %v1802_v52, 4  ;;  %v2457_v54 = vpop.f32.mrb[23].mxu0 }
0x1427   :  { %v1809_v55 = vadd.f32 %v1807_v53, %v2932_v45 }
0x1429   :  { %2627 = vtanh.f32 %v1809_v55  ;;  %v2174_v57 = vmul.f32 -1.442695, %v1809_v55 }
0x142b   :  { %2629 = vpow2.f32 %v2174_v57 }
0x1433   :  { %v2628_v56 = vpop.eup %2627 }
0x1434   :  { %1822 = vrot.lane.b32.xlu0 %v2628_v56, %s2663_s13 }
0x1435   :  { %v2630_v58 = vpop.eup %2629 }
0x1436   :  { %v1813_v13 = vadd.f32 1.0, %v2630_v58 }
0x1438   :  { %2631 = vrcp.f32 %v1813_v13 }
0x1442   :  { %v2632_v59 = vpop.eup %2631 }
0x1443   :  { %v1820_v16 = vmul.f32 %v2632_v59, %v1818_v12  ;;  %v832_v12 = vld [vmem:[%s3324_s2] sm:$0x3] }
0x14a6   :  { %v1823_v60 = vpop.permute.xlu0 %1822 }
0x14a7   :  { %v1825_v61 = vmul.f32 %v2632_v59, %v1823_v60 }
0x14a9   :  { %1827 = vrot.lane.b32.xlu1 %v1825_v61, %s2664_s9 }
0x151b   :  { %v1828_v63 = vpop.permute.xlu1 %1827 }
0x151c   :  { %v1830_v1 = vadd.f32 %v1828_v63, %v1820_v16 }
0x151e   :  { %2633 = vtanh.f32 %v1830_v1  ;;  %v1995_v28 = vrot.slane %v1830_v1, 6 }
0x1528   :  { %v2634_v45 = vpop.eup %2633 }
0x1529   :  { %1833 = vrot.lane.b32.xlu0 %v2634_v45, %s2663_s13 }
0x159b   :  { %v1834_v43 = vpop.permute.xlu0 %1833 }
0x159c   :  { %v1836_v2 = vmul.f32 %v2632_v59, %v1834_v43 }
0x159e   :  { %v1908_v4 = vrot.slane %v1836_v2, 4  ;;  %v1837_v26 = vpack.c.bf16 %v1836_v2, %v1836_v2 }
0x15a0   :  { %1909 = vrot.lane.b32.xlu1 %v1908_v4, %s2664_s9  ;;  %v1839_v27 = vrot.slane %v1837_v26, 2 }
0x1612   :  { %v1910_v5 = vpop.permute.xlu1 %1909 }
0x1613   :  { %2475 = vmatmul.mubr.msk.f32.vlgmr.msra.gmra.mrb[24].mxu0 %vm215_vm5, %v1910_v5 }
0x16e6   :  { %v1979_v6 = vpop.f32.mrb[24].mxu0 }
0x16e7   :  { %v1984_v7 = vrot.slane %v1979_v6, 2  ;;  %v2476_v8 = vpop.f32.mrb[25].mxu0 }
0x16e9   :  { %v1986_v9 = vadd.f32 %v1984_v7, %v2934_v46  ;;  %v3041_v46 = vld [vmem:[%s3321_s15 + $0x8] sm:$0xff]  }
0x16ea   :  { %2347 = vmatpush3.bf16.msra.mxu1 %v3041_v46 }
0x16eb   :  { %2635 = vtanh.f32 %v1986_v9  ;;  %v2181_v14 = vmul.f32 -1.442695, %v1986_v9  ;;  %2363 = vmatprep.subr.bf16.mxu1 %v2659_v0 }
0x16ed   :  { %2637 = vpow2.f32 %v2181_v14 }
0x16f5   :  { %v2636_v10 = vpop.eup %2635 }
0x16f6   :  { %1999 = vrot.lane.b32.xlu0 %v2636_v10, %s2663_s13 }
0x16f7   :  { %v2638_v15 = vpop.eup %2637 }
0x16f8   :  { %v1990_v17 = vadd.f32 1.0, %v2638_v15 }
0x16fa   :  { %2639 = vrcp.f32 %v1990_v17 }
0x1704   :  { %v2640_v18 = vpop.eup %2639 }
0x1705   :  { %v1997_v29 = vmul.f32 %v2640_v18, %v1995_v28 }
0x1768   :  { %v2000_v19 = vpop.permute.xlu0 %1999 }
0x1769   :  { %v2002_v20 = vmul.f32 %v2640_v18, %v2000_v19 }
0x176b   :  { %2004 = vrot.lane.b32.xlu1 %v2002_v20, %s2664_s9 }
0x176f   :  { %768 = vrot.lane.b32.xlu1 %v760_v22, %s2664_s9 }
0x1773   :  { %1135 = vrot.lane.b32.xlu1 %v1134_v40, %s2664_s9 }
0x1777   :  { %1487 = vrot.lane.b32.xlu1 %v1485_v24, %s2664_s9 }
0x177b   :  { %1840 = vrot.lane.b32.xlu1 %v1839_v27, %s2664_s9 }
0x17dd   :  { %v2005_v62 = vpop.permute.xlu1 %2004 }
0x17de   :  { %v2007_v30 = vadd.f32 %v2005_v62, %v1997_v29 }
0x17e0   :  { %2641 = vtanh.f32 %v2007_v30 }
0x17e1   :  { %v769_v42 = vpop.permute.xlu1 %768 }
0x17e2   :  { %2349 = vmatmul.mubr.msk.bf16.vlgmr.msra.gmra.mrb[20].mxu1 %vm215_vm5, %v769_v42 }
0x17e3   :  { %2364 = vmatpush3.bf16.msra.mxu1 %v3034_v11  ;;  %2367 = vmatprep.mubr.msk.bf16.mxu1 %vm2660_vm2, %v2659_v0 }
0x17e4   :  { %2365 = vmatprep.subr.bf16.mxu1 %v2659_v0 }
0x17e5   :  { %v1136_v3 = vpop.permute.xlu1 %1135 }
0x17e7   :  { %2366 = vmatpush3.bf16.msra.mxu1 %v3041_v46 }
0x17e8   :  { %2382 = vmatprep.subr.bf16.mxu1 %v2659_v0 }
0x17e9   :  { %v1488_v44 = vpop.permute.xlu1 %1487 }
0x17ea   :  { %v2642_v31 = vpop.eup %2641 }
0x17eb   :  { %2010 = vrot.lane.b32.xlu0 %v2642_v31, %s2663_s13 }
0x17ed   :  { %v1841_v49 = vpop.permute.xlu1 %1840 }
0x17ef   :  { %956 = vrot.lane.b32.xlu0 %v955_v32, %s2664_s9 }
0x17f3   :  { %1314 = vrot.lane.b32.xlu0 %v1313_v34, %s2664_s9 }
0x17f7   :  { %1663 = vrot.lane.b32.xlu0 %v1662_v36, %s2664_s9 }
0x185d   :  { %v2011_v37 = vpop.permute.xlu0 %2010 }
0x185e   :  { %v2013_v21 = vmul.f32 %v2640_v18, %v2011_v37 }
0x1860   :  { %v2014_v38 = vpack.c.bf16 %v2013_v21, %v2013_v21 }
0x1861   :  { %v957_v39 = vpop.permute.xlu0 %956 }
0x1862   :  { %v2016_v41 = vrot.slane %v2014_v38, 3  ;;  %2368 = vmatmul.mubr.msk.bf16.vlgmr.msra.gmra.mrb[24].mxu1 %vm215_vm5, %v957_v39 }
0x1863   :  { %2383 = vmatpush3.bf16.msra.mxu1 %v3034_v11  ;;  %2386 = vmatprep.mubr.msk.bf16.mxu1 %vm2660_vm2, %v2659_v0 }
0x1864   :  { %2017 = vrot.lane.b32.xlu0 %v2016_v41, %s2664_s9  ;;  %2384 = vmatprep.subr.bf16.mxu1 %v2659_v0 }
0x1865   :  { %v1315_v47 = vpop.permute.xlu0 %1314 }
0x1867   :  { %2385 = vmatpush3.bf16.msra.mxu1 %v3041_v46 }
0x1868   :  { %2401 = vmatprep.subr.bf16.mxu1 %v2659_v0 }
0x1869   :  { %v1664_v48 = vpop.permute.xlu0 %1663 }
0x186a   :  { %2387 = vmatmul.mubr.msk.bf16.vlgmr.msra.gmra.mrb[28].mxu1 %vm215_vm5, %v1136_v3 }
0x186b   :  { %2402 = vmatpush3.bf16.msra.mxu1 %v3034_v11  ;;  %2405 = vmatprep.mubr.msk.bf16.mxu1 %vm2660_vm2, %v2659_v0 }
0x186c   :  { %2403 = vmatprep.subr.bf16.mxu1 %v2659_v0 }
0x186f   :  { %2404 = vmatpush3.bf16.msra.mxu1 %v3041_v46 }
0x1870   :  { %2420 = vmatprep.subr.bf16.mxu1 %v2659_v0 }
0x1872   :  { %2406 = vmatmul.mubr.msk.bf16.vlgmr.msra.gmra.mrb[32].mxu1 %vm215_vm5, %v1315_v47 }
0x1873   :  { %2421 = vmatpush3.bf16.msra.mxu1 %v3034_v11  ;;  %2424 = vmatprep.mubr.msk.bf16.mxu1 %vm2660_vm2, %v2659_v0 }
0x1874   :  { %2422 = vmatprep.subr.bf16.mxu1 %v2659_v0 }
0x1877   :  { %2423 = vmatpush3.bf16.msra.mxu1 %v3041_v46 }
0x1878   :  { %2439 = vmatprep.subr.bf16.mxu1 %v2659_v0 }
0x187a   :  { %2425 = vmatmul.mubr.msk.bf16.vlgmr.msra.gmra.mrb[36].mxu1 %vm215_vm5, %v1488_v44 }
0x187b   :  { %2440 = vmatpush3.bf16.msra.mxu1 %v3034_v11  ;;  %2443 = vmatprep.mubr.msk.bf16.mxu1 %vm2660_vm2, %v2659_v0 }
0x187c   :  { %2441 = vmatprep.subr.bf16.mxu1 %v2659_v0 }
0x187f   :  { %2442 = vmatpush3.bf16.msra.mxu1 %v3041_v46 }
0x1880   :  { %2458 = vmatprep.subr.bf16.mxu1 %v2659_v0 }
0x1882   :  { %2444 = vmatmul.mubr.msk.bf16.vlgmr.msra.gmra.mrb[40].mxu1 %vm215_vm5, %v1664_v48 }
0x1883   :  { %2459 = vmatpush3.bf16.msra.mxu1 %v3034_v11  ;;  %2462 = vmatprep.mubr.msk.bf16.mxu1 %vm2660_vm2, %v2659_v0 }
0x1884   :  { %2460 = vmatprep.subr.bf16.mxu1 %v2659_v0 }
0x1887   :  { %2461 = vmatpush3.bf16.msra.mxu1 %v3041_v46 }
0x1888   :  { %2477 = vmatprep.subr.bf16.mxu1 %v2659_v0 }
0x188a   :  { %2463 = vmatmul.mubr.msk.bf16.vlgmr.msra.gmra.mrb[44].mxu1 %vm215_vm5, %v1841_v49 }
0x188b   :  { %2478 = vmatpush3.bf16.msra.mxu1 %v3034_v11  ;;  %2481 = vmatprep.mubr.msk.bf16.mxu1 %vm2660_vm2, %v2659_v0 }
0x188c   :  { %2479 = vmatprep.subr.bf16.mxu1 %v2659_v0 }
0x188f   :  { %2480 = vmatpush3.bf16.msra.mxu1 %v3041_v46 }
0x18b5   :  { %v819_v51 = vpop.f32.mrb[20].mxu1 }
0x18b6   :  { %v3121_v52 = vadd.f32 %v3118_v50, %v819_v51  ;;  %v2350_v53 = vpop.f32.mrb[21].mxu1 }
0x18b7   :  { %v822_v54 = vpop.f32.mrb[22].mxu1 }
0x18b8   :  { %826 = vst.msk [vmem:[%s3323_s17] sm:$0x3] %vm825_vm6, %v3121_v52  ;;  %v833_v0 = vmul.f32 0.5, %v3121_v52  ;;  %v2351_v55 = vpop.f32.mrb[23].mxu1 }
0x18b9   :  { %v2143_v55 = vld [vmem:[%s3324_s2 + $0x2] sm:$0x3] }
0x18ba   :  { %v834_v56 = vmul.f32 1.442695, %v833_v0 }
0x18bc   :  { %2643 = vpow2.f32 %v834_v56 }
0x18c6   :  { %v2644_v57 = vpop.eup %2643 }
0x18c7   :  { %837 = vrot.lane.b32.xlu1 %v2644_v57, %s2665_s16 }
0x18d6   :  { %v2018_v58 = vpop.permute.xlu0 %2017 }
0x18d7   :  { %2482 = vmatmul.mubr.msk.bf16.vlgmr.msra.gmra.mrb[48].mxu1 %vm215_vm5, %v2018_v58 }
0x1935   :  { %v995_v13 = vpop.f32.mrb[24].mxu1 }
0x1936   :  { %v3132_v59 = vadd.f32 %v3118_v50, %v995_v13  ;;  %v2369_v60 = vpop.f32.mrb[25].mxu1  ;;  %v2150_v13 = vld [vmem:[%s3324_s2 + $0x4] sm:$0x3] }
0x1937   :  { %v998_v61 = vpop.f32.mrb[26].mxu1 }
0x1938   :  { %2141 = vst.msk [vmem:[%s3323_s17 + $0x2] sm:$0x3] %vm825_vm6, %v3132_v59  ;;  %v1011_v16 = vmul.f32 0.5, %v3132_v59  ;;  %v2370_v63 = vpop.f32.mrb[27].mxu1 }
0x1939   :  { %v838_v1 = vpop.permute.xlu1 %837 }
0x193a   :  { %v1012_v45 = vmul.f32 1.442695, %v1011_v16  ;;  %v840_v43 = vmul.f32 %v838_v1, %v832_v12 }
0x193c   :  { %2645 = vpow2.f32 %v1012_v45  ;;  %v841_v2 = vadd.f32 %v840_v43, %v3121_v52  ;;  %v2164_v45 = vld [vmem:[%s3324_s2 + $0x8] sm:$0x3] }
0x193d   :  { %v1174_v4 = vpop.f32.mrb[28].mxu1 }
0x193e   :  { %842 = vst.msk [vmem:[%s3325_s19] sm:$0x3] %vm825_vm6, %v841_v2  ;;  %v3149_v5 = vadd.f32 %v3118_v50, %v1174_v4  ;;  %v2388_v6 = vpop.f32.mrb[29].mxu1 }
0x193f   :  { %v1177_v7 = vpop.f32.mrb[30].mxu1 }
0x1940   :  { %2148 = vst.msk [vmem:[%s3323_s17 + $0x4] sm:$0x3] %vm825_vm6, %v3149_v5  ;;  %v1190_v8 = vmul.f32 0.5, %v3149_v5  ;;  %v2389_v9 = vpop.f32.mrb[31].mxu1 }
0x1942   :  { %v1191_v10 = vmul.f32 1.442695, %v1190_v8 }
0x1944   :  { %2647 = vpow2.f32 %v1191_v10  ;;  %v2178_v10 = vld [vmem:[%s3324_s2 + $0xc] sm:$0x3] }
0x1945   :  { %v1353_v11 = vpop.f32.mrb[32].mxu1 }
0x1946   :  { %v2646_v14 = vpop.eup %2645  ;;  %v3158_v15 = vadd.f32 %v3118_v50, %v1353_v11  ;;  %v2407_v17 = vpop.f32.mrb[33].mxu1 }
0x1947   :  { %1015 = vrot.lane.b32.xlu0 %v2646_v14, %s2665_s16  ;;  %v1356_v46 = vpop.f32.mrb[34].mxu1 }
0x1948   :  { %2155 = vst.msk [vmem:[%s3323_s17 + $0x6] sm:$0x3] %vm825_vm6, %v3158_v15  ;;  %v1369_v18 = vmul.f32 0.5, %v3158_v15  ;;  %v2408_v19 = vpop.f32.mrb[35].mxu1 }
0x194a   :  { %v1370_v20 = vmul.f32 1.442695, %v1369_v18 }
0x194c   :  { %2649 = vpow2.f32 %v1370_v20 }
0x194d   :  { %v1526_v22 = vpop.f32.mrb[36].mxu1 }
0x194e   :  { %v2648_v23 = vpop.eup %2647  ;;  %v3168_v40 = vadd.f32 %v3118_v50, %v1526_v22  ;;  %v2426_v24 = vpop.f32.mrb[37].mxu1 }
0x194f   :  { %1194 = vrot.lane.b32.xlu1 %v2648_v23, %s2665_s16  ;;  %v1529_v26 = vpop.f32.mrb[38].mxu1  ;;  %v2185_v23 = vld [vmem:[%s3324_s2 + $0xe] sm:$0x3] }
0x1950   :  { %2162 = vst.msk [vmem:[%s3323_s17 + $0x8] sm:$0x3] %vm825_vm6, %v3168_v40  ;;  %v1542_v27 = vmul.f32 0.5, %v3168_v40  ;;  %v2427_v28 = vpop.f32.mrb[39].mxu1 }
0x1952   :  { %v1543_v29 = vmul.f32 1.442695, %v1542_v27 }
0x1954   :  { %2651 = vpow2.f32 %v1543_v29 }
0x1955   :  { %v1702_v62 = vpop.f32.mrb[40].mxu1 }
0x1956   :  { %v2650_v30 = vpop.eup %2649  ;;  %v3178_v42 = vadd.f32 %v3118_v50, %v1702_v62  ;;  %v2445_v25 = vpop.f32.mrb[41].mxu1 }
0x1957   :  { %1373 = vrot.lane.b32.xlu0 %v2650_v30, %s2665_s16  ;;  %v1705_v31 = vpop.f32.mrb[42].mxu1 }
0x1958   :  { %2169 = vst.msk [vmem:[%s3323_s17 + $0xa] sm:$0x3] %vm825_vm6, %v3178_v42  ;;  %v1718_v32 = vmul.f32 0.5, %v3178_v42  ;;  %v2446_v33 = vpop.f32.mrb[43].mxu1 }
0x195a   :  { %v1719_v34 = vmul.f32 1.442695, %v1718_v32 }
0x195c   :  { %2653 = vpow2.f32 %v1719_v34 }
0x195d   :  { %v1879_v35 = vpop.f32.mrb[44].mxu1 }
0x195e   :  { %v2652_v36 = vpop.eup %2651  ;;  %v3188_v37 = vadd.f32 %v3118_v50, %v1879_v35  ;;  %v2464_v21 = vpop.f32.mrb[45].mxu1 }
0x195f   :  { %1546 = vrot.lane.b32.xlu1 %v2652_v36, %s2665_s16  ;;  %v1882_v38 = vpop.f32.mrb[46].mxu1 }
0x1960   :  { %2176 = vst.msk [vmem:[%s3323_s17 + $0xc] sm:$0x3] %vm825_vm6, %v3188_v37  ;;  %v1895_v39 = vmul.f32 0.5, %v3188_v37  ;;  %v2465_v41 = vpop.f32.mrb[47].mxu1 }
0x1962   :  { %v1896_v3 = vmul.f32 1.442695, %v1895_v39 }
0x1964   :  { %2655 = vpow2.f32 %v1896_v3 }
0x1966   :  { %v2654_v47 = vpop.eup %2653 }
0x1967   :  { %1722 = vrot.lane.b32.xlu0 %v2654_v47, %s2665_s16 }
0x196b   :  { %1004 = vrot.lane.b32.xlu0 %v3132_v59, %s2665_s16 }
0x196e   :  { %v2656_v44 = vpop.eup %2655 }
0x196f   :  { %1362 = vrot.lane.b32.xlu0 %v3158_v15, %s2665_s16  ;;  %1899 = vrot.lane.b32.xlu1 %v2656_v44, %s2665_s16 }
0x1973   :  { %1711 = vrot.lane.b32.xlu0 %v3178_v42, %s2665_s16  ;;  %828 = vrot.lane.b32.xlu1 %v3121_v52, %s2665_s16 }
0x1977   :  { %1183 = vrot.lane.b32.xlu1 %v3149_v5, %s2665_s16 }
0x197b   :  { %1535 = vrot.lane.b32.xlu1 %v3168_v40, %s2665_s16 }
0x197f   :  { %1888 = vrot.lane.b32.xlu1 %v3188_v37, %s2665_s16 }
0x19aa   :  { %v2056_v48 = vpop.f32.mrb[48].mxu1 }
0x19ab   :  { %v2057_v49 = vadd.f32 %v3118_v50, %v2056_v48  ;;  %v2483_v51 = vpop.f32.mrb[49].mxu1 }
0x19ac   :  { %v2059_v53 = vpop.f32.mrb[50].mxu1 }
0x19ad   :  { %2183 = vst.msk [vmem:[%s3323_s17 + $0xe] sm:$0x3] %vm825_vm6, %v2057_v49  ;;  %v2072_v52 = vmul.f32 0.5, %v2057_v49  ;;  %v2484_v54 = vpop.f32.mrb[51].mxu1 }
0x19af   :  { %v2073_v0 = vmul.f32 1.442695, %v2072_v52 }
0x19b1   :  { %2657 = vpow2.f32 %v2073_v0 }
0x19b9   :  { %v1016_v56 = vpop.permute.xlu0 %1015 }
0x19ba   :  { %v1018_v57 = vmul.f32 %v2143_v55, %v1016_v56 }
0x19bb   :  { %v2658_v58 = vpop.eup %2657 }
0x19bc   :  { %v1019_v50 = vadd.f32 %v1018_v57, %v3132_v59  ;;  %2076 = vrot.lane.b32.xlu0 %v2658_v58, %s2665_s16  ;;  %v2157_v59 = vld [vmem:[%s3324_s2 + $0x6] sm:$0x3] }
0x19be   :  { %2144 = vst.msk [vmem:[%s3325_s19 + $0x2] sm:$0x3] %vm825_vm6, %v1019_v50 }
0x19c0   :  { %2065 = vrot.lane.b32.xlu0 %v2057_v49, %s2665_s16 }
0x19c1   :  { %v1195_v60 = vpop.permute.xlu1 %1194 }
0x19c2   :  { %v1197_v61 = vmul.f32 %v2150_v13, %v1195_v60 }
0x19c4   :  { %v1198_v12 = vadd.f32 %v1197_v61, %v3149_v5  ;;  %v2171_v5 = vld [vmem:[%s3324_s2 + $0xa] sm:$0x3] }
0x19c6   :  { %2151 = vst.msk [vmem:[%s3325_s19 + $0x4] sm:$0x3] %vm825_vm6, %v1198_v12 }
0x19c9   :  { %v1374_v16 = vpop.permute.xlu0 %1373 }
0x19ca   :  { %v1376_v63 = vmul.f32 %v2157_v59, %v1374_v16 }
0x19cc   :  { %v1377_v1 = vadd.f32 %v1376_v63, %v3158_v15 }
0x19ce   :  { %2158 = vst.msk [vmem:[%s3325_s19 + $0x6] sm:$0x3] %vm825_vm6, %v1377_v1 }
0x19d1   :  { %v1547_v43 = vpop.permute.xlu1 %1546 }
0x19d2   :  { %v1549_v2 = vmul.f32 %v2164_v45, %v1547_v43 }
0x19d4   :  { %v1550_v4 = vadd.f32 %v1549_v2, %v3168_v40 }
0x19d6   :  { %2165 = vst.msk [vmem:[%s3325_s19 + $0x8] sm:$0x3] %vm825_vm6, %v1550_v4 }
0x19d9   :  { %v1723_v6 = vpop.permute.xlu0 %1722 }
0x19da   :  { %v1725_v7 = vmul.f32 %v2171_v5, %v1723_v6 }
0x19dc   :  { %v1726_v8 = vadd.f32 %v1725_v7, %v3178_v42 }
0x19dd   :  { %v1005_v9 = vpop.permute.xlu0 %1004 }
0x19de   :  { %2172 = vst.msk [vmem:[%s3325_s19 + $0xa] sm:$0x3] %vm825_vm6, %v1726_v8  ;;  %2142 = vst.msk [vmem:[%s3326_s18 + $0x2] sm:$0x3] %vm825_vm6, %v1005_v9 }
0x19e1   :  { %v1363_v11 = vpop.permute.xlu0 %1362  ;;  %v1900_v14 = vpop.permute.xlu1 %1899 }
0x19e2   :  { %2156 = vst.msk [vmem:[%s3326_s18 + $0x6] sm:$0x3] %vm825_vm6, %v1363_v11  ;;  %v1902_v15 = vmul.f32 %v2178_v10, %v1900_v14 }
0x19e4   :  { %v1903_v17 = vadd.f32 %v1902_v15, %v3188_v37 }
0x19e5   :  { %v1712_v46 = vpop.permute.xlu0 %1711  ;;  %v829_v18 = vpop.permute.xlu1 %828 }
0x19e6   :  { %2179 = vst.msk [vmem:[%s3325_s19 + $0xc] sm:$0x3] %vm825_vm6, %v1903_v17  ;;  %2170 = vst.msk [vmem:[%s3326_s18 + $0xa] sm:$0x3] %vm825_vm6, %v1712_v46 }
0x19e7   :  { %831 = vst.msk [vmem:[%s3326_s18] sm:$0x3] %vm825_vm6, %v829_v18 }
0x19e9   :  { %v1184_v19 = vpop.permute.xlu1 %1183 }
0x19ea   :  { %2149 = vst.msk [vmem:[%s3326_s18 + $0x4] sm:$0x3] %vm825_vm6, %v1184_v19 }
0x19ed   :  { %v1536_v20 = vpop.permute.xlu1 %1535 }
0x19ee   :  { %2163 = vst.msk [vmem:[%s3326_s18 + $0x8] sm:$0x3] %vm825_vm6, %v1536_v20 }
0x19f1   :  { %v1889_v22 = vpop.permute.xlu1 %1888 }
0x19f2   :  { %2177 = vst.msk [vmem:[%s3326_s18 + $0xc] sm:$0x3] %vm825_vm6, %v1889_v22 }
0x1a2e   :  { %v2077_v40 = vpop.permute.xlu0 %2076 }
0x1a2f   :  { %v2079_v24 = vmul.f32 %v2185_v23, %v2077_v40 }
0x1a31   :  { %v2080_v26 = vadd.f32 %v2079_v24, %v2057_v49 }
0x1a32   :  { %v2066_v27 = vpop.permute.xlu0 %2065 }
0x1a33   :  { %2186 = vst.msk [vmem:[%s3325_s19 + $0xe] sm:$0x3] %vm825_vm6, %v2080_v26  ;;  %2184 = vst.msk [vmem:[%s3326_s18 + $0xe] sm:$0x3] %vm825_vm6, %v2066_v27 }

</bundles_post_ra>
